<compile_context>
chip_gen: v5e
topology: v5e:2x2
jax: 0.10.0
libtpu: 0.0.40
codegen_flags: <defaults>
</compile_context>

<pallas_src>
import functools

import jax
import jax.numpy as jnp
from jax import lax
from jax.experimental import pallas as pl
from jax.experimental.pallas import tpu as pltpu


# ----------------------------------------------------------------------------
# Config-like constants (small synthetic sizes consistent with the module).
# ----------------------------------------------------------------------------
IN_CHANNELS = 4        # backbone feature channels
POOL = 4               # ROIAlign output resolution (PxP)
FLAT = IN_CHANNELS * POOL * POOL       # flattened pooled feature size (64)
REPR = 32              # MLP feature extractor representation size (fc6/fc7)
REPR_PAD = 128         # lane-dense padded representation width
NUM_CLASSES = 8        # foreground classes (WSDDN cls/det heads)
NUM_REF = 3            # number of OICR refinement branches
REF_CLASSES = NUM_CLASSES + 1          # refinement heads include background (9)
BBOX_DIM = 4 * REF_CLASSES             # per-class box regression (36)
NUM_ROIS = 128         # proposals per image (batched into one kernel call)
FEAT_H = 16
FEAT_W = 16

# Packed head-weight column layout (single fused head matmul).
C_CLS = 0
C_DET = C_CLS + NUM_CLASSES                       # 8
C_REF = C_DET + NUM_CLASSES                       # 16
C_BBOX = C_REF + NUM_REF * REF_CLASSES            # 43
HEAD_COLS = C_BBOX + NUM_REF * BBOX_DIM           # 151
HEAD_PAD = 256                                    # lane-dense packed width

# Lane-dense output slab column layout.
O_FEAT = 0
O_FINAL = O_FEAT + REPR                           # 32
O_REF = O_FINAL + NUM_CLASSES                     # 40
O_BBOX = O_REF + NUM_REF * REF_CLASSES            # 67
OUT_USED = O_BBOX + NUM_REF * BBOX_DIM            # 175
OUT_COLS = 256                                    # padded to lane-dense width


# ----------------------------------------------------------------------------
# Fused Pallas kernel: fc6 -> ReLU -> fc7 -> ReLU -> packed heads -> softmaxes.
# ----------------------------------------------------------------------------
def _fused_head_kernel(x_ref, w6_ref, b6_ref, w7_ref, b7_ref, wh_ref, bh_ref,
                       o_ref, *, num_valid):
    n_pad = x_ref.shape[0]

    # --- feature_extractor neck (FPN2MLP): fc6+ReLU, fc7+ReLU (lane-dense) --
    x = x_ref[...]                                       # bf16 (n_pad, FLAT)
    h = jnp.dot(x, w6_ref[...], preferred_element_type=jnp.float32) + b6_ref[...]
    h = jnp.maximum(h, 0.0)                              # (n_pad, 128)
    h = jnp.dot(h.astype(jnp.bfloat16), w7_ref[...],
                preferred_element_type=jnp.float32) + b7_ref[...]
    feats = jnp.maximum(h, 0.0)                          # (n_pad, 128); cols>=REPR are 0

    # --- one packed matmul for cls/det/refine/bbox heads --------------------
    logits = jnp.dot(feats.astype(jnp.bfloat16), wh_ref[...],
                     preferred_element_type=jnp.float32) + bh_ref[...]  # (n_pad, 256)

    cls_logits = logits[:, C_CLS:C_CLS + NUM_CLASSES]
    det_logits = logits[:, C_DET:C_DET + NUM_CLASSES]

    # WSDDN heuristic: softmax over classes x softmax over proposals.
    # Exact division here (error compounds in final_score); EUP cost is hidden.
    ce = jnp.exp(cls_logits - jnp.max(cls_logits, axis=1, keepdims=True))
    cls_score = ce / jnp.sum(ce, axis=1, keepdims=True)

    if num_valid != n_pad:
        # padded proposal rows must not contribute to the axis-0 softmax
        row = lax.broadcasted_iota(jnp.int32, (n_pad, 1), 0)
        det_logits = jnp.where(row < num_valid, det_logits, -1e30)
    de = jnp.exp(det_logits - jnp.max(det_logits, axis=0, keepdims=True))
    det_score = de / jnp.sum(de, axis=0, keepdims=True)
    final_score = cls_score * det_score                  # (n_pad, 8)

    # OICR refinement softmaxes (per-row, per-branch) -------------------------
    ref_parts = []
    for k in range(NUM_REF):                             # static unroll, 3 branches
        lo = C_REF + k * REF_CLASSES
        rl = logits[:, lo:lo + REF_CLASSES]
        e = jnp.exp(rl - jnp.max(rl, axis=1, keepdims=True))
        ref_parts.append(e * pl.reciprocal(jnp.sum(e, axis=1, keepdims=True),
                                           approx=True))

    # all 3 bbox regression blocks are one contiguous slice of the logits
    bbox = logits[:, C_BBOX:C_BBOX + NUM_REF * BBOX_DIM]  # (n_pad, 108)
    pad = jnp.zeros((n_pad, OUT_COLS - OUT_USED), jnp.float32)

    # --- single unmasked lane-dense store of the whole result slab ----------
    o_ref[...] = jnp.concatenate(
        [feats[:, :REPR], final_score] + ref_parts + [bbox, pad], axis=1)


def _prep_params(params):
    """Lane-pad the neck to 128 and pack all predictor heads to (128, 256)."""
    w6 = jnp.pad(params["w_fc6"],
                 ((0, 0), (0, REPR_PAD - REPR))).astype(jnp.bfloat16)
    b6 = jnp.pad(params["b_fc6"], (0, REPR_PAD - REPR)).reshape(1, REPR_PAD)
    w7 = jnp.pad(params["w_fc7"],
                 ((0, REPR_PAD - REPR), (0, REPR_PAD - REPR))).astype(jnp.bfloat16)
    b7 = jnp.pad(params["b_fc7"], (0, REPR_PAD - REPR)).reshape(1, REPR_PAD)

    wh = jnp.concatenate(
        [params["w_cls"], params["w_det"]]
        + [params["w_ref"][k] for k in range(NUM_REF)]
        + [params["w_bbox"][k] for k in range(NUM_REF)],
        axis=1)                                                   # (REPR, 151)
    wh = jnp.pad(wh, ((0, REPR_PAD - REPR),
                      (0, HEAD_PAD - HEAD_COLS))).astype(jnp.bfloat16)
    bh = jnp.concatenate(
        [params["b_cls"], params["b_det"],
         params["b_ref"].reshape(-1), params["b_bbox"].reshape(-1)])  # (151,)
    bh = jnp.pad(bh, (0, HEAD_PAD - HEAD_COLS)).reshape(1, HEAD_PAD)
    return w6, b6, w7, b7, wh, bh


def fused_head_forward(x_flat, params):
    """x_flat: (N, FLAT) pooled+flattened ROI features. Returns
    (clean_roi_feats, final_score, ref_scores, ref_bbox_preds)."""
    n = x_flat.shape[0]
    n_pad = ((n + 7) // 8) * 8                   # sublane-align the row count
    x = x_flat.astype(jnp.bfloat16)              # halve input DMA bytes
    if n_pad != n:
        x = jnp.pad(x, ((0, n_pad - n), (0, 0)))
    w6, b6, w7, b7, wh, bh = _prep_params(params)

    vmem = pl.BlockSpec(memory_space=pltpu.MemorySpace.VMEM)
    out = pl.pallas_call(
        functools.partial(_fused_head_kernel, num_valid=n),
        out_shape=jax.ShapeDtypeStruct((n_pad, OUT_COLS), jnp.float32),
        in_specs=[vmem] * 7,
        out_specs=vmem,
    )(x, w6, b6, w7, b7, wh, bh)

    out = out[:n]
    feats = out[:, O_FEAT:O_FEAT + REPR]
    final_score = out[:, O_FINAL:O_FINAL + NUM_CLASSES]
    ref_scores = out[:, O_REF:O_REF + NUM_REF * REF_CLASSES].reshape(
        n, NUM_REF, REF_CLASSES).transpose(1, 0, 2)
    ref_bbox_preds = out[:, O_BBOX:O_BBOX + NUM_REF * BBOX_DIM].reshape(
        n, NUM_REF, BBOX_DIM).transpose(1, 0, 2)
    return feats, final_score, ref_scores, ref_bbox_preds


# ----------------------------------------------------------------------------
# Plain-JAX glue: gather-free ROIAlign pooler (bilinear weights via one-hot).
# TODO(synk): at production sizes these one-hot einsums are MXU-shaped and
# could be pulled into the Pallas kernel to avoid the pooled-tensor round-trip.
# ----------------------------------------------------------------------------
def roi_align(features, rois, pooled_size, spatial_scale=1.0):
    """features: (C, H, W) single image; rois: (N, 4) xyxy boxes. One bilinear
    sample per bin center (sampling_ratio = 1 approximation), computed as
    separable one-hot interpolation-weight reductions (no XLA gather)."""
    c, h, w = features.shape
    p = pooled_size
    scaled = rois * spatial_scale
    x1, y1, x2, y2 = scaled[:, 0], scaled[:, 1], scaled[:, 2], scaled[:, 3]
    roi_w = jnp.maximum(x2 - x1, 1.0)
    roi_h = jnp.maximum(y2 - y1, 1.0)
    bins = (jnp.arange(p, dtype=jnp.float32) + 0.5) / p
    ys = y1[:, None] + bins[None, :] * roi_h[:, None]       # (N, P)
    xs = x1[:, None] + bins[None, :] * roi_w[:, None]       # (N, P)

    def axis_weights(coords, size):
        f0 = jnp.floor(coords)
        frac = coords - f0
        i0 = jnp.clip(f0.astype(jnp.int32), 0, size - 1)
        i1 = jnp.clip(i0 + 1, 0, size - 1)
        oh0 = jax.nn.one_hot(i0, size, dtype=jnp.float32)
        oh1 = jax.nn.one_hot(i1, size, dtype=jnp.float32)
        return oh0 * (1.0 - frac)[..., None] + oh1 * frac[..., None]  # (N,P,size)

    wy = axis_weights(ys, h)                                 # (N, P, H)
    wx = axis_weights(xs, w)                                 # (N, P, W)
    tmp = jnp.einsum("cij,npj->ncip", features, wx)          # (N, C, H, P)
    pooled = jnp.einsum("nyi,nciq->ncyq", wy, tmp)           # (N, C, P, P)
    return pooled


# ----------------------------------------------------------------------------
# Parameter init (deterministic, synthetic, float32 master copies).
# ----------------------------------------------------------------------------
def init_params(key):
    ks = jax.random.split(key, 8)
    std = 0.1
    return {
        "w_fc6": jax.random.normal(ks[0], (FLAT, REPR), jnp.float32) * std,
        "b_fc6": jnp.zeros((REPR,), jnp.float32),
        "w_fc7": jax.random.normal(ks[1], (REPR, REPR), jnp.float32) * std,
        "b_fc7": jnp.zeros((REPR,), jnp.float32),
        "w_cls": jax.random.normal(ks[2], (REPR, NUM_CLASSES), jnp.float32) * std,
        "b_cls": jnp.zeros((NUM_CLASSES,), jnp.float32),
        "w_det": jax.random.normal(ks[3], (REPR, NUM_CLASSES), jnp.float32) * std,
        "b_det": jnp.zeros((NUM_CLASSES,), jnp.float32),
        "w_ref": jax.random.normal(ks[4], (NUM_REF, REPR, REF_CLASSES),
                                   jnp.float32) * std,
        "b_ref": jnp.zeros((NUM_REF, REF_CLASSES), jnp.float32),
        "w_bbox": jax.random.normal(ks[5], (NUM_REF, REPR, BBOX_DIM),
                                    jnp.float32) * 0.001,
        "b_bbox": jnp.zeros((NUM_REF, BBOX_DIM), jnp.float32),
    }


# ----------------------------------------------------------------------------
# ROIWeakRegHead.forward  (inference path, HEUR == 'WSDDN')
# ----------------------------------------------------------------------------
@jax.jit
def roi_weak_reg_head_forward(features, proposals, params):
    """features: (1, C, H, W) NCHW; proposals: (N, 4) xyxy boxes.

    Returns (clean_roi_feats, final_score, ref_scores, ref_bbox_preds), the
    eval-mode tensors of ROIWeakRegHead right before NMS post-processing."""
    # feature_extractor.forward_pooler (plain-JAX, gather-free bilinear)
    pooled = roi_align(features[0], proposals, POOL)          # (N, C, P, P)
    x_flat = pooled.reshape(pooled.shape[0], -1)              # (N, C*P*P)

    # fused neck + predictor + WSDDN heuristic (single Pallas kernel)
    feats, final_score, ref_scores, ref_bbox_preds = fused_head_forward(
        x_flat, params)
    # TODO(synk): weak_post_processor / strong_post_processor (per-image NMS +
    # BoxList bookkeeping) has no clean Pallas equivalent; final_score is the
    # tensor handed to it.
    return feats, final_score, ref_scores, ref_bbox_preds


# ----------------------------------------------------------------------------
# Pure-JAX float32 reference (for correctness checking).
# ----------------------------------------------------------------------------
def reference_forward(features, proposals, params):
    pooled = roi_align(features[0], proposals, POOL)
    x = pooled.reshape(pooled.shape[0], -1)
    h = jax.nn.relu(x @ params["w_fc6"] + params["b_fc6"])
    feats = jax.nn.relu(h @ params["w_fc7"] + params["b_fc7"])
    cls = jax.nn.softmax(feats @ params["w_cls"] + params["b_cls"], axis=1)
    det = jax.nn.softmax(feats @ params["w_det"] + params["b_det"], axis=0)
    final = cls * det
    refs = jnp.stack([
        jax.nn.softmax(feats @ params["w_ref"][k] + params["b_ref"][k], axis=1)
        for k in range(NUM_REF)])
    bbox = jnp.stack([
        feats @ params["w_bbox"][k] + params["b_bbox"][k]
        for k in range(NUM_REF)])
    return feats, final, refs, bbox


# ----------------------------------------------------------------------------
if __name__ == "__main__":
    key = jax.random.PRNGKey(0)
    k_feat, k_box, k_param = jax.random.split(key, 3)

    # single image, NCHW
    features = jax.random.normal(k_feat, (1, IN_CHANNELS, FEAT_H, FEAT_W),
                                 jnp.float32)

    # deterministic proposals (x1, y1, x2, y2) inside the feature map
    tl = jax.random.uniform(k_box, (NUM_ROIS, 2), minval=0.0, maxval=10.0)
    wh_ = jax.random.uniform(jax.random.fold_in(k_box, 1), (NUM_ROIS, 2),
                             minval=2.0, maxval=5.0)
    proposals = jnp.concatenate(
        [tl, jnp.minimum(tl + wh_, float(FEAT_H) - 1.0)], axis=1
    ).astype(jnp.float32)

    params = init_params(k_param)

    outs = roi_weak_reg_head_forward(features, proposals, params)
    jax.block_until_ready(outs)
    roi_feats, final_score, ref_scores, ref_bbox_preds = outs

    # shape checks
    assert roi_feats.shape == (NUM_ROIS, REPR)
    assert final_score.shape == (NUM_ROIS, NUM_CLASSES)
    assert ref_scores.shape == (NUM_REF, NUM_ROIS, REF_CLASSES)
    assert ref_bbox_preds.shape == (NUM_REF, NUM_ROIS, BBOX_DIM)

    # numerics vs. pure-JAX f32 reference (bf16 MXU operands + approx recip)
    r_feats, r_final, r_refs, r_bbox = reference_forward(
        features, proposals, params)
    assert jnp.allclose(roi_feats, r_feats, rtol=5e-2, atol=5e-3)
    assert jnp.allclose(final_score, r_final, rtol=5e-2, atol=5e-3)
    assert jnp.allclose(ref_scores, r_refs, rtol=5e-2, atol=5e-3)
    assert jnp.allclose(ref_bbox_preds, r_bbox, rtol=5e-2, atol=5e-3)
    # each refinement softmax row sums to ~1 (approx reciprocal tolerance)
    assert jnp.allclose(ref_scores.sum(-1), 1.0, atol=5e-3)

    print("KERNEL_OK")
</pallas_src>

<mosaic_0001>
module attributes {stable_mosaic.version = 11 : i64} {
  func.func @_fused_head_kernel(%arg0: memref<128x64xbf16, #tpu.memory_space<vmem>>, %arg1: memref<64x128xbf16, #tpu.memory_space<vmem>>, %arg2: memref<1x128xf32, #tpu.memory_space<vmem>>, %arg3: memref<128x128xbf16, #tpu.memory_space<vmem>>, %arg4: memref<1x128xf32, #tpu.memory_space<vmem>>, %arg5: memref<128x256xbf16, #tpu.memory_space<vmem>>, %arg6: memref<1x256xf32, #tpu.memory_space<vmem>>, %arg7: memref<128x256xf32, #tpu.memory_space<vmem>>) attributes {dimension_semantics = [], scalar_prefetch = 0 : i64, scratch_operands = 0 : i64, tpu.core_type = #tpu.core_type<tc>} {
    %c0 = arith.constant 0 : index
    %c0_0 = arith.constant 0 : index
    %0 = vector.load %arg0[%c0, %c0_0] : memref<128x64xbf16, #tpu.memory_space<vmem>>, vector<128x64xbf16>
    %c0_1 = arith.constant 0 : index
    %c0_2 = arith.constant 0 : index
    %1 = vector.load %arg1[%c0_1, %c0_2] : memref<64x128xbf16, #tpu.memory_space<vmem>>, vector<64x128xbf16>
    %cst = arith.constant dense<0.000000e+00> : vector<128x128xf32>
    %2 = tpu.matmul %0, %1, %cst {dimension_numbers = #tpu.dot_dimension_numbers<[1], [0], [0], [1], [0, 0, 1, 1], [], []>} : vector<128x64xbf16>, vector<64x128xbf16>, vector<128x128xf32> -> vector<128x128xf32>
    %c0_3 = arith.constant 0 : index
    %c0_4 = arith.constant 0 : index
    %3 = vector.load %arg2[%c0_3, %c0_4] : memref<1x128xf32, #tpu.memory_space<vmem>>, vector<1x128xf32>
    %4 = vector.broadcast %3 : vector<1x128xf32> to vector<128x128xf32>
    %5 = arith.addf %2, %4 : vector<128x128xf32>
    %cst_5 = arith.constant 0.000000e+00 : f32
    %6 = vector.broadcast %cst_5 : f32 to vector<128x128xf32>
    %7 = arith.maximumf %5, %6 : vector<128x128xf32>
    %8 = arith.truncf %7 : vector<128x128xf32> to vector<128x128xbf16>
    %c0_6 = arith.constant 0 : index
    %c0_7 = arith.constant 0 : index
    %9 = vector.load %arg3[%c0_6, %c0_7] : memref<128x128xbf16, #tpu.memory_space<vmem>>, vector<128x128xbf16>
    %cst_8 = arith.constant dense<0.000000e+00> : vector<128x128xf32>
    %10 = tpu.matmul %8, %9, %cst_8 {dimension_numbers = #tpu.dot_dimension_numbers<[1], [0], [0], [1], [0, 0, 1, 1], [], []>} : vector<128x128xbf16>, vector<128x128xbf16>, vector<128x128xf32> -> vector<128x128xf32>
    %c0_9 = arith.constant 0 : index
    %c0_10 = arith.constant 0 : index
    %11 = vector.load %arg4[%c0_9, %c0_10] : memref<1x128xf32, #tpu.memory_space<vmem>>, vector<1x128xf32>
    %12 = vector.broadcast %11 : vector<1x128xf32> to vector<128x128xf32>
    %13 = arith.addf %10, %12 : vector<128x128xf32>
    %cst_11 = arith.constant 0.000000e+00 : f32
    %14 = vector.broadcast %cst_11 : f32 to vector<128x128xf32>
    %15 = arith.maximumf %13, %14 : vector<128x128xf32>
    %16 = arith.truncf %15 : vector<128x128xf32> to vector<128x128xbf16>
    %c0_12 = arith.constant 0 : index
    %c0_13 = arith.constant 0 : index
    %17 = vector.load %arg5[%c0_12, %c0_13] : memref<128x256xbf16, #tpu.memory_space<vmem>>, vector<128x256xbf16>
    %cst_14 = arith.constant dense<0.000000e+00> : vector<128x256xf32>
    %18 = tpu.matmul %16, %17, %cst_14 {dimension_numbers = #tpu.dot_dimension_numbers<[1], [0], [0], [1], [0, 0, 1, 1], [], []>} : vector<128x128xbf16>, vector<128x256xbf16>, vector<128x256xf32> -> vector<128x256xf32>
    %c0_15 = arith.constant 0 : index
    %c0_16 = arith.constant 0 : index
    %19 = vector.load %arg6[%c0_15, %c0_16] : memref<1x256xf32, #tpu.memory_space<vmem>>, vector<1x256xf32>
    %20 = vector.broadcast %19 : vector<1x256xf32> to vector<128x256xf32>
    %21 = arith.addf %18, %20 : vector<128x256xf32>
    %22 = vector.extract_strided_slice %21 {offsets = [0, 0], sizes = [128, 8], strides = [1, 1]} : vector<128x256xf32> to vector<128x8xf32>
    %23 = vector.extract_strided_slice %21 {offsets = [0, 8], sizes = [128, 8], strides = [1, 1]} : vector<128x256xf32> to vector<128x8xf32>
    %cst_17 = arith.constant dense<0xFF800000> : vector<128xf32>
    %24 = vector.multi_reduction <maximumf>, %22, %cst_17 [1] : vector<128x8xf32> to vector<128xf32>
    %25 = vector.shape_cast %24 : vector<128xf32> to vector<128x1xf32>
    %26 = vector.broadcast %25 : vector<128x1xf32> to vector<128x8xf32>
    %27 = arith.subf %22, %26 : vector<128x8xf32>
    %28 = math.exp %27 : vector<128x8xf32>
    %cst_18 = arith.constant dense<0.000000e+00> : vector<128xf32>
    %29 = vector.multi_reduction <add>, %28, %cst_18 [1] : vector<128x8xf32> to vector<128xf32>
    %30 = vector.shape_cast %29 : vector<128xf32> to vector<128x1xf32>
    %31 = vector.broadcast %30 : vector<128x1xf32> to vector<128x8xf32>
    %32 = arith.divf %28, %31 : vector<128x8xf32>
    %cst_19 = arith.constant dense<0xFF800000> : vector<8xf32>
    %33 = vector.multi_reduction <maximumf>, %23, %cst_19 [0] : vector<128x8xf32> to vector<8xf32>
    %34 = vector.shape_cast %33 : vector<8xf32> to vector<1x8xf32>
    %35 = vector.broadcast %34 : vector<1x8xf32> to vector<128x8xf32>
    %36 = arith.subf %23, %35 : vector<128x8xf32>
    %37 = math.exp %36 : vector<128x8xf32>
    %cst_20 = arith.constant dense<0.000000e+00> : vector<8xf32>
    %38 = vector.multi_reduction <add>, %37, %cst_20 [0] : vector<128x8xf32> to vector<8xf32>
    %39 = vector.shape_cast %38 : vector<8xf32> to vector<1x8xf32>
    %40 = vector.broadcast %39 : vector<1x8xf32> to vector<128x8xf32>
    %41 = arith.divf %37, %40 : vector<128x8xf32>
    %42 = arith.mulf %32, %41 : vector<128x8xf32>
    %43 = vector.extract_strided_slice %21 {offsets = [0, 16], sizes = [128, 9], strides = [1, 1]} : vector<128x256xf32> to vector<128x9xf32>
    %cst_21 = arith.constant dense<0xFF800000> : vector<128xf32>
    %44 = vector.multi_reduction <maximumf>, %43, %cst_21 [1] : vector<128x9xf32> to vector<128xf32>
    %45 = vector.shape_cast %44 : vector<128xf32> to vector<128x1xf32>
    %46 = vector.broadcast %45 : vector<128x1xf32> to vector<128x9xf32>
    %47 = arith.subf %43, %46 : vector<128x9xf32>
    %48 = math.exp %47 : vector<128x9xf32>
    %cst_22 = arith.constant dense<0.000000e+00> : vector<128xf32>
    %49 = vector.multi_reduction <add>, %48, %cst_22 [1] : vector<128x9xf32> to vector<128xf32>
    %50 = vector.shape_cast %49 : vector<128xf32> to vector<128x1xf32>
    %51 = tpu.reciprocal %50 {approx = true} : vector<128x1xf32> -> vector<128x1xf32>
    %52 = vector.broadcast %51 : vector<128x1xf32> to vector<128x9xf32>
    %53 = arith.mulf %48, %52 : vector<128x9xf32>
    %54 = vector.extract_strided_slice %21 {offsets = [0, 25], sizes = [128, 9], strides = [1, 1]} : vector<128x256xf32> to vector<128x9xf32>
    %cst_23 = arith.constant dense<0xFF800000> : vector<128xf32>
    %55 = vector.multi_reduction <maximumf>, %54, %cst_23 [1] : vector<128x9xf32> to vector<128xf32>
    %56 = vector.shape_cast %55 : vector<128xf32> to vector<128x1xf32>
    %57 = vector.broadcast %56 : vector<128x1xf32> to vector<128x9xf32>
    %58 = arith.subf %54, %57 : vector<128x9xf32>
    %59 = math.exp %58 : vector<128x9xf32>
    %cst_24 = arith.constant dense<0.000000e+00> : vector<128xf32>
    %60 = vector.multi_reduction <add>, %59, %cst_24 [1] : vector<128x9xf32> to vector<128xf32>
    %61 = vector.shape_cast %60 : vector<128xf32> to vector<128x1xf32>
    %62 = tpu.reciprocal %61 {approx = true} : vector<128x1xf32> -> vector<128x1xf32>
    %63 = vector.broadcast %62 : vector<128x1xf32> to vector<128x9xf32>
    %64 = arith.mulf %59, %63 : vector<128x9xf32>
    %65 = vector.extract_strided_slice %21 {offsets = [0, 34], sizes = [128, 9], strides = [1, 1]} : vector<128x256xf32> to vector<128x9xf32>
    %cst_25 = arith.constant dense<0xFF800000> : vector<128xf32>
    %66 = vector.multi_reduction <maximumf>, %65, %cst_25 [1] : vector<128x9xf32> to vector<128xf32>
    %67 = vector.shape_cast %66 : vector<128xf32> to vector<128x1xf32>
    %68 = vector.broadcast %67 : vector<128x1xf32> to vector<128x9xf32>
    %69 = arith.subf %65, %68 : vector<128x9xf32>
    %70 = math.exp %69 : vector<128x9xf32>
    %cst_26 = arith.constant dense<0.000000e+00> : vector<128xf32>
    %71 = vector.multi_reduction <add>, %70, %cst_26 [1] : vector<128x9xf32> to vector<128xf32>
    %72 = vector.shape_cast %71 : vector<128xf32> to vector<128x1xf32>
    %73 = tpu.reciprocal %72 {approx = true} : vector<128x1xf32> -> vector<128x1xf32>
    %74 = vector.broadcast %73 : vector<128x1xf32> to vector<128x9xf32>
    %75 = arith.mulf %70, %74 : vector<128x9xf32>
    %76 = vector.extract_strided_slice %21 {offsets = [0, 43], sizes = [128, 108], strides = [1, 1]} : vector<128x256xf32> to vector<128x108xf32>
    %cst_27 = arith.constant 0.000000e+00 : f32
    %77 = vector.broadcast %cst_27 : f32 to vector<128x81xf32>
    %78 = vector.extract_strided_slice %15 {offsets = [0, 0], sizes = [128, 32], strides = [1, 1]} : vector<128x128xf32> to vector<128x32xf32>
    %79 = tpu.concatenate %78, %42, %53, %64, %75, %76, %77 in 1 : vector<128x32xf32>, vector<128x8xf32>, vector<128x9xf32>, vector<128x9xf32>, vector<128x9xf32>, vector<128x108xf32>, vector<128x81xf32> -> vector<128x256xf32>
    %c0_28 = arith.constant 0 : index
    %c0_29 = arith.constant 0 : index
    %80 = vector.load %arg7[%c0_28, %c0_29] : memref<128x256xf32, #tpu.memory_space<vmem>>, vector<128x256xf32>
    tpu.vector_store %arg7[%c0_28, %c0_29], %79 {strides = array<i32>} : memref<128x256xf32, #tpu.memory_space<vmem>>, vector<128x256xf32>,
    return
  }
}

</mosaic_0001>

<bundles_post_ra>
// kernel: roi_weak_reg_head_forward.1
= control target key start
LH: loop header
LB: loop body
LE: loop exit
PB: predicated region body
PF: predicated region fallthrough
CT: control target
= control target key end

     0   :  { %vm119_vm0 = vcmask 523264   ;;  %vm1418_vm1 = vcmask 277704   ;;  %s2925_s27 = smov 24   ;;  %vm1659_vm2 = vcmask 351504   ;;  %vm558_vm3 = vcmask 64512   ;;  %s2926_s15 = smov 112   ;;  %s5098_s1 = inlined_call_operand.vmem [shape: bf16[64,128], index: 1, kind: input, shape index: {}]   ;;  %s5099_s2 = inlined_call_operand.vmem [shape: f32[1,128], index: 2, kind: input, shape index: {}]   ;;  %s5100_s0 = inlined_call_operand.vmem [shape: bf16[128,64], index: 0, kind: input, shape index: {}]   ;;  %s5101_s3 = inlined_call_operand.vmem [shape: bf16[128,128], index: 3, kind: input, shape index: {}]   ;;  %s5102_s4 = inlined_call_operand.vmem [shape: f32[1,128], index: 4, kind: input, shape index: {}]   ;;  %s5103_s5 = inlined_call_operand.vmem [shape: bf16[128,256], index: 5, kind: input, shape index: {}]   ;;  %s5104_s6 = inlined_call_operand.vmem [shape: f32[1,256], index: 6, kind: input, shape index: {}]   ;;  %s5105_s7 = inlined_call_operand.vmem [shape: f32[128,256], index: 7, kind: output, shape index: {}]  }
   0x1   :  { %v2602_v0 = vld [vmem:[%s5098_s1 + $0x18] sm:$0xff]  ;;  %v2601_v1 = vld [vmem:[%s5098_s1 + $0x10] sm:$0xff]  ;;  %v2600_v2 = vld [vmem:[%s5098_s1 + $0x8] sm:$0xff]  ;;  %vm1176_vm4 = vcmask 203904   ;;  %vm943_vm5 = vcmask 130112   ;;  %vm2252_vm6 = vcmask 195584  }
   0x2   :  { %148 = vmatpush.bf16.msra.mxu0 %v2602_v0  ;;  %v2599_v3 = vld [vmem:[%s5098_s1] sm:$0xff]  ;;  %v2592_v5 = vld [vmem:[%s5100_s0 + $0x8] sm:$0xff]  ;;  %v2593_v6 = vld [vmem:[%s5100_s0 + $0x10] sm:$0xff]  ;;  %vm2386_vm7 = vcmask 384000   ;;  %s2927_s16 = smov 103   ;;  %s2928_s17 = smov 94  }
   0x3   :  { %v2591_v4 = vld [vmem:[%s5100_s0] sm:$0xff]  ;;  %v2594_v7 = vld [vmem:[%s5100_s0 + $0x18] sm:$0xff]  ;;  %v2596_v10 = vld [vmem:[%s5100_s0 + $0x28] sm:$0xff]  ;;  %vm1337_vm12 = vcmask 72704  }
   0x4   :  { %v2595_v8 = vld [vmem:[%s5100_s0 + $0x20] sm:$0xff]  ;;  %v2610_v9 = vld [vmem:[%s5101_s3 + $0x38] sm:$0xff]  ;;  %v2609_v11 = vld [vmem:[%s5101_s3 + $0x30] sm:$0xff] }
   0x5   :  { %285 = vmatpush.bf16.msra.mxu1 %v2610_v9  ;;  %v2608_v12 = vld [vmem:[%s5101_s3 + $0x28] sm:$0xff]  ;;  %v2607_v13 = vld [vmem:[%s5101_s3 + $0x20] sm:$0xff]  ;;  %v2606_v14 = vld [vmem:[%s5101_s3 + $0x18] sm:$0xff] }
   0x6   :  { %149 = vmatpush.bf16.msra.mxu0 %v2601_v1  ;;  %v2597_v15 = vld [vmem:[%s5100_s0 + $0x30] sm:$0xff]  ;;  %v2604_v17 = vld [vmem:[%s5101_s3 + $0x8] sm:$0xff]  ;;  %v2603_v18 = vld [vmem:[%s5101_s3] sm:$0xff] }
   0x7   :  { %v2605_v16 = vld [vmem:[%s5101_s3 + $0x10] sm:$0xff]  ;;  %v2598_v19 = vld [vmem:[%s5100_s0 + $0x38] sm:$0xff]  ;;  %v3042_v21 = vld [vmem:[%s5099_s2] ss:$0 sm:$0xff]  ;;  %s2929_s0 = smov 120   ;;  %s2930_s2 = smov 32  }
   0x8   :  { %v2585_v61 = vld [vmem:[%s5103_s5 + $0x70] sm:$0xf]  ;;  %v2626_v62 = vld [vmem:[%s5103_s5 + $0x74] sm:$0xf0]  ;;  %v2625_v63 = vld [vmem:[%s5103_s5 + $0x74] sm:$0xf] }
   0x9   :  { %286 = vmatpush.bf16.msra.mxu1 %v2609_v11  ;;  %v2586_v0 = vor.u32 %v2626_v62, %v2585_v61  ;;  %v2587_v1 = vld [vmem:[%s5103_s5 + $0x78] sm:$0xf0]  ;;  %v2579_v9 = vld [vmem:[%s5103_s5 + $0x68] sm:$0xf0]  ;;  %v2569_v11 = vld [vmem:[%s5103_s5 + $0x50] sm:$0xf] }
   0xa   :  { %150 = vmatpush.bf16.msra.mxu0 %v2600_v2 }
   0xb   :  { %460 = vmatpush.bf16.msra.mxu2 %v2586_v0 }
   0xd   :  { %287 = vmatpush.bf16.msra.mxu1 %v2608_v12  ;;  %v2622_v12 = vld [vmem:[%s5103_s5 + $0x54] sm:$0xf0] }
   0xe   :  { %151 = vmatpush.bf16.msra.mxu0 %v2599_v3  ;;  %v2590_v3 = vor.u32 %v2625_v63, %v2587_v1  ;;  %v3159_v63 = vld [vmem:[%s5102_s4] ss:$0 sm:$0xff] }
  0x10   :  { %509 = vmatpush.bf16.msra.mxu3 %v2590_v3 }
  0x11   :  { %2487 = vmatmul.msk.bf16.vlgmr.msra.gmra.mxu0 %vm119_vm0, %v2591_v4  ;;  %288 = vmatpush.bf16.msra.mxu1 %v2607_v13  ;;  %v2621_v13 = vld [vmem:[%s5103_s5 + $0x54] sm:$0xf] }
  0x15   :  { %289 = vmatpush.bf16.msra.mxu1 %v2606_v14 }
  0x19   :  { %290 = vmatpush.bf16.msra.mxu1 %v2605_v16  ;;  %v2571_v16 = vld [vmem:[%s5103_s5 + $0x58] sm:$0xf0] }
  0x1d   :  { %291 = vmatpush.bf16.msra.mxu1 %v2604_v17  ;;  %v2574_v17 = vor.u32 %v2621_v13, %v2571_v16 }
  0x21   :  { %2488 = vmatmul.msk.bf16.gmra.mxu0 %vm119_vm0, %v2592_v5  ;;  %292 = vmatpush.bf16.msra.mxu1 %v2603_v18  ;;  %v2577_v5 = vld [vmem:[%s5103_s5 + $0x60] sm:$0xf] }
  0x22   :  { %v2561_v18 = vld [vmem:[%s5103_s5 + $0x40] sm:$0xf] }
  0x31   :  { %2489 = vmatmul.msk.bf16.gmra.mxu0 %vm119_vm0, %v2593_v6  ;;  %v2624_v6 = vld [vmem:[%s5103_s5 + $0x64] sm:$0xf0] }
  0x41   :  { %2490 = vmatmul.msk.bf16.gmra.mxu0 %vm119_vm0, %v2594_v7  ;;  %v2623_v7 = vld [vmem:[%s5103_s5 + $0x64] sm:$0xf] }
  0x51   :  { %2491 = vmatmul.msk.bf16.gmra.mxu0 %vm119_vm0, %v2595_v8  ;;  %v2578_v8 = vor.u32 %v2624_v6, %v2577_v5 }
  0x53   :  { %461 = vmatpush.bf16.msra.mxu2 %v2578_v8 }
  0x61   :  { %2492 = vmatmul.msk.bf16.gmra.mxu0 %vm119_vm0, %v2596_v10  ;;  %v2582_v10 = vor.u32 %v2623_v7, %v2579_v9 }
  0x63   :  { %510 = vmatpush.bf16.msra.mxu3 %v2582_v10 }
  0x67   :  { %511 = vmatpush.bf16.msra.mxu3 %v2574_v17 }
  0x71   :  { %2493 = vmatmul.msk.bf16.gmra.mxu0 %vm119_vm0, %v2597_v15  ;;  %v2570_v15 = vor.u32 %v2622_v12, %v2569_v11 }
  0x73   :  { %462 = vmatpush.bf16.msra.mxu2 %v2570_v15 }
  0x81   :  { %2494 = vmatmul.msk.bf16.gmra.mxu0 %vm119_vm0, %v2598_v19  ;;  %v2620_v19 = vld [vmem:[%s5103_s5 + $0x44] sm:$0xf0] }
  0x8e   :  { %v153_v20 = vpop.f32.mrf.mxu0 }
  0x8f   :  { %v154_v22 = vadd.f32 %v3042_v21, %v153_v20  ;;  %v2619_v20 = vld [vmem:[%s5103_s5 + $0x44] sm:$0xf] }
  0x91   :  { %v193_v25 = vmax.f32 %v154_v22, 0.0  ;;  %v2563_v22 = vld [vmem:[%s5103_s5 + $0x48] sm:$0xf0] }
  0x96   :  { %v155_v23 = vpop.f32.mrf.mxu0 }
  0x97   :  { %v156_v24 = vadd.f32 %v3042_v21, %v155_v23 }
  0x99   :  { %v194_v26 = vmax.f32 %v156_v24, 0.0  ;;  %v2562_v24 = vor.u32 %v2620_v19, %v2561_v18 }
  0x9b   :  { %v209_v27 = vpack.c.bf16 %v194_v26, %v193_v25  ;;  %v2566_v25 = vor.u32 %v2619_v20, %v2563_v22  ;;  %463 = vmatpush.bf16.msra.mxu2 %v2562_v24 }
  0x9d   :  { %293 = vmatmul.bf16.vlgmr.msra.gmra.mxu1 %v209_v27  ;;  %512 = vmatpush.bf16.msra.mxu3 %v2566_v25 }
  0x9e   :  { %v158_v28 = vpop.f32.mrf.mxu0 }
  0x9f   :  { %v159_v29 = vadd.f32 %v3042_v21, %v158_v28 }
  0xa1   :  { %v195_v31 = vmax.f32 %v159_v29, 0.0  ;;  %v2553_v29 = vld [vmem:[%s5103_s5 + $0x30] sm:$0xf] }
  0xa6   :  { %v160_v30 = vpop.f32.mrf.mxu0 }
  0xa7   :  { %v161_v32 = vadd.f32 %v3042_v21, %v160_v30  ;;  %v2618_v30 = vld [vmem:[%s5103_s5 + $0x34] sm:$0xf0] }
  0xa9   :  { %v196_v33 = vmax.f32 %v161_v32, 0.0  ;;  %v2554_v32 = vor.u32 %v2618_v30, %v2553_v29 }
  0xab   :  { %v210_v34 = vpack.c.bf16 %v196_v33, %v195_v31  ;;  %v2617_v31 = vld [vmem:[%s5103_s5 + $0x34] sm:$0xf]  ;;  %v2555_v33 = vld [vmem:[%s5103_s5 + $0x38] sm:$0xf0]  ;;  %464 = vmatpush.bf16.msra.mxu2 %v2554_v32 }
  0xad   :  { %298 = vmatmul.bf16.gmra.mxu1 %v210_v34 }
  0xae   :  { %v163_v35 = vpop.f32.mrf.mxu0 }
  0xaf   :  { %v164_v36 = vadd.f32 %v3042_v21, %v163_v35  ;;  %v2558_v35 = vor.u32 %v2617_v31, %v2555_v33 }
  0xb1   :  { %v197_v38 = vmax.f32 %v164_v36, 0.0  ;;  %513 = vmatpush.bf16.msra.mxu3 %v2558_v35 }
  0xb6   :  { %v165_v37 = vpop.f32.mrf.mxu0 }
  0xb7   :  { %v166_v39 = vadd.f32 %v3042_v21, %v165_v37  ;;  %v2545_v37 = vld [vmem:[%s5103_s5 + $0x20] sm:$0xf] }
  0xb9   :  { %v198_v40 = vmax.f32 %v166_v39, 0.0  ;;  %v2615_v39 = vld [vmem:[%s5103_s5 + $0x24] sm:$0xf] }
  0xbb   :  { %v211_v41 = vpack.c.bf16 %v198_v40, %v197_v38  ;;  %v2616_v38 = vld [vmem:[%s5103_s5 + $0x24] sm:$0xf0] }
  0xbc   :  { %v2546_v40 = vor.u32 %v2616_v38, %v2545_v37 }
  0xbd   :  { %303 = vmatmul.bf16.gmra.mxu1 %v211_v41  ;;  %v2547_v41 = vld [vmem:[%s5103_s5 + $0x28] sm:$0xf0] }
  0xbe   :  { %v168_v42 = vpop.f32.mrf.mxu0  ;;  %465 = vmatpush.bf16.msra.mxu2 %v2546_v40 }
  0xbf   :  { %v169_v43 = vadd.f32 %v3042_v21, %v168_v42  ;;  %v2550_v42 = vor.u32 %v2615_v39, %v2547_v41 }
  0xc1   :  { %v199_v45 = vmax.f32 %v169_v43, 0.0  ;;  %514 = vmatpush.bf16.msra.mxu3 %v2550_v42 }
  0xc6   :  { %v170_v44 = vpop.f32.mrf.mxu0 }
  0xc7   :  { %v171_v46 = vadd.f32 %v3042_v21, %v170_v44  ;;  %v2537_v44 = vld [vmem:[%s5103_s5 + $0x10] sm:$0xf] }
  0xc9   :  { %v200_v47 = vmax.f32 %v171_v46, 0.0  ;;  %v2613_v46 = vld [vmem:[%s5103_s5 + $0x14] sm:$0xf] }
  0xcb   :  { %v212_v48 = vpack.c.bf16 %v200_v47, %v199_v45  ;;  %v2614_v45 = vld [vmem:[%s5103_s5 + $0x14] sm:$0xf0] }
  0xcc   :  { %v2538_v47 = vor.u32 %v2614_v45, %v2537_v44 }
  0xcd   :  { %308 = vmatmul.bf16.gmra.mxu1 %v212_v48  ;;  %v2539_v48 = vld [vmem:[%s5103_s5 + $0x18] sm:$0xf0] }
  0xce   :  { %v173_v49 = vpop.f32.mrf.mxu0  ;;  %466 = vmatpush.bf16.msra.mxu2 %v2538_v47 }
  0xcf   :  { %v174_v50 = vadd.f32 %v3042_v21, %v173_v49  ;;  %v2542_v49 = vor.u32 %v2613_v46, %v2539_v48 }
  0xd1   :  { %v201_v52 = vmax.f32 %v174_v50, 0.0  ;;  %515 = vmatpush.bf16.msra.mxu3 %v2542_v49 }
  0xd6   :  { %v175_v51 = vpop.f32.mrf.mxu0 }
  0xd7   :  { %v176_v53 = vadd.f32 %v3042_v21, %v175_v51  ;;  %v2529_v51 = vld [vmem:[%s5103_s5] sm:$0xf] }
  0xd9   :  { %v202_v54 = vmax.f32 %v176_v53, 0.0  ;;  %v2611_v53 = vld [vmem:[%s5103_s5 + $0x4] sm:$0xf] }
  0xdb   :  { %v213_v55 = vpack.c.bf16 %v202_v54, %v201_v52  ;;  %v2612_v52 = vld [vmem:[%s5103_s5 + $0x4] sm:$0xf0] }
  0xdc   :  { %v2530_v54 = vor.u32 %v2612_v52, %v2529_v51 }
  0xdd   :  { %313 = vmatmul.bf16.gmra.mxu1 %v213_v55  ;;  %v2531_v55 = vld [vmem:[%s5103_s5 + $0x8] sm:$0xf0] }
  0xde   :  { %v178_v56 = vpop.f32.mrf.mxu0  ;;  %467 = vmatpush.bf16.msra.mxu2 %v2530_v54 }
  0xdf   :  { %v179_v57 = vadd.f32 %v3042_v21, %v178_v56  ;;  %v2534_v56 = vor.u32 %v2611_v53, %v2531_v55  ;;  %v374_v55 = vld [vmem:[%s5104_s6] sm:$0x3] }
  0xe1   :  { %v203_v58 = vmax.f32 %v179_v57, 0.0  ;;  %516 = vmatpush.bf16.msra.mxu3 %v2534_v56  ;;  %v3260_v56 = vperm.slane %v374_v55, 0 }
  0xe6   :  { %v180_v59 = vpop.f32.mrf.mxu0 }
  0xe7   :  { %v181_v60 = vadd.f32 %v3042_v21, %v180_v59 }
  0xe9   :  { %v204_v2 = vmax.f32 %v181_v60, 0.0 }
  0xeb   :  { %v214_v4 = vpack.c.bf16 %v204_v2, %v203_v58 }
  0xed   :  { %318 = vmatmul.bf16.gmra.mxu1 %v214_v4 }
  0xee   :  { %v183_v14 = vpop.f32.mrf.mxu0 }
  0xef   :  { %v184_v23 = vadd.f32 %v3042_v21, %v183_v14 }
  0xf1   :  { %v205_v26 = vmax.f32 %v184_v23, 0.0 }
  0xf6   :  { %v185_v27 = vpop.f32.mrf.mxu0 }
  0xf7   :  { %v186_v28 = vadd.f32 %v3042_v21, %v185_v27 }
  0xf9   :  { %v206_v34 = vmax.f32 %v186_v28, 0.0 }
  0xfb   :  { %v215_v36 = vpack.c.bf16 %v206_v34, %v205_v26 }
  0xfd   :  { %323 = vmatmul.bf16.gmra.mxu1 %v215_v36 }
  0xfe   :  { %v188_v43 = vpop.f32.mrf.mxu0 }
  0xff   :  { %v189_v50 = vadd.f32 %v3042_v21, %v188_v43 }
 0x101   :  { %v207_v58 = vmax.f32 %v189_v50, 0.0 }
 0x106   :  { %v190_v57 = vpop.f32.mrf.mxu0 }
 0x107   :  { %v191_v59 = vadd.f32 %v3042_v21, %v190_v57  ;;  %v3262_v57 = vperm.slane %v374_v55, 1 }
 0x109   :  { %v208_v60 = vmax.f32 %v191_v59, 0.0  ;;  %5218 = vst [vmem:[#allocation18_spill] sm:$0xff] %v3262_v57 }
 0x10b   :  { %v216_v61 = vpack.c.bf16 %v208_v60, %v207_v58 }
 0x10d   :  { %328 = vmatmul.bf16.gmra.mxu1 %v216_v61 }
 0x11a   :  { %v294_v62 = vpop.f32.mrf.mxu1 }
 0x11b   :  { %v3162_v0 = vadd.f32 %v3159_v63, %v294_v62 }
 0x11d   :  { %5202 = vst [vmem:[#allocation2_spill] sm:$0xff] %v3162_v0  ;;  %v5120_v3 = vmax.f32 %v3162_v0, 0.0 }
 0x122   :  { %v296_v1 = vpop.f32.mrf.mxu1 }
 0x123   :  { %v3165_v2 = vadd.f32 %v3159_v63, %v296_v1 }
 0x125   :  { %5203 = vst [vmem:[#allocation3_spill] sm:$0xff] %v3165_v2  ;;  %v5119_v21 = vmax.f32 %v3165_v2, 0.0 }
 0x127   :  { %v350_v4 = vpack.c.bf16 %v5119_v21, %v5120_v3 }
 0x129   :  { %468 = vmatmul.bf16.vlgmr.msra.gmra.mxu2 %v350_v4  ;;  %517 = vmatmul.bf16.vlgmr.msra.gmra.mxu3 %v350_v4 }
 0x12a   :  { %v299_v5 = vpop.f32.mrf.mxu1 }
 0x12b   :  { %v3174_v6 = vadd.f32 %v3159_v63, %v299_v5 }
 0x12d   :  { %5204 = vst [vmem:[#allocation4_spill] sm:$0xff] %v3174_v6  ;;  %v5117_v8 = vmax.f32 %v3174_v6, 0.0 }
 0x132   :  { %v301_v7 = vpop.f32.mrf.mxu1 }
 0x133   :  { %v3178_v9 = vadd.f32 %v3159_v63, %v301_v7 }
 0x135   :  { %5205 = vst [vmem:[#allocation5_spill] sm:$0xff] %v3178_v9  ;;  %v5116_v10 = vmax.f32 %v3178_v9, 0.0 }
 0x137   :  { %v351_v11 = vpack.c.bf16 %v5116_v10, %v5117_v8 }
 0x139   :  { %473 = vmatmul.bf16.gmra.mxu2 %v351_v11  ;;  %522 = vmatmul.bf16.gmra.mxu3 %v351_v11 }
 0x13a   :  { %v304_v12 = vpop.f32.mrf.mxu1 }
 0x13b   :  { %v3186_v13 = vadd.f32 %v3159_v63, %v304_v12 }
 0x13d   :  { %5206 = vst [vmem:[#allocation6_spill] sm:$0xff] %v3186_v13  ;;  %v5115_v15 = vmax.f32 %v3186_v13, 0.0 }
 0x142   :  { %v306_v14 = vpop.f32.mrf.mxu1 }
 0x143   :  { %v3190_v16 = vadd.f32 %v3159_v63, %v306_v14 }
 0x145   :  { %5207 = vst [vmem:[#allocation7_spill] sm:$0xff] %v3190_v16  ;;  %v5114_v17 = vmax.f32 %v3190_v16, 0.0 }
 0x147   :  { %v352_v18 = vpack.c.bf16 %v5114_v17, %v5115_v15 }
 0x149   :  { %478 = vmatmul.bf16.gmra.mxu2 %v352_v18  ;;  %527 = vmatmul.bf16.gmra.mxu3 %v352_v18 }
 0x14a   :  { %v309_v19 = vpop.f32.mrf.mxu1 }
 0x14b   :  { %v3198_v20 = vadd.f32 %v3159_v63, %v309_v19 }
 0x14d   :  { %5208 = vst [vmem:[#allocation8_spill] sm:$0xff] %v3198_v20  ;;  %v5113_v23 = vmax.f32 %v3198_v20, 0.0 }
 0x152   :  { %v311_v22 = vpop.f32.mrf.mxu1 }
 0x153   :  { %v3202_v24 = vadd.f32 %v3159_v63, %v311_v22 }
 0x155   :  { %5209 = vst [vmem:[#allocation9_spill] sm:$0xff] %v3202_v24  ;;  %v5112_v25 = vmax.f32 %v3202_v24, 0.0 }
 0x157   :  { %v353_v26 = vpack.c.bf16 %v5112_v25, %v5113_v23 }
 0x159   :  { %483 = vmatmul.bf16.gmra.mxu2 %v353_v26  ;;  %532 = vmatmul.bf16.gmra.mxu3 %v353_v26 }
 0x15a   :  { %v314_v27 = vpop.f32.mrf.mxu1 }
 0x15b   :  { %v3210_v28 = vadd.f32 %v3159_v63, %v314_v27 }
 0x15d   :  { %5210 = vst [vmem:[#allocation10_spill] sm:$0xff] %v3210_v28  ;;  %v5121_v30 = vmax.f32 %v3210_v28, 0.0 }
 0x162   :  { %v316_v29 = vpop.f32.mrf.mxu1 }
 0x163   :  { %v3214_v31 = vadd.f32 %v3159_v63, %v316_v29 }
 0x165   :  { %5211 = vst [vmem:[#allocation11_spill] sm:$0xff] %v3214_v31  ;;  %v5111_v32 = vmax.f32 %v3214_v31, 0.0 }
 0x167   :  { %v354_v33 = vpack.c.bf16 %v5111_v32, %v5121_v30 }
 0x169   :  { %488 = vmatmul.bf16.gmra.mxu2 %v354_v33  ;;  %537 = vmatmul.bf16.gmra.mxu3 %v354_v33 }
 0x16a   :  { %v319_v34 = vpop.f32.mrf.mxu1 }
 0x16b   :  { %v3222_v35 = vadd.f32 %v3159_v63, %v319_v34 }
 0x16d   :  { %5212 = vst [vmem:[#allocation12_spill] sm:$0xff] %v3222_v35  ;;  %v5108_v37 = vmax.f32 %v3222_v35, 0.0 }
 0x172   :  { %v321_v36 = vpop.f32.mrf.mxu1 }
 0x173   :  { %v3226_v38 = vadd.f32 %v3159_v63, %v321_v36 }
 0x175   :  { %5213 = vst [vmem:[#allocation13_spill] sm:$0xff] %v3226_v38  ;;  %v5118_v39 = vmax.f32 %v3226_v38, 0.0 }
 0x177   :  { %v355_v40 = vpack.c.bf16 %v5118_v39, %v5108_v37 }
 0x179   :  { %493 = vmatmul.bf16.gmra.mxu2 %v355_v40  ;;  %542 = vmatmul.bf16.gmra.mxu3 %v355_v40 }
 0x17a   :  { %v324_v41 = vpop.f32.mrf.mxu1 }
 0x17b   :  { %v3234_v42 = vadd.f32 %v3159_v63, %v324_v41 }
 0x17d   :  { %5214 = vst [vmem:[#allocation14_spill] sm:$0xff] %v3234_v42  ;;  %v5109_v44 = vmax.f32 %v3234_v42, 0.0 }
 0x182   :  { %v326_v43 = vpop.f32.mrf.mxu1 }
 0x183   :  { %v3238_v45 = vadd.f32 %v3159_v63, %v326_v43 }
 0x185   :  { %5215 = vst [vmem:[#allocation15_spill] sm:$0xff] %v3238_v45  ;;  %v5107_v46 = vmax.f32 %v3238_v45, 0.0 }
 0x187   :  { %v356_v47 = vpack.c.bf16 %v5107_v46, %v5109_v44 }
 0x189   :  { %498 = vmatmul.bf16.gmra.mxu2 %v356_v47  ;;  %547 = vmatmul.bf16.gmra.mxu3 %v356_v47 }
 0x18a   :  { %v329_v48 = vpop.f32.mrf.mxu1 }
 0x18b   :  { %v3246_v49 = vadd.f32 %v3159_v63, %v329_v48 }
 0x18d   :  { %5216 = vst [vmem:[#allocation16_spill] sm:$0xff] %v3246_v49  ;;  %v5110_v51 = vmax.f32 %v3246_v49, 0.0 }
 0x192   :  { %v331_v50 = vpop.f32.mrf.mxu1 }
 0x193   :  { %v3250_v52 = vadd.f32 %v3159_v63, %v331_v50 }
 0x195   :  { %5217 = vst [vmem:[#allocation17_spill] sm:$0xff] %v3250_v52  ;;  %v5106_v53 = vmax.f32 %v3250_v52, 0.0 }
 0x197   :  { %v357_v54 = vpack.c.bf16 %v5106_v53, %v5110_v51 }
 0x199   :  { %503 = vmatmul.bf16.gmra.mxu2 %v357_v54  ;;  %552 = vmatmul.bf16.gmra.mxu3 %v357_v54 }
 0x1ac   :  { %v469_v58 = vpop.f32.mrf.mxu2  ;;  %v518_v59 = vpop.f32.mrf.mxu3 }
 0x1ad   :  { %v3265_v60 = vadd.f32 %v469_v58, %v3260_v56  ;;  %v519_v61 = vadd.f32 %v518_v59, %v3262_v57 }
 0x1af   :  { %2190 = vrot.lane.b32.xlu2 %v519_v61, %s2925_s27  ;;  %2188 = vrot.lane.b32.xlu0 %v3265_v60, %s2925_s27  ;;  %v1419_v62 = vsel %vm1418_vm1, %v3265_v60, -inf  ;;  %v1660_v1 = vsel %vm1659_vm2, %v3265_v60, -inf  ;;  %v559_v26 = vsel %vm558_vm3, %v3265_v60, -inf  ;;  %v1177_v33 = vsel %vm1176_vm4, %v3265_v60, -inf }
 0x1b0   :  { %1420 = vmax.xlane.f32.xlu1 %v1419_v62 }
 0x1b4   :  { %v471_v63 = vpop.f32.mrf.mxu2  ;;  %v520_v7 = vpop.f32.mrf.mxu3 }
 0x1b5   :  { %v3276_v12 = vadd.f32 %v471_v63, %v3260_v56  ;;  %v521_v40 = vadd.f32 %v520_v7, %v3262_v57 }
 0x1b7   :  { %v1180_v22 = vsel %vm1176_vm4, %v3276_v12, -inf  ;;  %v1422_v29 = vsel %vm1418_vm1, %v3276_v12, -inf }
 0x1b8   :  { %1661 = vmax.xlane.f32.xlu1 %v1660_v1  ;;  %v944_v1 = vsel %vm943_vm5, %v3265_v60, -inf }
 0x1bc   :  { %v474_v4 = vpop.f32.mrf.mxu2  ;;  %v523_v14 = vpop.f32.mrf.mxu3 }
 0x1bd   :  { %v524_v19 = vadd.f32 %v523_v14, %v3262_v57  ;;  %v3293_v43 = vadd.f32 %v474_v4, %v3260_v56  ;;  %v945_v14 = vsel %vm943_vm5, %v3276_v12, -inf }
 0x1bf   :  { %v565_v48 = vsel %vm558_vm3, %v3293_v43, -inf  ;;  %v1183_v54 = vsel %vm1176_vm4, %v3293_v43, -inf }
 0x1c4   :  { %v476_v5 = vpop.f32.mrf.mxu2  ;;  %v525_v15 = vpop.f32.mrf.mxu3 }
 0x1c5   :  { %v3302_v58 = vadd.f32 %v476_v5, %v3260_v56 }
 0x1c7   :  { %v568_v59 = vsel %vm558_vm3, %v3302_v58, -inf  ;;  %v1428_v63 = vsel %vm1418_vm1, %v3302_v58, -inf  ;;  %v1669_v37 = vsel %vm1659_vm2, %v3302_v58, -inf }
 0x1cc   :  { %v479_v11 = vpop.f32.mrf.mxu2 }
 0x1cd   :  { %v3314_v4 = vadd.f32 %v479_v11, %v3260_v56  ;;  %v946_v11 = vsel %vm943_vm5, %v3293_v43, -inf }
 0x1cf   :  { %v1189_v20 = vsel %vm1176_vm4, %v3314_v4, -inf }
 0x1d1   :  { %2192 = vrot.lane.b32.xlu1 %v3276_v12, %s2925_s27 }
 0x1d4   :  { %v481_v18 = vpop.f32.mrf.mxu2 }
 0x1d5   :  { %v3307_v62 = vadd.f32 %v481_v18, %v3260_v56 }
 0x1d8   :  { %1181 = vmax.xlane.f32.xlu2 %v1180_v22  ;;  %v562_v22 = vsel %vm558_vm3, %v3276_v12, -inf }
 0x1d9   :  { %2198 = vrot.lane.b32.xlu1 %v524_v19, %s2925_s27  ;;  %560 = vmax.xlane.f32.xlu0 %v559_v26  ;;  %v947_v26 = vsel %vm943_vm5, %v3302_v58, -inf }
 0x1dc   :  { %v484_v27 = vpop.f32.mrf.mxu2 }
 0x1dd   :  { %v3317_v5 = vadd.f32 %v484_v27, %v3260_v56  ;;  %v950_v27 = vsel %vm943_vm5, %v3307_v62, -inf }
 0x1df   :  { %5219 = vst [vmem:[#allocation19_spill] sm:$0xff] %v3317_v5 }
 0x1e0   :  { %1423 = vmax.xlane.f32.xlu2 %v1422_v29 }
 0x1e1   :  { %1178 = vmax.xlane.f32.xlu0 %v1177_v33 }
 0x1e4   :  { %v486_v34 = vpop.f32.mrf.mxu2 }
 0x1e5   :  { %v3322_v18 = vadd.f32 %v486_v34, %v3260_v56 }
 0x1e7   :  { %5220 = vst [vmem:[#allocation20_spill] sm:$0xff] %v3322_v18 }
 0x1ec   :  { %v489_v36 = vpop.f32.mrf.mxu2 }
 0x1ed   :  { %v3336_v29 = vadd.f32 %v489_v36, %v3260_v56  ;;  %v1666_v36 = vsel %vm1659_vm2, %v3293_v43, -inf }
 0x1ef   :  { %5222 = vst [vmem:[#allocation22_spill] sm:$0xff] %v3336_v29  ;;  %v956_v53 = vsel %vm943_vm5, %v3336_v29, -inf }
 0x1f4   :  { %v491_v41 = vpop.f32.mrf.mxu2 }
 0x1f5   :  { %2194 = vrot.lane.b32.xlu0 %v521_v40, %s2925_s27  ;;  %v3325_v19 = vadd.f32 %v491_v41, %v3260_v56  ;;  %v948_v41 = vsel %vm943_vm5, %v3314_v4, -inf }
 0x1f7   :  { %5221 = vst [vmem:[#allocation21_spill] sm:$0xff] %v3325_v19  ;;  %v586_v9 = vsel %vm558_vm3, %v3325_v19, -inf }
 0x1f8   :  { %2196 = vrot.lane.b32.xlu2 %v3293_v43, %s2925_s27 }
 0x1fc   :  { %v494_v47 = vpop.f32.mrf.mxu2 }
 0x1fd   :  { %v3339_v33 = vadd.f32 %v494_v47, %v3260_v56  ;;  %v954_v47 = vsel %vm943_vm5, %v3322_v18, -inf }
 0x1fe   :  { %v955_v51 = vmax.f32 %v947_v26, %v954_v47 }
 0x1ff   :  { %5223 = vst [vmem:[#allocation23_spill] sm:$0xff] %v3339_v33 }
 0x203   :  { %566 = vmax.xlane.f32.xlu1 %v565_v48  ;;  %v952_v48 = vsel %vm943_vm5, %v3317_v5, -inf }
 0x204   :  { %v496_v50 = vpop.f32.mrf.mxu2  ;;  %v953_v44 = vmax.f32 %v946_v11, %v952_v48 }
 0x205   :  { %v3342_v34 = vadd.f32 %v496_v50, %v3260_v56  ;;  %v958_v50 = vsel %vm943_vm5, %v3325_v19, -inf }
 0x207   :  { %5224 = vst [vmem:[#allocation24_spill] sm:$0xff] %v3342_v34  ;;  %v592_v2 = vsel %vm558_vm3, %v3342_v34, -inf }
 0x20b   :  { %1184 = vmax.xlane.f32.xlu1 %v1183_v54  ;;  %v2191_v54 = vpop.permute.xlu2 %2190 }
 0x20c   :  { %v499_v55 = vpop.f32.mrf.mxu2 }
 0x213   :  { %569 = vmax.xlane.f32.xlu1 %v568_v59  ;;  %v3358_v59 = vadd.f32 %v499_v55, %v3260_v56  ;;  %v960_v55 = vsel %vm943_vm5, %v3339_v33, -inf }
 0x214   :  { %v501_v61 = vpop.f32.mrf.mxu2 }
 0x215   :  { %v3345_v40 = vadd.f32 %v501_v61, %v3260_v56  ;;  %5226 = vst [vmem:[#allocation26_spill] sm:$0xff] %v3358_v59  ;;  %v964_v25 = vsel %vm943_vm5, %v3358_v59, -inf }
 0x217   :  { %5225 = vst [vmem:[#allocation25_spill] sm:$0xff] %v3345_v40 }
 0x21b   :  { %1429 = vmax.xlane.f32.xlu1 %v1428_v63 }
 0x21c   :  { %v504_v7 = vpop.f32.mrf.mxu2 }
 0x21d   :  { %v3361_v61 = vadd.f32 %v504_v7, %v3260_v56  ;;  %v962_v7 = vsel %vm943_vm5, %v3342_v34, -inf }
 0x21e   :  { %v963_v11 = vmax.f32 %v955_v51, %v962_v7  ;;  %v3394_v51 = vpop.f32.mrf.mxu3  ;;  %v526_v7 = vadd.f32 %v525_v15, %v3262_v57 }
 0x21f   :  { %563 = vmax.xlane.f32.xlu0 %v562_v22  ;;  %5227 = vst [vmem:[#allocation27_spill] sm:$0xff] %v3361_v61  ;;  %v951_v22 = vmax.f32 %v945_v14, %v950_v27  ;;  %v949_v27 = vmax.f32 %v944_v1, %v948_v41  ;;  %v968_v23 = vsel %vm943_vm5, %v3361_v61, -inf  ;;  %v961_v1 = vmax.f32 %v953_v44, %v960_v55 }
 0x221   :  { %1667 = vmax.xlane.f32.xlu2 %v1666_v36  ;;  %v3363_v63 = vpop.permute.xlu0 %2188  ;;  %v966_v36 = vsel %vm943_vm5, %v3345_v40, -inf  ;;  %v959_v32 = vmax.f32 %v951_v22, %v958_v50  ;;  %v969_v47 = vmax.f32 %v961_v1, %v968_v23 }
 0x222   :  { %5228 = vst [vmem:[#allocation28_spill] sm:$0xff] %v3363_v63  ;;  %v2253_v46 = vsel %vm2252_vm6, %v3363_v63, %v2191_v54 }
 0x223   :  { %v2387_v14 = vsel %vm2386_vm7, %v2253_v46, 0.0  ;;  %1670 = vmax.xlane.f32.xlu1 %v1669_v37  ;;  %v1663_v37 = vsel %vm1659_vm2, %v3276_v12, -inf  ;;  %v957_v46 = vmax.f32 %v949_v27, %v956_v53  ;;  %v967_v26 = vmax.f32 %v959_v32, %v966_v36 }
 0x224   :  { %2404 = vst [vmem:[%s5105_s7 + $0x8] sm:$0xff] %v2387_v14  ;;  %v506_v54 = vpop.f32.mrf.mxu2 }
 0x225   :  { %v3386_v17 = vadd.f32 %v506_v54, %v3260_v56  ;;  %v965_v48 = vmax.f32 %v957_v46, %v964_v25  ;;  %v1425_v54 = vsel %vm1418_vm1, %v3293_v43, -inf }
 0x226   :  { %v530_v15 = vpop.f32.mrf.mxu3 }
 0x227   :  { %5229 = vst [vmem:[#allocation29_spill] sm:$0xff] %v3386_v17  ;;  %v970_v41 = vsel %vm943_vm5, %v3386_v17, -inf  ;;  %1664 = vmax.xlane.f32.xlu0 %v1663_v37  ;;  %v972_v22 = vmax.f32 %v965_v48, %v967_v26  ;;  %v3412_v26 = vpop.xlane.xlu1 %1420  ;;  %v1464_v13 = vsel %vm1418_vm1, %v3386_v17, -inf }
 0x228   :  { %v971_v50 = vmax.f32 %v963_v11, %v970_v41 }
 0x22a   :  { %v973_v14 = vmax.f32 %v969_v47, %v971_v50  ;;  %v531_v47 = vadd.f32 %v530_v15, %v3262_v57 }
 0x22c   :  { %v974_v10 = vmax.f32 %v972_v22, %v973_v14 }
 0x22e   :  { %v975_v56 = vrot.slane %v974_v10, 4 }
 0x22f   :  { %1426 = vmax.xlane.f32.xlu0 %v1425_v54  ;;  %v3440_v15 = vpop.xlane.xlu1 %1661 }
 0x230   :  { %v976_v53 = vmax.f32 %v974_v10, %v975_v56 }
 0x232   :  { %v977_v44 = vrot.slane %v976_v53, 2 }
 0x234   :  { %v978_v32 = vmax.f32 %v976_v53, %v977_v44 }
 0x236   :  { %v979_v55 = vrot.slane %v978_v32, 1 }
 0x238   :  { %v3397_v25 = vmax.f32 %v978_v32, %v979_v55 }
 0x239   :  { %2202 = vrot.lane.b32.xlu2 %v526_v7, %s2925_s27 }
 0x23a   :  { %v981_v23 = vsub.f32 %v3265_v60, %v3397_v25  ;;  %v982_v36 = vsub.f32 %v3276_v12, %v3397_v25  ;;  %v983_v10 = vsub.f32 %v3293_v43, %v3397_v25  ;;  %v984_v27 = vsub.f32 %v3302_v58, %v3397_v25 }
 0x23b   :  { %v985_v37 = vsub.f32 %v3314_v4, %v3397_v25  ;;  %v986_v41 = vsub.f32 %v3307_v62, %v3397_v25  ;;  %v987_v50 = vsub.f32 %v3317_v5, %v3397_v25  ;;  %v988_v14 = vsub.f32 %v3322_v18, %v3397_v25 }
 0x23c   :  { %2204 = vrot.lane.b32.xlu1 %v3314_v4, %s2925_s27  ;;  %v997_v46 = vmul.f32 1.442695, %v981_v23  ;;  %v999_v1 = vmul.f32 1.442695, %v982_v36  ;;  %v1001_v11 = vmul.f32 1.442695, %v983_v10  ;;  %v989_v54 = vsub.f32 %v3336_v29, %v3397_v25 }
 0x23d   :  { %v1003_v48 = vmul.f32 1.442695, %v984_v27  ;;  %v1005_v22 = vmul.f32 1.442695, %v985_v37  ;;  %v1007_v56 = vmul.f32 1.442695, %v986_v41  ;;  %v990_v55 = vsub.f32 %v3325_v19, %v3397_v25 }
 0x23e   :  { %2635 = vpow2.f32 %v997_v46  ;;  %v1009_v53 = vmul.f32 1.442695, %v987_v50  ;;  %v1011_v7 = vmul.f32 1.442695, %v988_v14  ;;  %v991_v37 = vsub.f32 %v3339_v33, %v3397_v25 }
 0x23f   :  { %2637 = vpow2.f32 %v999_v1  ;;  %v1013_v46 = vmul.f32 1.442695, %v989_v54  ;;  %v1015_v50 = vmul.f32 1.442695, %v990_v55  ;;  %v993_v54 = vsub.f32 %v3358_v59, %v3397_v25 }
 0x240   :  { %2639 = vpow2.f32 %v1001_v11  ;;  %v994_v55 = vsub.f32 %v3345_v40, %v3397_v25 }
 0x241   :  { %2641 = vpow2.f32 %v1003_v48 }
 0x242   :  { %2643 = vpow2.f32 %v1005_v22 }
 0x243   :  { %2200 = vrot.lane.b32.xlu0 %v3302_v58, %s2925_s27  ;;  %2645 = vpow2.f32 %v1007_v56  ;;  %v3468_v21 = vpop.permute.xlu1 %2192 }
 0x244   :  { %2210 = vrot.lane.b32.xlu1 %v531_v47, %s2925_s27  ;;  %v3426_v44 = vpop.eup %2635  ;;  %2647 = vpow2.f32 %v1009_v53  ;;  %v992_v47 = vsub.f32 %v3342_v34, %v3397_v25  ;;  %v1017_v53 = vmul.f32 1.442695, %v991_v37  ;;  %5230 = vst [vmem:[#allocation30_spill] sm:$0xff] %v3468_v21  ;;  %v995_v37 = vsub.f32 %v3361_v61, %v3397_v25 }
 0x245   :  { %v3428_v32 = vpop.eup %2637  ;;  %v1029_v23 = vsel %vm943_vm5, %v3426_v44, 0.0  ;;  %2649 = vpow2.f32 %v1011_v7 }
 0x246   :  { %v3434_v36 = vpop.eup %2639  ;;  %v1030_v10 = vsel %vm943_vm5, %v3428_v32, 0.0  ;;  %2651 = vpow2.f32 %v1013_v46  ;;  %v1019_v7 = vmul.f32 1.442695, %v992_v47  ;;  %v1021_v46 = vmul.f32 1.442695, %v993_v54 }
 0x247   :  { %v3438_v27 = vpop.eup %2641  ;;  %v1031_v1 = vadd.f32 %v1030_v10, %v1029_v23  ;;  %v1032_v11 = vsel %vm943_vm5, %v3434_v36, 0.0  ;;  %2653 = vpow2.f32 %v1015_v50  ;;  %v996_v50 = vsub.f32 %v3386_v17, %v3397_v25 }
 0x248   :  { %v3446_v41 = vpop.eup %2643  ;;  %v1034_v14 = vsel %vm943_vm5, %v3438_v27, 0.0  ;;  %2655 = vpow2.f32 %v1017_v53  ;;  %v1025_v53 = vmul.f32 1.442695, %v995_v37 }
 0x249   :  { %v1033_v22 = vadd.f32 %v1032_v11, %v1031_v1  ;;  %v3454_v56 = vpop.eup %2645  ;;  %v1036_v10 = vsel %vm943_vm5, %v3446_v41, 0.0  ;;  %2657 = vpow2.f32 %v1019_v7  ;;  %v1027_v25 = vmul.f32 1.442695, %v996_v50 }
 0x24a   :  { %v3460_v8 = vpop.eup %2647  ;;  %v1038_v11 = vsel %vm943_vm5, %v3454_v56, 0.0  ;;  %2659 = vpow2.f32 %v1021_v46 }
 0x24b   :  { %v3448_v48 = vpop.xlane.xlu2 %1181  ;;  %v1035_v23 = vadd.f32 %v1034_v14, %v1033_v22  ;;  %v3466_v39 = vpop.eup %2649  ;;  %v1040_v14 = vsel %vm943_vm5, %v3460_v8, 0.0 }
 0x24c   :  { %v3474_v3 = vpop.eup %2651  ;;  %v1042_v30 = vsel %vm943_vm5, %v3466_v39, 0.0  ;;  %v3484_v54 = vpop.xlane.xlu0 %560 }
 0x24d   :  { %v1037_v1 = vadd.f32 %v1036_v10, %v1035_v23  ;;  %v1023_v23 = vmul.f32 1.442695, %v994_v55  ;;  %v3482_v52 = vpop.eup %2653 }
 0x24e   :  { %v3488_v45 = vpop.eup %2655  ;;  %v1046_v55 = vsel %vm943_vm5, %v3482_v52, 0.0 }
 0x24f   :  { %v1039_v22 = vadd.f32 %v1038_v11, %v1037_v1  ;;  %v1044_v11 = vsel %vm943_vm5, %v3474_v3, 0.0  ;;  %2661 = vpow2.f32 %v1023_v23  ;;  %v1048_v37 = vsel %vm943_vm5, %v3488_v45, 0.0 }
 0x250   :  { %2663 = vpow2.f32 %v1025_v53 }
 0x251   :  { %v1041_v10 = vadd.f32 %v1040_v14, %v1039_v22  ;;  %v3492_v22 = vpop.eup %2657  ;;  %v2199_v14 = vpop.permute.xlu1 %2198  ;;  %2665 = vpow2.f32 %v1027_v25 }
 0x252   :  { %v1050_v23 = vsel %vm943_vm5, %v3492_v22, 0.0 }
 0x253   :  { %v3476_v47 = vpop.xlane.xlu2 %1423  ;;  %v1043_v1 = vadd.f32 %v1042_v30, %v1041_v10  ;;  %v3496_v30 = vpop.eup %2659 }
 0x255   :  { %v1045_v7 = vadd.f32 %v1044_v11, %v1043_v1  ;;  %v2662_v1 = vpop.eup %2661 }
 0x257   :  { %v1047_v35 = vadd.f32 %v1046_v55, %v1045_v7  ;;  %v1052_v7 = vsel %vm943_vm5, %v3496_v30, 0.0  ;;  %v3510_v55 = vpop.eup %2663 }
 0x259   :  { %v1049_v10 = vadd.f32 %v1048_v37, %v1047_v35  ;;  %v3512_v35 = vpop.xlane.xlu0 %1178  ;;  %v3515_v37 = vpop.eup %2665 }
 0x25a   :  { %v1058_v42 = vsel %vm943_vm5, %v3515_v37, 0.0 }
 0x25b   :  { %v3498_v46 = vpop.permute.xlu2 %2196  ;;  %v1051_v53 = vadd.f32 %v1050_v23, %v1049_v10  ;;  %v1056_v23 = vsel %vm943_vm5, %v3510_v55, 0.0 }
 0x25c   :  { %5231 = vst [vmem:[#allocation31_spill] sm:$0xff] %v3498_v46  ;;  %v2255_v50 = vsel %vm2252_vm6, %v3498_v46, %v2199_v14  ;;  %v1054_v14 = vsel %vm943_vm5, %v2662_v1, 0.0 }
 0x25d   :  { %v2389_v11 = vsel %vm2386_vm7, %v2255_v50, 0.0  ;;  %v1053_v25 = vadd.f32 %v1052_v7, %v1051_v53  ;;  %v571_v50 = vsel %vm558_vm3, %v3314_v4, -inf }
 0x25e   :  { %2408 = vst [vmem:[%s5105_s7 + $0x28] sm:$0xff] %v2389_v11 }
 0x25f   :  { %v1055_v10 = vadd.f32 %v1054_v14, %v1053_v25 }
 0x261   :  { %v1057_v11 = vadd.f32 %v1056_v23, %v1055_v10  ;;  %v1431_v23 = vsel %vm1418_vm1, %v3314_v4, -inf }
 0x262   :  { %572 = vmax.xlane.f32.xlu2 %v571_v50  ;;  %v1192_v50 = vsel %vm1176_vm4, %v3307_v62, -inf }
 0x263   :  { %v1059_v49 = vadd.f32 %v1058_v42, %v1057_v11  ;;  %v1186_v42 = vsel %vm1176_vm4, %v3302_v58, -inf }
 0x265   :  { %v1060_v24 = vrot.slane %v1059_v49, 4 }
 0x267   :  { %v2195_v31 = vpop.permute.xlu0 %2194  ;;  %v1061_v25 = vadd.f32 %v1060_v24, %v1059_v49  ;;  %v1437_v49 = vsel %vm1418_vm1, %v3317_v5, -inf }
 0x268   :  { %v2254_v53 = vsel %vm2252_vm6, %v3468_v21, %v2195_v31 }
 0x269   :  { %v2388_v7 = vsel %vm2386_vm7, %v2254_v53, 0.0  ;;  %v1062_v14 = vrot.slane %v1061_v25, 2  ;;  %v1678_v53 = vsel %vm1659_vm2, %v3317_v5, -inf }
 0x26a   :  { %2406 = vst [vmem:[%s5105_s7 + $0x18] sm:$0xff] %v2388_v7  ;;  %1190 = vmax.xlane.f32.xlu2 %v1189_v20 }
 0x26b   :  { %v1063_v31 = vadd.f32 %v1062_v14, %v1061_v25 }
 0x26d   :  { %1187 = vmax.xlane.f32.xlu0 %v1186_v42  ;;  %v1064_v10 = vrot.slane %v1063_v31, 1 }
 0x26e   :  { %1193 = vmax.xlane.f32.xlu1 %v1192_v50  ;;  %v529_v50 = vadd.f32 %v3394_v51, %v3262_v57 }
 0x26f   :  { %v1065_v24 = vadd.f32 %v1064_v10, %v1063_v31 }
 0x271   :  { %2667 = vrcp.f32 %v1065_v24  ;;  %v1077_v42 = vand.u32 2147483648, %v1065_v24  ;;  %v1075_v14 = vand.u32 2147483647, %v1065_v24  ;;  %vm1071_vm9 = vweird.f32 %v1065_v24 }
 0x272   :  { %1432 = vmax.xlane.f32.xlu2 %v1431_v23 }
 0x273   :  { %v1078_v10 = vor.u32 1.1754944e-38, %v1077_v42  ;;  %vm1076_vm11 = vcmp.eq.f32.partialorder %v1075_v14, 8.507059e+37 }
 0x276   :  { %1438 = vmax.xlane.f32.xlu1 %v1437_v49  ;;  %v580_v49 = vsel %vm558_vm3, %v3322_v18, -inf }
 0x277   :  { %v2668_v20 = vpop.eup %2667 }
 0x278   :  { %v1067_v11 = vmul.f32 %v2668_v20, %v1065_v24  ;;  %vm1072_vm8 = vweird.f32 %v2668_v20 }
 0x279   :  { %vm1073_vm10 = vmor %vm1071_vm9, %vm1072_vm8 }
 0x27a   :  { %v1068_v7 = vsub.f32 1.0, %v1067_v11 }
 0x27c   :  { %v1069_v25 = vmul.f32 %v2668_v20, %v1068_v7 }
 0x27e   :  { %1679 = vmax.xlane.f32.xlu1 %v1678_v53  ;;  %v1070_v31 = vadd.f32 %v2668_v20, %v1069_v25  ;;  %v1672_v25 = vsel %vm1659_vm2, %v3314_v4, -inf }
 0x280   :  { %v1074_v23 = vsel %vm1073_vm10, %v2668_v20, %v1070_v31 }
 0x281   :  { %2206 = vrot.lane.b32.xlu0 %v529_v50, %s2925_s27  ;;  %v3546_v11 = vsel %vm1076_vm11, %v1078_v10, %v1074_v23  ;;  %v1210_v50 = vsel %vm1176_vm4, %v3342_v34, -inf  ;;  %v574_v10 = vsel %vm558_vm3, %v3307_v62, -inf  ;;  %v1434_v23 = vsel %vm1418_vm1, %v3307_v62, -inf }
 0x282   :  { %v3550_v53 = vmul.f32 %v3428_v32, %v3546_v11  ;;  %v3554_v51 = vmul.f32 %v3446_v41, %v3546_v11  ;;  %v3558_v24 = vmul.f32 %v3466_v39, %v3546_v11  ;;  %v3562_v20 = vmul.f32 %v3488_v45, %v3546_v11 }
 0x283   :  { %v3565_v7 = vmul.f32 %v2662_v1, %v3546_v11  ;;  %v3569_v32 = vmul.f32 %v3426_v44, %v3546_v11  ;;  %v3573_v41 = vmul.f32 %v3438_v27, %v3546_v11  ;;  %v3577_v39 = vmul.f32 %v3454_v56, %v3546_v11 }
 0x284   :  { %v3581_v42 = vmul.f32 %v3474_v3, %v3546_v11  ;;  %v3585_v45 = vmul.f32 %v3492_v22, %v3546_v11  ;;  %v3589_v44 = vmul.f32 %v3510_v55, %v3546_v11  ;;  %v1201_v27 = vsel %vm1176_vm4, %v3336_v29, -inf }
 0x285   :  { %v1446_v56 = vsel %vm1418_vm1, %v3325_v19, -inf  ;;  %v1687_v22 = vsel %vm1659_vm2, %v3325_v19, -inf  ;;  %v589_v55 = vsel %vm558_vm3, %v3339_v33, -inf }
 0x286   :  { %581 = vmax.xlane.f32.xlu1 %v580_v49  ;;  %v3617_v49 = vpop.xlane.xlu1 %566 }
 0x28a   :  { %2208 = vrot.lane.b32.xlu2 %v3307_v62, %s2925_s27 }
 0x28e   :  { %1202 = vmax.xlane.f32.xlu1 %v1201_v27  ;;  %v1455_v27 = vsel %vm1418_vm1, %v3358_v59, -inf  ;;  %v3635_v16 = vpop.xlane.xlu1 %1184 }
 0x292   :  { %v3597_v3 = vpop.xlane.xlu0 %563 }
 0x294   :  { %v3607_v14 = vpop.xlane.xlu2 %1667 }
 0x296   :  { %1447 = vmax.xlane.f32.xlu1 %v1446_v56 }
 0x29a   :  { %v3601_v1 = vpop.xlane.xlu0 %1664 }
 0x29c   :  { %v2203_v56 = vpop.permute.xlu2 %2202 }
 0x29e   :  { %1688 = vmax.xlane.f32.xlu1 %v1687_v22 }
 0x2a2   :  { %v3611_v31 = vpop.xlane.xlu0 %1426 }
 0x2a6   :  { %590 = vmax.xlane.f32.xlu1 %v589_v55 }
 0x2ab   :  { %1673 = vmax.xlane.f32.xlu0 %v1672_v25 }
 0x2ae   :  { %1211 = vmax.xlane.f32.xlu1 %v1210_v50  ;;  %v1675_v50 = vsel %vm1659_vm2, %v3307_v62, -inf }
 0x2b3   :  { %575 = vmax.xlane.f32.xlu2 %v574_v10  ;;  %1435 = vmax.xlane.f32.xlu0 %v1434_v23  ;;  %v577_v10 = vsel %vm558_vm3, %v3317_v5, -inf  ;;  %v1696_v23 = vsel %vm1659_vm2, %v3358_v59, -inf }
 0x2b5   :  { %v3621_v22 = vpop.permute.xlu0 %2200 }
 0x2b6   :  { %5232 = vst [vmem:[#allocation32_spill] sm:$0xff] %v3621_v22  ;;  %v2256_v55 = vsel %vm2252_vm6, %v3621_v22, %v2203_v56  ;;  %1456 = vmax.xlane.f32.xlu1 %v1455_v27  ;;  %v1198_v27 = vsel %vm1176_vm4, %v3322_v18, -inf  ;;  %v1195_v56 = vsel %vm1176_vm4, %v3317_v5, -inf  ;;  %v1684_v22 = vsel %vm1659_vm2, %v3336_v29, -inf }
 0x2b7   :  { %v2390_v25 = vsel %vm2386_vm7, %v2256_v55, 0.0  ;;  %v598_v55 = vsel %vm558_vm3, %v3345_v40, -inf }
 0x2b8   :  { %2410 = vst [vmem:[%s5105_s7 + $0x38] sm:$0xff] %v2390_v25  ;;  %v3643_v25 = vpop.xlane.xlu1 %569 }
 0x2bb   :  { %1676 = vmax.xlane.f32.xlu2 %v1675_v50  ;;  %578 = vmax.xlane.f32.xlu0 %v577_v10  ;;  %v1440_v50 = vsel %vm1418_vm1, %v3322_v18, -inf  ;;  %v1681_v10 = vsel %vm1659_vm2, %v3322_v18, -inf }
 0x2be   :  { %1697 = vmax.xlane.f32.xlu1 %v1696_v23  ;;  %v1219_v23 = vsel %vm1176_vm4, %v3361_v61, -inf }
 0x2c3   :  { %1199 = vmax.xlane.f32.xlu2 %v1198_v27  ;;  %1196 = vmax.xlane.f32.xlu0 %v1195_v56  ;;  %v3651_v27 = vpop.xlane.xlu1 %1429  ;;  %v583_v56 = vsel %vm558_vm3, %v3336_v29, -inf }
 0x2c6   :  { %599 = vmax.xlane.f32.xlu1 %v598_v55  ;;  %v1443_v55 = vsel %vm1418_vm1, %v3336_v29, -inf }
 0x2cb   :  { %1441 = vmax.xlane.f32.xlu2 %v1440_v50  ;;  %1682 = vmax.xlane.f32.xlu0 %v1681_v10  ;;  %v607_v50 = vsub.f32 %v3265_v60, %v3484_v54  ;;  %v3667_v46 = vpop.xlane.xlu1 %1670 }
 0x2ce   :  { %1220 = vmax.xlane.f32.xlu1 %v1219_v23  ;;  %v623_v23 = vmul.f32 1.442695, %v607_v50  ;;  %v1204_v50 = vsel %vm1176_vm4, %v3325_v19, -inf }
 0x2d0   :  { %2669 = vpow2.f32 %v623_v23  ;;  %v1449_v23 = vsel %vm1418_vm1, %v3339_v33, -inf }
 0x2d3   :  { %584 = vmax.xlane.f32.xlu2 %v583_v56  ;;  %1444 = vmax.xlane.f32.xlu0 %v1443_v55  ;;  %v1705_v56 = vsel %vm1659_vm2, %v3386_v17, -inf  ;;  %v3679_v6 = vpop.permute.xlu1 %2204 }
 0x2d4   :  { %5233 = vst [vmem:[#allocation33_spill] sm:$0xff] %v3679_v6 }
 0x2d5   :  { %v3661_v10 = vpop.xlane.xlu2 %572 }
 0x2d6   :  { %1465 = vmax.xlane.f32.xlu1 %v1464_v13  ;;  %v3673_v54 = vpop.eup %2669  ;;  %v1207_v13 = vsel %vm1176_vm4, %v3339_v33, -inf }
 0x2db   :  { %1685 = vmax.xlane.f32.xlu2 %v1684_v22  ;;  %587 = vmax.xlane.f32.xlu0 %v586_v9  ;;  %v655_v22 = vsel %vm558_vm3, %v3673_v54, 0.0  ;;  %v2211_v57 = vpop.permute.xlu1 %2210 }
 0x2dd   :  { %v3671_v55 = vpop.xlane.xlu2 %1190 }
 0x2de   :  { %1706 = vmax.xlane.f32.xlu1 %v1705_v56  ;;  %v1690_v56 = vsel %vm1659_vm2, %v3339_v33, -inf }
 0x2e0   :  { %v3689_v38 = vpop.xlane.xlu0 %1187 }
 0x2e3   :  { %1208 = vmax.xlane.f32.xlu2 %v1207_v13  ;;  %1205 = vmax.xlane.f32.xlu0 %v1204_v50 }
 0x2e5   :  { %v3681_v9 = vpop.xlane.xlu2 %1432 }
 0x2e6   :  { %656 = vadd.xlane.f32.xlu1 %v655_v22  ;;  %v1226_v22 = vsub.f32 %v3276_v12, %v3448_v48  ;;  %v1469_v48 = vsub.f32 %v3293_v43, %v3611_v31  ;;  %v1216_v31 = vsel %vm1176_vm4, %v3345_v40, -inf }
 0x2e8   :  { %v1243_v63 = vmul.f32 1.442695, %v1226_v22  ;;  %v1487_v22 = vmul.f32 1.442695, %v1469_v48  ;;  %v1699_v48 = vsel %vm1659_vm2, %v3345_v40, -inf }
 0x2ea   :  { %2671 = vpow2.f32 %v1243_v63  ;;  %v1710_v63 = vsub.f32 %v3293_v43, %v3607_v14  ;;  %v1458_v14 = vsel %vm1418_vm1, %v3345_v40, -inf }
 0x2eb   :  { %1450 = vmax.xlane.f32.xlu2 %v1449_v23  ;;  %1691 = vmax.xlane.f32.xlu0 %v1690_v56  ;;  %v1452_v23 = vsel %vm1418_vm1, %v3342_v34, -inf  ;;  %2673 = vpow2.f32 %v1487_v22  ;;  %v1461_v22 = vsel %vm1418_vm1, %v3361_v61, -inf }
 0x2ed   :  { %v3691_v21 = vpop.permute.xlu2 %2208 }
 0x2ee   :  { %5234 = vst [vmem:[#allocation34_spill] sm:$0xff] %v3691_v21  ;;  %v2258_v13 = vsel %vm2252_vm6, %v3691_v21, %v2211_v57  ;;  %v1467_v21 = vsub.f32 %v3265_v60, %v3412_v26 }
 0x2ef   :  { %v2392_v50 = vsel %vm2386_vm7, %v2258_v13, 0.0 }
 0x2f0   :  { %2414 = vst [vmem:[%s5105_s7 + $0x58] sm:$0xff] %v2392_v50  ;;  %v1693_v50 = vsel %vm1659_vm2, %v3342_v34, -inf }
 0x2f3   :  { %593 = vmax.xlane.f32.xlu2 %v592_v2  ;;  %1453 = vmax.xlane.f32.xlu0 %v1452_v23  ;;  %v2207_v56 = vpop.permute.xlu0 %2206  ;;  %v595_v2 = vsel %vm558_vm3, %v3358_v59, -inf  ;;  %v3717_v23 = vpop.eup %2671 }
 0x2f4   :  { %v2257_v57 = vsel %vm2252_vm6, %v3679_v6, %v2207_v56  ;;  %5235 = vst [vmem:[#allocation35_spill] sm:$0xff] %v3717_v23  ;;  %v1213_v56 = vsel %vm1176_vm4, %v3358_v59, -inf }
 0x2f5   :  { %v2391_v13 = vsel %vm2386_vm7, %v2257_v57, 0.0  ;;  %v1728_v57 = vmul.f32 1.442695, %v1710_v63  ;;  %v1702_v63 = vsel %vm1659_vm2, %v3361_v61, -inf }
 0x2f6   :  { %2412 = vst [vmem:[%s5105_s7 + $0x48] sm:$0xff] %v2391_v13  ;;  %v3727_v13 = vpop.eup %2673 }
 0x2f7   :  { %5236 = vst [vmem:[#allocation36_spill] sm:$0xff] %v3727_v13  ;;  %2675 = vpow2.f32 %v1728_v57  ;;  %v1225_v57 = vsub.f32 %v3265_v60, %v3512_v35 }
 0x2fb   :  { %1694 = vmax.xlane.f32.xlu2 %v1693_v50  ;;  %596 = vmax.xlane.f32.xlu0 %v595_v2  ;;  %v601_v2 = vsel %vm558_vm3, %v3361_v61, -inf }
 0x2fd   :  { %v3735_v50 = vpop.eup %2675 }
 0x2fe   :  { %5237 = vst [vmem:[#allocation37_spill] sm:$0xff] %v3735_v50 }
 0x2ff   :  { %1291 = vrot.lane.b32.xlu1 %v3717_v23, %s2926_s15 }
 0x303   :  { %1217 = vmax.xlane.f32.xlu2 %v1216_v31  ;;  %1214 = vmax.xlane.f32.xlu0 %v1213_v56  ;;  %v604_v31 = vsel %vm558_vm3, %v3386_v17, -inf  ;;  %v1222_v56 = vsel %vm1176_vm4, %v3386_v17, -inf }
 0x307   :  { %1535 = vrot.lane.b32.xlu1 %v3727_v13, %s2927_s16 }
 0x30b   :  { %1459 = vmax.xlane.f32.xlu2 %v1458_v14  ;;  %1700 = vmax.xlane.f32.xlu0 %v1699_v48  ;;  %v610_v14 = vsub.f32 %v3302_v58, %v3643_v25  ;;  %v1708_v48 = vsub.f32 %v3265_v60, %v3440_v15  ;;  %v1709_v25 = vsub.f32 %v3276_v12, %v3601_v1 }
 0x30d   :  { %v1726_v26 = vmul.f32 1.442695, %v1709_v25 }
 0x30f   :  { %1776 = vrot.lane.b32.xlu1 %v3735_v50, %s2928_s17 }
 0x313   :  { %602 = vmax.xlane.f32.xlu2 %v601_v2  ;;  %1462 = vmax.xlane.f32.xlu0 %v1461_v22  ;;  %v1241_v2 = vmul.f32 1.442695, %v1225_v57  ;;  %v629_v22 = vmul.f32 1.442695, %v610_v14 }
 0x315   :  { %2677 = vpow2.f32 %v1241_v2 }
 0x316   :  { %2679 = vpow2.f32 %v629_v22 }
 0x31b   :  { %1703 = vmax.xlane.f32.xlu2 %v1702_v63  ;;  %605 = vmax.xlane.f32.xlu0 %v604_v31  ;;  %v1724_v63 = vmul.f32 1.442695, %v1708_v48  ;;  %v1483_v31 = vmul.f32 1.442695, %v1467_v21  ;;  %v3759_v35 = vpop.eup %2677  ;;  %v1227_v21 = vsub.f32 %v3293_v43, %v3635_v16  ;;  %v1194_v48 = vpop.xlane.xlu1 %1193 }
 0x31c   :  { %5238 = vst [vmem:[#allocation38_spill] sm:$0xff] %v3759_v35  ;;  %v3765_v57 = vpop.eup %2679 }
 0x31d   :  { %2681 = vpow2.f32 %v1724_v63  ;;  %v1245_v1 = vmul.f32 1.442695, %v1227_v21  ;;  %v1230_v63 = vsub.f32 %v3307_v62, %v1194_v48 }
 0x31e   :  { %2683 = vpow2.f32 %v1483_v31  ;;  %v3781_v22 = vpop.xlane.xlu0 %1673 }
 0x323   :  { %1223 = vmax.xlane.f32.xlu0 %v1222_v56  ;;  %v1468_v56 = vsub.f32 %v3276_v12, %v3476_v47  ;;  %v3767_v60 = vpop.eup %2681  ;;  %v664_v47 = vsel %vm558_vm3, %v3765_v57, 0.0 }
 0x324   :  { %v3775_v14 = vpop.eup %2683 }
 0x325   :  { %v1485_v15 = vmul.f32 1.442695, %v1468_v56  ;;  %5239 = vst [vmem:[#allocation39_spill] sm:$0xff] %v3775_v14  ;;  %v3792_v56 = vpop.xlane.xlu1 %1438 }
 0x326   :  { %v1436_v25 = vpop.xlane.xlu0 %1435 }
 0x327   :  { %2685 = vpow2.f32 %v1485_v15  ;;  %v1251_v15 = vmul.f32 1.442695, %v1230_v63  ;;  %v1472_v21 = vsub.f32 %v3307_v62, %v1436_v25  ;;  %v608_v63 = vsub.f32 %v3276_v12, %v3597_v3 }
 0x328   :  { %2687 = vpow2.f32 %v1726_v26  ;;  %v609_v25 = vsub.f32 %v3293_v43, %v3617_v49  ;;  %v1228_v43 = vsub.f32 %v3302_v58, %v3689_v38  ;;  %v1470_v49 = vsub.f32 %v3302_v58, %v3651_v27 }
 0x329   :  { %2689 = vpow2.f32 %v1245_v1  ;;  %v1493_v26 = vmul.f32 1.442695, %v1472_v21 }
 0x32a   :  { %2691 = vpow2.f32 %v1251_v15  ;;  %v625_v15 = vmul.f32 1.442695, %v608_v63  ;;  %v1247_v63 = vmul.f32 1.442695, %v1228_v43 }
 0x32b   :  { %2693 = vpow2.f32 %v1493_v26  ;;  %v627_v26 = vmul.f32 1.442695, %v609_v25 }
 0x32d   :  { %v3779_v2 = vpop.eup %2685 }
 0x32e   :  { %v3785_v16 = vpop.eup %2687 }
 0x32f   :  { %5240 = vst [vmem:[#allocation40_spill] sm:$0xff] %v3785_v16  ;;  %v3790_v31 = vpop.eup %2689 }
 0x330   :  { %v3797_v1 = vpop.eup %2691 }
 0x331   :  { %5241 = vst [vmem:[#allocation41_spill] sm:$0xff] %v3797_v1  ;;  %v3802_v0 = vpop.eup %2693 }
 0x332   :  { %5242 = vst [vmem:[#allocation42_spill] sm:$0xff] %v3802_v0 }
 0x333   :  { %1289 = vrot.lane.b32.xlu2 %v3759_v35, %s2926_s15 }
 0x337   :  { %1772 = vrot.lane.b32.xlu0 %v3767_v60, %s2928_s17 }
 0x339   :  { %665 = vadd.xlane.f32.xlu1 %v664_v47  ;;  %v1680_v47 = vpop.xlane.xlu1 %1679 }
 0x33a   :  { %v1714_v48 = vsub.f32 %v3317_v5, %v1680_v47 }
 0x33b   :  { %1531 = vrot.lane.b32.xlu2 %v3775_v14, %s2927_s16 }
 0x33c   :  { %v1736_v6 = vmul.f32 1.442695, %v1714_v48  ;;  %v579_v48 = vpop.xlane.xlu0 %578 }
 0x33d   :  { %v613_v25 = vsub.f32 %v3317_v5, %v579_v48 }
 0x33e   :  { %2695 = vpow2.f32 %v1736_v6 }
 0x33f   :  { %1533 = vrot.lane.b32.xlu0 %v3779_v2, %s2927_s16  ;;  %2697 = vpow2.f32 %v625_v15  ;;  %v1489_v15 = vmul.f32 1.442695, %v1470_v49 }
 0x340   :  { %2699 = vpow2.f32 %v627_v26  ;;  %v1471_v26 = vsub.f32 %v3314_v4, %v3681_v9  ;;  %v1712_v9 = vsub.f32 %v3314_v4, %v3781_v22 }
 0x341   :  { %2701 = vpow2.f32 %v1247_v63  ;;  %v3837_v43 = vpop.xlane.xlu1 %581 }
 0x342   :  { %2703 = vpow2.f32 %v1489_v15  ;;  %v1491_v28 = vmul.f32 1.442695, %v1471_v26  ;;  %v1732_v48 = vmul.f32 1.442695, %v1712_v9 }
 0x343   :  { %1774 = vrot.lane.b32.xlu2 %v3785_v16, %s2928_s17 }
 0x344   :  { %v3810_v21 = vpop.eup %2695 }
 0x345   :  { %5243 = vst [vmem:[#allocation43_spill] sm:$0xff] %v3810_v21  ;;  %v3814_v47 = vpop.eup %2697 }
 0x346   :  { %v658_v12 = vsel %vm558_vm3, %v3814_v47, 0.0  ;;  %v3818_v3 = vpop.eup %2699 }
 0x347   :  { %1293 = vrot.lane.b32.xlu0 %v3790_v31, %s2926_s15  ;;  %v661_v6 = vsel %vm558_vm3, %v3818_v3, 0.0  ;;  %v3831_v50 = vpop.eup %2701 }
 0x348   :  { %5244 = vst [vmem:[#allocation44_spill] sm:$0xff] %v3831_v50  ;;  %v3833_v27 = vpop.eup %2703 }
 0x349   :  { %5245 = vst [vmem:[#allocation45_spill] sm:$0xff] %v3833_v27  ;;  %v1203_v22 = vpop.xlane.xlu1 %1202 }
 0x352   :  { %1299 = vrot.lane.b32.xlu1 %v3797_v1, %s2926_s15 }
 0x35a   :  { %1541 = vrot.lane.b32.xlu1 %v3802_v0, %s2927_s16  ;;  %v576_v0 = vpop.xlane.xlu2 %575 }
 0x362   :  { %1784 = vrot.lane.b32.xlu1 %v3810_v21, %s2928_s17 }
 0x36c   :  { %659 = vadd.xlane.f32.xlu2 %v658_v12  ;;  %v1711_v12 = vsub.f32 %v3302_v58, %v3667_v46  ;;  %v1229_v58 = vsub.f32 %v3314_v4, %v3671_v55  ;;  %v1197_v46 = vpop.xlane.xlu0 %1196 }
 0x36e   :  { %v1730_v38 = vmul.f32 1.442695, %v1711_v12  ;;  %v1249_v63 = vmul.f32 1.442695, %v1229_v58  ;;  %v1233_v58 = vsub.f32 %v3336_v29, %v1203_v22 }
 0x371   :  { %662 = vadd.xlane.f32.xlu0 %v661_v6  ;;  %v635_v6 = vmul.f32 1.442695, %v613_v25 }
 0x373   :  { %2705 = vpow2.f32 %v635_v6 }
 0x374   :  { %2707 = vpow2.f32 %v1491_v28  ;;  %v1677_v28 = vpop.xlane.xlu2 %1676  ;;  %v1683_v12 = vpop.xlane.xlu0 %1682 }
 0x375   :  { %2709 = vpow2.f32 %v1730_v38  ;;  %v1713_v55 = vsub.f32 %v3307_v62, %v1677_v28 }
 0x376   :  { %2711 = vpow2.f32 %v1732_v48  ;;  %v3867_v48 = vpop.xlane.xlu1 %1447 }
 0x377   :  { %2713 = vpow2.f32 %v1249_v63  ;;  %v1734_v6 = vmul.f32 1.442695, %v1713_v55  ;;  %v1257_v63 = vmul.f32 1.442695, %v1233_v58  ;;  %v611_v58 = vsub.f32 %v3314_v4, %v3661_v10 }
 0x379   :  { %v3845_v49 = vpop.eup %2705  ;;  %2715 = vpow2.f32 %v1734_v6 }
 0x37a   :  { %v3847_v15 = vpop.eup %2707  ;;  %v673_v25 = vsel %vm558_vm3, %v3845_v49, 0.0  ;;  %2717 = vpow2.f32 %v1257_v63  ;;  %v631_v63 = vmul.f32 1.442695, %v611_v58  ;;  %v1231_v58 = vsub.f32 %v3317_v5, %v1197_v46 }
 0x37b   :  { %5246 = vst [vmem:[#allocation46_spill] sm:$0xff] %v3847_v15  ;;  %v3851_v26 = vpop.eup %2709 }
 0x37c   :  { %v3858_v38 = vpop.eup %2711  ;;  %v1445_v28 = vpop.xlane.xlu0 %1444 }
 0x37d   :  { %5247 = vst [vmem:[#allocation47_spill] sm:$0xff] %v3858_v38  ;;  %v3860_v9 = vpop.eup %2713  ;;  %v1475_v55 = vsub.f32 %v3336_v29, %v1445_v28 }
 0x37e   :  { %5248 = vst [vmem:[#allocation48_spill] sm:$0xff] %v3860_v9 }
 0x384   :  { %1295 = vrot.lane.b32.xlu2 %v3831_v50, %s2926_s15 }
 0x385   :  { %1537 = vrot.lane.b32.xlu0 %v3833_v27, %s2927_s16  ;;  %v1499_v27 = vmul.f32 1.442695, %v1475_v55  ;;  %v612_v55 = vsub.f32 %v3307_v62, %v576_v0  ;;  %v1253_v62 = vmul.f32 1.442695, %v1231_v58 }
 0x387   :  { %2719 = vpow2.f32 %v1499_v27 }
 0x38c   :  { %1539 = vrot.lane.b32.xlu2 %v3847_v15, %s2927_s16  ;;  %674 = vadd.xlane.f32.xlu1 %v673_v25  ;;  %v3869_v25 = vpop.eup %2715 }
 0x38d   :  { %1778 = vrot.lane.b32.xlu0 %v3851_v26, %s2928_s17  ;;  %5249 = vst [vmem:[#allocation49_spill] sm:$0xff] %v3869_v25  ;;  %v3874_v50 = vpop.eup %2717 }
 0x38e   :  { %5250 = vst [vmem:[#allocation50_spill] sm:$0xff] %v3874_v50 }
 0x394   :  { %1780 = vrot.lane.b32.xlu2 %v3858_v38, %s2928_s17  ;;  %v1689_v38 = vpop.xlane.xlu1 %1688 }
 0x395   :  { %1297 = vrot.lane.b32.xlu0 %v3860_v9, %s2926_s15  ;;  %v1717_v22 = vsub.f32 %v3325_v19, %v1689_v38  ;;  %v3881_v9 = vpop.eup %2719  ;;  %v633_v38 = vmul.f32 1.442695, %v612_v55  ;;  %v1473_v55 = vsub.f32 %v3317_v5, %v3792_v56  ;;  %v1715_v56 = vsub.f32 %v3322_v18, %v1683_v12 }
 0x396   :  { %5251 = vst [vmem:[#allocation51_spill] sm:$0xff] %v3881_v9 }
 0x397   :  { %v1742_v6 = vmul.f32 1.442695, %v1717_v22  ;;  %v1200_v22 = vpop.xlane.xlu2 %1199 }
 0x398   :  { %v1232_v46 = vsub.f32 %v3322_v18, %v1200_v22 }
 0x399   :  { %2721 = vpow2.f32 %v1742_v6 }
 0x39a   :  { %2723 = vpow2.f32 %v631_v63  ;;  %v588_v63 = vpop.xlane.xlu0 %587  ;;  %v1255_v58 = vmul.f32 1.442695, %v1232_v46  ;;  %v614_v46 = vsub.f32 %v3322_v18, %v3837_v43 }
 0x39b   :  { %2725 = vpow2.f32 %v633_v38 }
 0x39c   :  { %2727 = vpow2.f32 %v1253_v62 }
 0x39d   :  { %1782 = vrot.lane.b32.xlu0 %v3869_v25, %s2928_s17  ;;  %v1495_v25 = vmul.f32 1.442695, %v1473_v55 }
 0x39f   :  { %v3885_v28 = vpop.eup %2721  ;;  %v1442_v6 = vpop.xlane.xlu2 %1441  ;;  %2729 = vpow2.f32 %v1495_v25 }
 0x3a0   :  { %5252 = vst [vmem:[#allocation52_spill] sm:$0xff] %v3885_v28  ;;  %v3890_v27 = vpop.eup %2723  ;;  %v1474_v38 = vsub.f32 %v3322_v18, %v1442_v6  ;;  %v1738_v6 = vmul.f32 1.442695, %v1715_v56  ;;  %v1086_v56 = vmul.f32 %v3460_v8, %v3546_v11 }
 0x3a1   :  { %v667_v4 = vsel %vm558_vm3, %v3890_v27, 0.0  ;;  %v3894_v10 = vpop.eup %2725 }
 0x3a2   :  { %v670_v0 = vsel %vm558_vm3, %v3894_v10, 0.0  ;;  %v1497_v13 = vmul.f32 1.442695, %v1474_v38  ;;  %v3903_v14 = vpop.eup %2727  ;;  %v1082_v38 = vmul.f32 %v3434_v36, %v3546_v11  ;;  %v1089_v36 = vmul.f32 %v3482_v52, %v3546_v11 }
 0x3a3   :  { %5253 = vst [vmem:[#allocation53_spill] sm:$0xff] %v3903_v14 }
 0x3a5   :  { %1305 = vrot.lane.b32.xlu1 %v3874_v50, %s2926_s15  ;;  %v3909_v62 = vpop.eup %2729 }
 0x3a6   :  { %5254 = vst [vmem:[#allocation54_spill] sm:$0xff] %v3909_v62 }
 0x3ad   :  { %1547 = vrot.lane.b32.xlu1 %v3881_v9, %s2927_s16  ;;  %v616_v9 = vsub.f32 %v3325_v19, %v588_v63 }
 0x3af   :  { %v641_v23 = vmul.f32 1.442695, %v616_v9 }
 0x3b1   :  { %2731 = vpow2.f32 %v641_v23 }
 0x3b2   :  { %2733 = vpow2.f32 %v1497_v13 }
 0x3b3   :  { %2735 = vpow2.f32 %v1255_v58  ;;  %v637_v58 = vmul.f32 1.442695, %v614_v46  ;;  %v1092_v46 = vmul.f32 %v3496_v30, %v3546_v11 }
 0x3b4   :  { %2737 = vpow2.f32 %v1738_v6  ;;  %v1206_v6 = vpop.xlane.xlu0 %1205 }
 0x3b5   :  { %1790 = vrot.lane.b32.xlu1 %v3885_v28, %s2928_s17  ;;  %v1234_v30 = vsub.f32 %v3325_v19, %v1206_v6 }
 0x3b7   :  { %v3911_v63 = vpop.eup %2731 }
 0x3b8   :  { %v3915_v9 = vpop.eup %2733  ;;  %v682_v13 = vsel %vm558_vm3, %v3911_v63, 0.0 }
 0x3b9   :  { %5255 = vst [vmem:[#allocation55_spill] sm:$0xff] %v3915_v9  ;;  %v3922_v25 = vpop.eup %2735 }
 0x3ba   :  { %5256 = vst [vmem:[#allocation56_spill] sm:$0xff] %v3922_v25  ;;  %v3926_v22 = vpop.eup %2737 }
 0x3bb   :  { %5257 = vst [vmem:[#allocation57_spill] sm:$0xff] %v3926_v22 }
 0x3bc   :  { %v1692_v8 = vpop.xlane.xlu0 %1691 }
 0x3bd   :  { %668 = vadd.xlane.f32.xlu2 %v667_v4  ;;  %v585_v4 = vpop.xlane.xlu2 %584 }
 0x3c7   :  { %671 = vadd.xlane.f32.xlu0 %v670_v0  ;;  %v1686_v0 = vpop.xlane.xlu2 %1685 }
 0x3c8   :  { %v1716_v23 = vsub.f32 %v3336_v29, %v1686_v0  ;;  %v3941_v0 = vpop.xlane.xlu1 %590 }
 0x3ca   :  { %v1740_v12 = vmul.f32 1.442695, %v1716_v23  ;;  %v615_v23 = vsub.f32 %v3336_v29, %v585_v4  ;;  %v1259_v29 = vmul.f32 1.442695, %v1234_v30 }
 0x3cc   :  { %2739 = vpow2.f32 %v1740_v12 }
 0x3cd   :  { %2741 = vpow2.f32 %v637_v58 }
 0x3d0   :  { %v1212_v43 = vpop.xlane.xlu1 %1211 }
 0x3d1   :  { %v1236_v52 = vsub.f32 %v3342_v34, %v1212_v43  ;;  %v1476_v43 = vsub.f32 %v3325_v19, %v3867_v48 }
 0x3d2   :  { %v3930_v55 = vpop.eup %2739 }
 0x3d3   :  { %5258 = vst [vmem:[#allocation58_spill] sm:$0xff] %v3930_v55  ;;  %v3948_v12 = vpop.eup %2741 }
 0x3d5   :  { %1301 = vrot.lane.b32.xlu2 %v3903_v14, %s2926_s15 }
 0x3d8   :  { %v3958_v58 = vpop.xlane.xlu1 %1456 }
 0x3db   :  { %1543 = vrot.lane.b32.xlu0 %v3909_v62, %s2927_s16 }
 0x3dd   :  { %1545 = vrot.lane.b32.xlu2 %v3915_v9, %s2927_s16 }
 0x3df   :  { %683 = vadd.xlane.f32.xlu1 %v682_v13  ;;  %v639_v13 = vmul.f32 1.442695, %v615_v23 }
 0x3e1   :  { %2743 = vpow2.f32 %v639_v13  ;;  %v1454_v13 = vpop.xlane.xlu0 %1453 }
 0x3e3   :  { %1303 = vrot.lane.b32.xlu0 %v3922_v25, %s2926_s15 }
 0x3e5   :  { %1786 = vrot.lane.b32.xlu2 %v3926_v22, %s2928_s17 }
 0x3e7   :  { %v3955_v4 = vpop.eup %2743 }
 0x3e8   :  { %v679_v23 = vsel %vm558_vm3, %v3955_v4, 0.0 }
 0x3eb   :  { %1788 = vrot.lane.b32.xlu0 %v3930_v55, %s2928_s17  ;;  %v1501_v55 = vmul.f32 1.442695, %v1476_v43  ;;  %v597_v43 = vpop.xlane.xlu0 %596 }
 0x3f8   :  { %1116 = vrot.lane.b32.xlu1 %v1082_v38, %s2929_s0  ;;  %v676_v38 = vsel %vm558_vm3, %v3948_v12, 0.0 }
 0x400   :  { %1124 = vrot.lane.b32.xlu1 %v1086_v56, %s2929_s0  ;;  %v1209_v56 = vpop.xlane.xlu2 %1208 }
 0x401   :  { %v1235_v6 = vsub.f32 %v3339_v33, %v1209_v56 }
 0x408   :  { %1130 = vrot.lane.b32.xlu1 %v1089_v36, %s2929_s0  ;;  %v1263_v36 = vmul.f32 1.442695, %v1236_v52  ;;  %v1451_v5 = vpop.xlane.xlu2 %1450  ;;  %v1698_v52 = vpop.xlane.xlu1 %1697 }
 0x40a   :  { %2745 = vpow2.f32 %v1263_v36 }
 0x40b   :  { %2747 = vpow2.f32 %v1259_v29 }
 0x40e   :  { %677 = vadd.xlane.f32.xlu2 %v676_v38  ;;  %v1095_v38 = vmul.f32 %v3515_v37, %v3546_v11  ;;  %v1477_v37 = vsub.f32 %v3339_v33, %v1451_v5  ;;  %v1720_v11 = vsub.f32 %v3358_v59, %v1698_v52  ;;  %v1718_v5 = vsub.f32 %v3339_v33, %v1692_v8 }
 0x410   :  { %1136 = vrot.lane.b32.xlu1 %v1092_v46, %s2929_s0  ;;  %v1478_v46 = vsub.f32 %v3342_v34, %v1454_v13  ;;  %v1503_v48 = vmul.f32 1.442695, %v1477_v37  ;;  %v1748_v13 = vmul.f32 1.442695, %v1720_v11  ;;  %v594_v52 = vpop.xlane.xlu2 %593  ;;  %v619_v37 = vsub.f32 %v3358_v59, %v597_v43  ;;  %v4010_v11 = vpop.xlane.xlu0 %1214 }
 0x412   :  { %v1505_v18 = vmul.f32 1.442695, %v1478_v46 }
 0x414   :  { %2749 = vpow2.f32 %v1505_v18  ;;  %v1744_v18 = vmul.f32 1.442695, %v1718_v5 }
 0x415   :  { %680 = vadd.xlane.f32.xlu0 %v679_v23  ;;  %v3969_v23 = vpop.eup %2745  ;;  %2751 = vpow2.f32 %v1501_v55 }
 0x416   :  { %5259 = vst [vmem:[#allocation59_spill] sm:$0xff] %v3969_v23  ;;  %v3976_v36 = vpop.eup %2747  ;;  %2753 = vpow2.f32 %v1503_v48  ;;  %v617_v48 = vsub.f32 %v3339_v33, %v3941_v0 }
 0x417   :  { %5260 = vst [vmem:[#allocation60_spill] sm:$0xff] %v3976_v36  ;;  %2755 = vpow2.f32 %v1748_v13 }
 0x418   :  { %1142 = vrot.lane.b32.xlu1 %v1095_v38, %s2929_s0  ;;  %v1261_v38 = vmul.f32 1.442695, %v1235_v6  ;;  %v647_v6 = vmul.f32 1.442695, %v619_v37  ;;  %v1695_v13 = vpop.xlane.xlu2 %1694  ;;  %v4021_v5 = vpop.xlane.xlu0 %1700 }
 0x41a   :  { %v3980_v29 = vpop.eup %2749  ;;  %2757 = vpow2.f32 %v1261_v38  ;;  %v643_v38 = vmul.f32 1.442695, %v617_v48 }
 0x41b   :  { %5261 = vst [vmem:[#allocation61_spill] sm:$0xff] %v3980_v29  ;;  %v3983_v30 = vpop.eup %2751  ;;  %2759 = vpow2.f32 %v1744_v18 }
 0x41c   :  { %5262 = vst [vmem:[#allocation62_spill] sm:$0xff] %v3983_v30  ;;  %v3989_v55 = vpop.eup %2753  ;;  %2761 = vpow2.f32 %v647_v6 }
 0x41d   :  { %5263 = vst [vmem:[#allocation63_spill] sm:$0xff] %v3989_v55  ;;  %v3993_v56 = vpop.eup %2755  ;;  %2763 = vpow2.f32 %v643_v38 }
 0x41e   :  { %5264 = vst [vmem:[#allocation64_spill] sm:$0xff] %v3993_v56 }
 0x420   :  { %1311 = vrot.lane.b32.xlu1 %v3969_v23, %s2926_s15  ;;  %v3995_v8 = vpop.eup %2757  ;;  %v1218_v37 = vpop.xlane.xlu2 %1217 }
 0x421   :  { %5265 = vst [vmem:[#allocation65_spill] sm:$0xff] %v3995_v8  ;;  %v4001_v46 = vpop.eup %2759  ;;  %v1463_v6 = vpop.xlane.xlu0 %1462 }
 0x422   :  { %5266 = vst [vmem:[#allocation66_spill] sm:$0xff] %v4001_v46  ;;  %v4023_v18 = vpop.eup %2761  ;;  %v1481_v19 = vsub.f32 %v3361_v61, %v1463_v6  ;;  %v618_v6 = vsub.f32 %v3342_v34, %v594_v52 }
 0x423   :  { %v691_v0 = vsel %vm558_vm3, %v4023_v18, 0.0  ;;  %v4029_v43 = vpop.eup %2763 }
 0x424   :  { %v685_v48 = vsel %vm558_vm3, %v4029_v43, 0.0 }
 0x426   :  { %1307 = vrot.lane.b32.xlu2 %v3976_v36, %s2926_s15 }
 0x428   :  { %1553 = vrot.lane.b32.xlu1 %v3980_v29, %s2927_s16 }
 0x429   :  { %1549 = vrot.lane.b32.xlu0 %v3983_v30, %s2927_s16 }
 0x42e   :  { %1551 = vrot.lane.b32.xlu2 %v3989_v55, %s2927_s16 }
 0x430   :  { %1796 = vrot.lane.b32.xlu1 %v3993_v56, %s2928_s17 }
 0x431   :  { %1309 = vrot.lane.b32.xlu0 %v3995_v8, %s2926_s15  ;;  %v1511_v8 = vmul.f32 1.442695, %v1481_v19 }
 0x436   :  { %1792 = vrot.lane.b32.xlu2 %v4001_v46, %s2928_s17  ;;  %v645_v46 = vmul.f32 1.442695, %v618_v6 }
 0x439   :  { %1114 = vrot.lane.b32.xlu0 %v3550_v53, %s2929_s0  ;;  %v4018_v53 = vpop.xlane.xlu1 %599 }
 0x441   :  { %1120 = vrot.lane.b32.xlu0 %v3554_v51, %s2929_s0  ;;  %v1719_v51 = vsub.f32 %v3342_v34, %v1695_v13 }
 0x449   :  { %1126 = vrot.lane.b32.xlu0 %v3558_v24, %s2929_s0  ;;  %v1746_v24 = vmul.f32 1.442695, %v1719_v51  ;;  %v1460_v51 = vpop.xlane.xlu2 %1459 }
 0x44b   :  { %2765 = vpow2.f32 %v1746_v24  ;;  %v606_v24 = vpop.xlane.xlu0 %605 }
 0x451   :  { %1132 = vrot.lane.b32.xlu0 %v3562_v20, %s2929_s0  ;;  %v1221_v20 = vpop.xlane.xlu1 %1220  ;;  %v4033_v13 = vpop.eup %2765 }
 0x452   :  { %5267 = vst [vmem:[#allocation67_spill] sm:$0xff] %v4033_v13  ;;  %v4041_v30 = vpop.xlane.xlu2 %602 }
 0x459   :  { %1138 = vrot.lane.b32.xlu0 %v3565_v7, %s2929_s0  ;;  %v1239_v7 = vsub.f32 %v3361_v61, %v1221_v20  ;;  %v4038_v38 = vpop.xlane.xlu1 %1465 }
 0x45a   :  { %692 = vadd.xlane.f32.xlu1 %v691_v0 }
 0x45b   :  { %v1269_v0 = vmul.f32 1.442695, %v1239_v7 }
 0x45d   :  { %2767 = vpow2.f32 %v1269_v0 }
 0x45e   :  { %2769 = vpow2.f32 %v1511_v8 }
 0x45f   :  { %686 = vadd.xlane.f32.xlu2 %v685_v48  ;;  %v4043_v48 = vpop.xlane.xlu0 %1223 }
 0x461   :  { %1794 = vrot.lane.b32.xlu0 %v4033_v13, %s2928_s17  ;;  %v1707_v33 = vpop.xlane.xlu1 %1706  ;;  %v1704_v13 = vpop.xlane.xlu2 %1703 }
 0x462   :  { %v1723_v20 = vsub.f32 %v3386_v17, %v1707_v33 }
 0x463   :  { %v4045_v29 = vpop.eup %2767 }
 0x464   :  { %5268 = vst [vmem:[#allocation68_spill] sm:$0xff] %v4045_v29  ;;  %v1754_v7 = vmul.f32 1.442695, %v1723_v20  ;;  %v4055_v19 = vpop.eup %2769 }
 0x465   :  { %5269 = vst [vmem:[#allocation69_spill] sm:$0xff] %v4055_v19 }
 0x466   :  { %2771 = vpow2.f32 %v1754_v7  ;;  %v1479_v7 = vsub.f32 %v3358_v59, %v3958_v58 }
 0x467   :  { %v4053_v0 = vpop.permute.xlu0 %1772  ;;  %2773 = vpow2.f32 %v645_v46 }
 0x468   :  { %v1507_v6 = vmul.f32 1.442695, %v1479_v7 }
 0x469   :  { %v4067_v8 = vpop.permute.xlu2 %1289  ;;  %v4083_v34 = vpop.xlane.xlu1 %656 }
 0x46a   :  { %2775 = vpow2.f32 %v1507_v6 }
 0x46c   :  { %v4061_v33 = vpop.eup %2771 }
 0x46d   :  { %5270 = vst [vmem:[#allocation70_spill] sm:$0xff] %v4061_v33  ;;  %v4069_v52 = vpop.eup %2773 }
 0x46e   :  { %v688_v20 = vsel %vm558_vm3, %v4069_v52, 0.0 }
 0x470   :  { %v4097_v36 = vpop.eup %2775 }
 0x471   :  { %v4077_v46 = vpop.permute.xlu2 %1531  ;;  %v1292_v58 = vpop.permute.xlu1 %1291  ;;  %5271 = vst [vmem:[#allocation71_spill] sm:$0xff] %v4097_v36 }
 0x473   :  { %1317 = vrot.lane.b32.xlu1 %v4045_v29, %s2926_s15  ;;  %v622_v29 = vsub.f32 %v3386_v17, %v606_v24 }
 0x475   :  { %v653_v62 = vmul.f32 1.442695, %v622_v29 }
 0x477   :  { %1112 = vrot.lane.b32.xlu2 %v3569_v32, %s2929_s0  ;;  %v4063_v32 = vpop.permute.xlu0 %1533 }
 0x47b   :  { %1559 = vrot.lane.b32.xlu1 %v4055_v19, %s2927_s16  ;;  %v4092_v19 = vpop.permute.xlu2 %1774 }
 0x47f   :  { %1118 = vrot.lane.b32.xlu2 %v3573_v41, %s2929_s0  ;;  %v4075_v41 = vpop.permute.xlu0 %1293 }
 0x483   :  { %1802 = vrot.lane.b32.xlu1 %v4061_v33, %s2928_s17 }
 0x487   :  { %1122 = vrot.lane.b32.xlu2 %v3577_v39, %s2929_s0  ;;  %v4085_v33 = vpop.xlane.xlu0 %662  ;;  %v1238_v39 = vsub.f32 %v3345_v40, %v1218_v37  ;;  %v1480_v37 = vsub.f32 %v3345_v40, %v1460_v51  ;;  %v4111_v51 = vpop.permute.xlu1 %1535 }
 0x489   :  { %v1509_v24 = vmul.f32 1.442695, %v1480_v37 }
 0x48b   :  { %689 = vadd.xlane.f32.xlu0 %v688_v20  ;;  %v1237_v20 = vsub.f32 %v3358_v59, %v4010_v11  ;;  %v4105_v11 = vpop.xlane.xlu2 %659 }
 0x48c   :  { %v729_v28 = vand.u32 2147483648, %v4105_v11  ;;  %vm723_vm14 = vweird.f32 %v4105_v11 }
 0x48d   :  { %v1265_v7 = vmul.f32 1.442695, %v1237_v20 }
 0x48e   :  { %v730_v9 = vor.u32 1.1754944e-38, %v729_v28  ;;  %v1823_v28 = vsel %vm1337_vm12, %v4092_v19, 0.0 }
 0x48f   :  { %1128 = vrot.lane.b32.xlu2 %v3581_v42, %s2929_s0  ;;  %v1267_v42 = vmul.f32 1.442695, %v1238_v39  ;;  %v4095_v25 = vpop.permute.xlu0 %1537 }
 0x491   :  { %2777 = vpow2.f32 %v1267_v42 }
 0x492   :  { %2779 = vpow2.f32 %v1265_v7 }
 0x493   :  { %2781 = vpow2.f32 %v653_v62 }
 0x494   :  { %2783 = vpow2.f32 %v1509_v24 }
 0x497   :  { %1134 = vrot.lane.b32.xlu2 %v3585_v45, %s2929_s0  ;;  %v1722_v45 = vsub.f32 %v3361_v61, %v1704_v13  ;;  %v4107_v39 = vpop.eup %2777  ;;  %v4113_v29 = vpop.permute.xlu0 %1778 }
 0x498   :  { %5272 = vst [vmem:[#allocation72_spill] sm:$0xff] %v4107_v39  ;;  %v4109_v20 = vpop.eup %2779  ;;  %v4123_v13 = vpop.permute.xlu2 %1295 }
 0x499   :  { %v1752_v6 = vmul.f32 1.442695, %v1722_v45  ;;  %5273 = vst [vmem:[#allocation73_spill] sm:$0xff] %v4109_v20  ;;  %v4121_v62 = vpop.eup %2781 }
 0x49a   :  { %v700_v7 = vsel %vm558_vm3, %v4121_v62, 0.0  ;;  %v4127_v37 = vpop.eup %2783 }
 0x49b   :  { %2785 = vpow2.f32 %v1752_v6  ;;  %5274 = vst [vmem:[#allocation74_spill] sm:$0xff] %v4127_v37  ;;  %v1341_v6 = vsel %vm1337_vm12, %v1292_v58, 0.0 }
 0x49f   :  { %1555 = vrot.lane.b32.xlu0 %v4097_v36, %s2927_s16  ;;  %1140 = vrot.lane.b32.xlu2 %v3589_v44, %s2929_s0  ;;  %v1721_v44 = vsub.f32 %v3345_v40, %v4021_v5  ;;  %v1777_v5 = vpop.permute.xlu1 %1776  ;;  %v1298_v24 = vpop.permute.xlu0 %1297 }
 0x4a0   :  { %v1826_v58 = vsel %vm1337_vm12, %v1777_v5, 0.0 }
 0x4a1   :  { %v1750_v42 = vmul.f32 1.442695, %v1721_v44  ;;  %v4129_v45 = vpop.eup %2785  ;;  %v1540_v44 = vpop.permute.xlu2 %1539 }
 0x4a2   :  { %5275 = vst [vmem:[#allocation75_spill] sm:$0xff] %v4129_v45 }
 0x4a3   :  { %2787 = vpow2.f32 %v1750_v42 }
 0x4a7   :  { %1315 = vrot.lane.b32.xlu0 %v4107_v39, %s2926_s15  ;;  %1313 = vrot.lane.b32.xlu2 %v4109_v20, %s2926_s15  ;;  %v1783_v39 = vpop.permute.xlu0 %1782 }
 0x4a9   :  { %v4136_v59 = vpop.eup %2787  ;;  %v4144_v42 = vpop.permute.xlu2 %1780 }
 0x4aa   :  { %5276 = vst [vmem:[#allocation76_spill] sm:$0xff] %v4136_v59 }
 0x4ad   :  { %701 = vadd.xlane.f32.xlu1 %v700_v7  ;;  %v4140_v7 = vpop.xlane.xlu1 %665 }
 0x4af   :  { %1800 = vrot.lane.b32.xlu0 %v4129_v45, %s2928_s17  ;;  %1557 = vrot.lane.b32.xlu2 %v4127_v37, %s2927_s16  ;;  %v1582_v45 = vsel %vm1337_vm12, %v4063_v32, 0.0  ;;  %v4148_v20 = vpop.xlane.xlu0 %671  ;;  %v1350_v32 = vsel %vm1337_vm12, %v1298_v24, 0.0 }
 0x4b5   :  { %1342 = vadd.xlane.f32.xlu1 %v1341_v6  ;;  %v4146_v36 = vpop.permute.xlu1 %1299  ;;  %v621_v6 = vsub.f32 %v3361_v61, %v4041_v30  ;;  %v1591_v30 = vsel %vm1337_vm12, %v1540_v44, 0.0 }
 0x4b7   :  { %1798 = vrot.lane.b32.xlu2 %v4136_v59, %s2928_s17  ;;  %v4153_v59 = vpop.xlane.xlu2 %668  ;;  %v651_v14 = vmul.f32 1.442695, %v621_v6  ;;  %v4157_v37 = vpop.permute.xlu0 %1543 }
 0x4b9   :  { %2789 = vpow2.f32 %v651_v14 }
 0x4bd   :  { %1583 = vadd.xlane.f32.xlu1 %v1582_v45  ;;  %v4155_v22 = vpop.permute.xlu1 %1541  ;;  %v620_v45 = vsub.f32 %v3345_v40, %v4018_v53  ;;  %v1835_v53 = vsel %vm1337_vm12, %v1783_v39, 0.0  ;;  %v1482_v39 = vsub.f32 %v3386_v17, %v4038_v38  ;;  %v1820_v38 = vsel %vm1337_vm12, %v4053_v0, 0.0 }
 0x4bf   :  { %v4162_v56 = vpop.permute.xlu2 %1301  ;;  %v649_v5 = vmul.f32 1.442695, %v620_v45  ;;  %v4167_v61 = vpop.eup %2789 }
 0x4c0   :  { %5277 = vst [vmem:[#allocation77_spill] sm:$0xff] %v4167_v61  ;;  %v1304_v23 = vpop.permute.xlu0 %1303  ;;  %v697_v24 = vsel %vm558_vm3, %v4167_v61, 0.0  ;;  %v1579_v61 = vsel %vm1337_vm12, %v4077_v46, 0.0 }
 0x4c1   :  { %2791 = vpow2.f32 %v649_v5  ;;  %v1338_v5 = vsel %vm1337_vm12, %v4067_v8, 0.0 }
 0x4c5   :  { %1827 = vadd.xlane.f32.xlu1 %v1826_v58  ;;  %v4164_v58 = vpop.permute.xlu1 %1784 }
 0x4c7   :  { %v1546_v6 = vpop.permute.xlu2 %1545 }
 0x4c8   :  { %v1789_v45 = vpop.permute.xlu0 %1788  ;;  %v1600_v8 = vsel %vm1337_vm12, %v1546_v6, 0.0 }
 0x4c9   :  { %v1844_v46 = vsel %vm1337_vm12, %v1789_v45, 0.0 }
 0x4cd   :  { %1351 = vadd.xlane.f32.xlu1 %v1350_v32  ;;  %v4171_v32 = vpop.eup %2791  ;;  %v4173_v14 = vpop.xlane.xlu1 %674 }
 0x4ce   :  { %5278 = vst [vmem:[#allocation78_spill] sm:$0xff] %v4171_v32  ;;  %v694_v44 = vsel %vm558_vm3, %v4171_v32, 0.0  ;;  %vm798_vm2 = vweird.f32 %v4173_v14 }
 0x4cf   :  { %v4183_v40 = vpop.permute.xlu2 %1786 }
 0x4d5   :  { %1592 = vadd.xlane.f32.xlu1 %v1591_v30  ;;  %v4180_v30 = vpop.permute.xlu1 %1305 }
 0x4d9   :  { %698 = vadd.xlane.f32.xlu0 %v697_v24  ;;  %v1359_v24 = vsel %vm1337_vm12, %v1304_v23, 0.0 }
 0x4dd   :  { %1836 = vadd.xlane.f32.xlu1 %v1835_v53  ;;  %v4187_v53 = vpop.xlane.xlu0 %680  ;;  %v4194_v23 = vpop.permute.xlu1 %1547 }
 0x4e0   :  { %695 = vadd.xlane.f32.xlu2 %v694_v44  ;;  %v1513_v44 = vmul.f32 1.442695, %v1482_v39  ;;  %v1240_v39 = vsub.f32 %v3386_v17, %v4043_v48 }
 0x4e1   :  { %1339 = vadd.xlane.f32.xlu0 %v1338_v5  ;;  %v4192_v5 = vpop.xlane.xlu2 %677 }
 0x4e2   :  { %2793 = vpow2.f32 %v1513_v44 }
 0x4e3   :  { %2795 = vrcp.f32 %v4105_v11 }
 0x4e5   :  { %1360 = vadd.xlane.f32.xlu1 %v1359_v24  ;;  %v4196_v16 = vpop.permute.xlu0 %1549  ;;  %v4207_v6 = vpop.permute.xlu1 %1790 }
 0x4e8   :  { %1580 = vadd.xlane.f32.xlu2 %v1579_v61  ;;  %v4200_v24 = vpop.eup %2793 }
 0x4e9   :  { %5279 = vst [vmem:[#allocation79_spill] sm:$0xff] %v4200_v24  ;;  %v4205_v61 = vpop.permute.xlu2 %1307  ;;  %v2796_v45 = vpop.eup %2795 }
 0x4ea   :  { %vm724_vm13 = vweird.f32 %v2796_v45 }
 0x4eb   :  { %vm725_vm15 = vmor %vm723_vm14, %vm724_vm13  ;;  %vm708_vm13 = vweird.f32 %v4083_v34 }
 0x4ed   :  { %1601 = vadd.xlane.f32.xlu1 %v1600_v8  ;;  %v1310_v44 = vpop.permute.xlu0 %1309  ;;  %v1271_v8 = vmul.f32 1.442695, %v1240_v39 }
 0x4ee   :  { %v1368_v0 = vsel %vm1337_vm12, %v1310_v44, 0.0 }
 0x4ef   :  { %2797 = vpow2.f32 %v1271_v8 }
 0x4f0   :  { %1821 = vadd.xlane.f32.xlu2 %v1820_v38  ;;  %v4213_v38 = vpop.xlane.xlu1 %683  ;;  %2799 = vrcp.f32 %v4173_v14 }
 0x4f1   :  { %2801 = vrcp.f32 %v4213_v38  ;;  %vm843_vm8 = vweird.f32 %v4213_v38 }
 0x4f2   :  { %2803 = vrcp.f32 %v4083_v34 }
 0x4f3   :  { %2805 = vrcp.f32 %v4140_v7 }
 0x4f4   :  { %2807 = vrcp.f32 %v4085_v33 }
 0x4f5   :  { %1561 = vrot.lane.b32.xlu0 %v4200_v24, %s2927_s16  ;;  %1845 = vadd.xlane.f32.xlu1 %v1844_v46  ;;  %v1552_v24 = vpop.permute.xlu2 %1551  ;;  %v719_v46 = vmul.f32 %v2796_v45, %v4105_v11  ;;  %v4218_v48 = vpop.eup %2797  ;;  %2809 = vrcp.f32 %v4153_v59 }
 0x4f6   :  { %v1609_v32 = vsel %vm1337_vm12, %v1552_v24, 0.0  ;;  %5280 = vst [vmem:[#allocation80_spill] sm:$0xff] %v4218_v48  ;;  %v2800_v39 = vpop.eup %2799  ;;  %2811 = vrcp.f32 %v4148_v20 }
 0x4f7   :  { %v720_v17 = vsub.f32 1.0, %v719_v46  ;;  %v794_v44 = vmul.f32 %v2800_v39, %v4173_v14  ;;  %vm799_vm1 = vweird.f32 %v2800_v39  ;;  %2813 = vrcp.f32 %v4192_v5 }
 0x4f8   :  { %v4220_v35 = vpop.permute.xlu1 %1116  ;;  %vm800_vm3 = vmor %vm798_vm2, %vm799_vm1  ;;  %2815 = vrcp.f32 %v4187_v53  ;;  %vm753_vm1 = vweird.f32 %v4140_v7 }
 0x4f9   :  { %v795_v8 = vsub.f32 1.0, %v794_v44  ;;  %v1115_v44 = vpop.permute.xlu0 %1114 }
 0x4fb   :  { %v796_v24 = vmul.f32 %v2800_v39, %v795_v8 }
 0x4fd   :  { %1369 = vadd.xlane.f32.xlu1 %v1368_v0  ;;  %v721_v0 = vmul.f32 %v2796_v45, %v720_v17  ;;  %v797_v21 = vadd.f32 %v2800_v39, %v796_v24  ;;  %v804_v17 = vand.u32 2147483648, %v4173_v14 }
 0x4ff   :  { %v722_v55 = vadd.f32 %v2796_v45, %v721_v0  ;;  %v802_v0 = vand.u32 2147483647, %v4173_v14  ;;  %v801_v15 = vsel %vm800_vm3, %v2800_v39, %v797_v21  ;;  %v4242_v21 = vpop.permute.xlu2 %1792  ;;  %v1832_v39 = vsel %vm1337_vm12, %v4144_v42, 0.0 }
 0x500   :  { %v1125_v50 = vpop.permute.xlu1 %1124 }
 0x501   :  { %v726_v46 = vsel %vm725_vm15, %v2796_v45, %v722_v55  ;;  %v805_v55 = vor.u32 1.1754944e-38, %v804_v17  ;;  %vm803_vm4 = vcmp.eq.f32.partialorder %v802_v0, 8.507059e+37  ;;  %v1594_v17 = vsel %vm1337_vm12, %v4155_v22, 0.0 }
 0x502   :  { %v1353_v22 = vsel %vm1337_vm12, %v4146_v36, 0.0 }
 0x505   :  { %1610 = vadd.xlane.f32.xlu1 %v1609_v32  ;;  %v727_v32 = vand.u32 2147483647, %v4105_v11 }
 0x507   :  { %vm728_vm0 = vcmp.eq.f32.partialorder %v727_v32, 8.507059e+37  ;;  %v4238_v32 = vpop.permute.xlu0 %1120  ;;  %v4249_v19 = vpop.xlane.xlu2 %686 }
 0x508   :  { %1319 = vrot.lane.b32.xlu2 %v4218_v48, %s2926_s15  ;;  %v731_v48 = vsel %vm728_vm0, %v730_v9, %v726_v46  ;;  %v4232_v11 = vpop.permute.xlu1 %1130  ;;  %v806_v9 = vsel %vm803_vm4, %v805_v55, %v801_v15  ;;  %v1344_v15 = vsel %vm1337_vm12, %v4075_v41, 0.0  ;;  %v1588_v46 = vsel %vm1337_vm12, %v4095_v25, 0.0 }
 0x509   :  { %v732_v1 = vmul.f32 %v3814_v47, %v731_v48  ;;  %v807_v45 = vmul.f32 %v3845_v49, %v806_v9  ;;  %v1347_v49 = vsel %vm1337_vm12, %v4123_v13, 0.0  ;;  %v1829_v41 = vsel %vm1337_vm12, %v4113_v29, 0.0 }
 0x50a   :  { %v1356_v25 = vsel %vm1337_vm12, %v4162_v56, 0.0  ;;  %v1841_v9 = vsel %vm1337_vm12, %v4183_v40, 0.0  ;;  %v1597_v56 = vsel %vm1337_vm12, %v4157_v37, 0.0  ;;  %v1838_v40 = vsel %vm1337_vm12, %v4164_v58, 0.0 }
 0x50b   :  { %v1161_v8 = vmul.f32 %v1115_v44, %v732_v1  ;;  %v1166_v14 = vmul.f32 %v1125_v50, %v807_v45  ;;  %v1585_v1 = vsel %vm1337_vm12, %v4111_v51, 0.0  ;;  %v849_v37 = vand.u32 2147483648, %v4213_v38 }
 0x50d   :  { %v850_v58 = vor.u32 1.1754944e-38, %v849_v37 }
 0x50f   :  { %v4247_v48 = vpop.permute.xlu0 %1126  ;;  %v4261_v24 = vpop.permute.xlu2 %1112 }
 0x510   :  { %v4240_v47 = vpop.permute.xlu1 %1136 }
 0x517   :  { %v4259_v51 = vpop.permute.xlu0 %1132  ;;  %v4273_v44 = vpop.permute.xlu2 %1118 }
 0x518   :  { %v4253_v50 = vpop.permute.xlu1 %1142 }
 0x51e   :  { %1918 = vrot.lane.b32.xlu1 %v1161_v8, %s2930_s2  ;;  %v2802_v8 = vpop.eup %2801 }
 0x51f   :  { %1824 = vadd.xlane.f32.xlu0 %v1823_v28  ;;  %v4271_v42 = vpop.permute.xlu0 %1138  ;;  %v4282_v29 = vpop.permute.xlu2 %1122  ;;  %v839_v45 = vmul.f32 %v2802_v8, %v4213_v38  ;;  %vm844_vm5 = vweird.f32 %v2802_v8 }
 0x520   :  { %v4265_v13 = vpop.permute.xlu1 %1311  ;;  %vm845_vm9 = vmor %vm843_vm8, %vm844_vm5  ;;  %vm738_vm8 = vweird.f32 %v4085_v33 }
 0x521   :  { %v840_v36 = vsub.f32 1.0, %v839_v45 }
 0x526   :  { %1928 = vrot.lane.b32.xlu1 %v1166_v14, %s2930_s2 }
 0x527   :  { %1586 = vadd.xlane.f32.xlu0 %v1585_v1  ;;  %v1795_v55 = vpop.permute.xlu0 %1794 }
 0x528   :  { %v4275_v0 = vpop.permute.xlu1 %1553  ;;  %v1853_v14 = vsel %vm1337_vm12, %v1795_v55, 0.0 }
 0x52f   :  { %1348 = vadd.xlane.f32.xlu0 %v1347_v49  ;;  %v4294_v49 = vpop.permute.xlu2 %1128 }
 0x530   :  { %v4284_v28 = vpop.permute.xlu1 %1796 }
 0x531   :  { %1345 = vadd.xlane.f32.xlu2 %v1344_v15  ;;  %v1603_v15 = vsel %vm1337_vm12, %v4194_v23, 0.0  ;;  %v1365_v23 = vsel %vm1337_vm12, %v4205_v61, 0.0  ;;  %v1850_v61 = vsel %vm1337_vm12, %v4242_v21, 0.0 }
 0x537   :  { %1833 = vadd.xlane.f32.xlu0 %v1832_v39  ;;  %v841_v39 = vmul.f32 %v2802_v8, %v840_v36  ;;  %v4309_v55 = vpop.permute.xlu2 %1134 }
 0x538   :  { %v4292_v1 = vpop.xlane.xlu1 %692 }
 0x539   :  { %1589 = vadd.xlane.f32.xlu2 %v1588_v46  ;;  %v842_v46 = vadd.f32 %v2802_v8, %v841_v39  ;;  %2817 = vrcp.f32 %v4292_v1 }
 0x53a   :  { %2819 = vrcp.f32 %v4249_v19 }
 0x53f   :  { %1595 = vadd.xlane.f32.xlu0 %v1594_v17  ;;  %v847_v17 = vand.u32 2147483647, %v4213_v38 }
 0x541   :  { %1830 = vadd.xlane.f32.xlu2 %v1829_v41  ;;  %v2804_v41 = vpop.eup %2803  ;;  %vm848_vm10 = vcmp.eq.f32.partialorder %v847_v17, 8.507059e+37 }
 0x542   :  { %v704_v45 = vmul.f32 %v2804_v41, %v4083_v34  ;;  %v4315_v36 = vpop.eup %2805  ;;  %vm709_vm11 = vweird.f32 %v2804_v41 }
 0x543   :  { %v4331_v21 = vpop.eup %2807  ;;  %vm710_vm14 = vmor %vm708_vm13, %vm709_vm11  ;;  %vm754_vm0 = vweird.f32 %v4315_v36 }
 0x544   :  { %v734_v17 = vmul.f32 %v4331_v21, %v4085_v33  ;;  %vm4366_vm2 = vmor %vm753_vm1, %vm754_vm0  ;;  %vm739_vm3 = vweird.f32 %v4331_v21  ;;  %vm783_vm0 = vweird.f32 %v4148_v20 }
 0x547   :  { %1357 = vadd.xlane.f32.xlu0 %v1356_v25  ;;  %v4304_v25 = vpop.permute.xlu1 %1317 }
 0x549   :  { %1354 = vadd.xlane.f32.xlu2 %v1353_v22  ;;  %v846_v22 = vsel %vm845_vm9, %v2802_v8, %v842_v46  ;;  %v4333_v46 = vpop.eup %2809  ;;  %vm4391_vm9 = vmor %vm738_vm8, %vm739_vm3  ;;  %vm813_vm3 = vweird.f32 %v4192_v5 }
 0x54a   :  { %v851_v38 = vsel %vm848_vm10, %v850_v58, %v846_v22  ;;  %v764_v22 = vmul.f32 %v4333_v46, %v4153_v59  ;;  %v1847_v58 = vsel %vm1337_vm12, %v4207_v6, 0.0  ;;  %vm769_vm5 = vweird.f32 %v4333_v46 }
 0x54b   :  { %vm768_vm10 = vweird.f32 %v4153_v59 }
 0x54c   :  { %vm770_vm11 = vmor %vm768_vm10, %vm769_vm5  ;;  %vm828_vm10 = vweird.f32 %v4187_v53 }
 0x54f   :  { %1842 = vadd.xlane.f32.xlu0 %v1841_v9  ;;  %v1362_v9 = vsel %vm1337_vm12, %v4180_v30, 0.0  ;;  %v4322_v30 = vpop.permute.xlu1 %1559 }
 0x550   :  { %1854 = vadd.xlane.f32.xlu1 %v1853_v14  ;;  %v705_v14 = vsub.f32 1.0, %v704_v45 }
 0x551   :  { %1598 = vadd.xlane.f32.xlu2 %v1597_v56  ;;  %v852_v56 = vmul.f32 %v3911_v63, %v851_v38  ;;  %v749_v63 = vmul.f32 %v4315_v36, %v4140_v7 }
 0x552   :  { %v706_v39 = vmul.f32 %v2804_v41, %v705_v14 }
 0x553   :  { %v1169_v8 = vmul.f32 %v4232_v11, %v852_v56  ;;  %v750_v11 = vsub.f32 1.0, %v749_v63  ;;  %v4349_v56 = vpop.eup %2811 }
 0x554   :  { %v707_v37 = vadd.f32 %v2804_v41, %v706_v39  ;;  %v4355_v6 = vpop.eup %2813  ;;  %v759_v39 = vand.u32 2147483648, %v4140_v7 }
 0x555   :  { %v751_v45 = vmul.f32 %v4315_v36, %v750_v11  ;;  %vm814_vm1 = vweird.f32 %v4355_v6 }
 0x557   :  { %1604 = vadd.xlane.f32.xlu0 %v1603_v15  ;;  %v1606_v15 = vsel %vm1337_vm12, %v4196_v16, 0.0  ;;  %v714_v16 = vand.u32 2147483648, %v4083_v34  ;;  %v4347_v14 = vpop.permute.xlu1 %1802  ;;  %v752_v63 = vadd.f32 %v4315_v36, %v751_v45  ;;  %v760_v45 = vor.u32 1.1754944e-38, %v759_v39  ;;  %v4389_v39 = vpop.xlane.xlu0 %689 }
 0x559   :  { %1839 = vadd.xlane.f32.xlu2 %v1838_v40  ;;  %v4329_v40 = vpop.permute.xlu2 %1140  ;;  %v715_v38 = vor.u32 1.1754944e-38, %v714_v16  ;;  %v757_v16 = vand.u32 2147483647, %v4140_v7 }
 0x55a   :  { %5281 = vst [vmem:[#allocation81_spill] sm:$0xff] %v4329_v40 }
 0x55b   :  { %vm758_vm4 = vcmp.eq.f32.partialorder %v757_v16, 8.507059e+37 }
 0x55f   :  { %1366 = vadd.xlane.f32.xlu0 %v1365_v23  ;;  %v712_v23 = vand.u32 2147483647, %v4083_v34  ;;  %v765_v34 = vsub.f32 1.0, %v764_v22  ;;  %v809_v22 = vmul.f32 %v4355_v6, %v4192_v5 }
 0x561   :  { %1363 = vadd.xlane.f32.xlu2 %v1362_v9  ;;  %v711_v9 = vsel %vm710_vm14, %v2804_v41, %v707_v37  ;;  %vm713_vm15 = vcmp.eq.f32.partialorder %v712_v23, 8.507059e+37  ;;  %v779_v41 = vmul.f32 %v4349_v56, %v4148_v20 }
 0x567   :  { %1851 = vadd.xlane.f32.xlu0 %v1850_v61  ;;  %v735_v61 = vsub.f32 1.0, %v734_v17  ;;  %v766_v17 = vmul.f32 %v4333_v46, %v765_v34  ;;  %v744_v34 = vand.u32 2147483648, %v4085_v33 }
 0x569   :  { %1607 = vadd.xlane.f32.xlu2 %v1606_v15  ;;  %1934 = vrot.lane.b32.xlu1 %v1169_v8, %s2930_s2  ;;  %v716_v8 = vsel %vm713_vm15, %v715_v38, %v711_v9  ;;  %v4351_v15 = vpop.permute.xlu2 %1313  ;;  %v736_v11 = vmul.f32 %v4331_v21, %v735_v61  ;;  %v756_v9 = vsel %vm4366_vm2, %v4315_v36, %v752_v63  ;;  %v4376_v38 = vpop.xlane.xlu1 %701  ;;  %v810_v63 = vsub.f32 1.0, %v809_v22 }
 0x56a   :  { %v717_v37 = vmul.f32 %v3673_v54, %v716_v8  ;;  %v780_v54 = vsub.f32 1.0, %v779_v41  ;;  %v4381_v61 = vpop.eup %2815  ;;  %v761_v36 = vsel %vm758_vm4, %v760_v45, %v756_v9  ;;  %v742_v8 = vand.u32 2147483647, %v4085_v33  ;;  %vm815_vm4 = vmor %vm813_vm3, %vm814_vm1 }
 0x56b   :  { %v737_v7 = vadd.f32 %v4331_v21, %v736_v11  ;;  %v774_v41 = vand.u32 2147483648, %v4153_v59  ;;  %v824_v23 = vmul.f32 %v4381_v61, %v4187_v53  ;;  %v762_v22 = vmul.f32 %v3765_v57, %v761_v36 }
 0x56c   :  { %v781_v16 = vmul.f32 %v4349_v56, %v780_v54  ;;  %vm743_vm13 = vcmp.eq.f32.partialorder %v742_v8, 8.507059e+37  ;;  %vm784_vm15 = vweird.f32 %v4349_v56  ;;  %v789_v57 = vand.u32 2147483648, %v4148_v20  ;;  %v4424_v8 = vpop.permute.xlu0 %1555 }
 0x56d   :  { %v741_v33 = vsel %vm4391_vm9, %v4331_v21, %v737_v7  ;;  %v775_v45 = vor.u32 1.1754944e-38, %v774_v41  ;;  %v1163_v54 = vmul.f32 %v4273_v44, %v762_v22  ;;  %v825_v21 = vsub.f32 1.0, %v824_v23  ;;  %vm4419_vm2 = vmor %vm783_vm0, %vm784_vm15 }
 0x56e   :  { %v782_v11 = vadd.f32 %v4349_v56, %v781_v16  ;;  %v787_v36 = vand.u32 2147483647, %v4148_v20  ;;  %v819_v41 = vand.u32 2147483648, %v4192_v5  ;;  %v790_v20 = vor.u32 1.1754944e-38, %v789_v57 }
 0x56f   :  { %v826_v16 = vmul.f32 %v4381_v61, %v825_v21  ;;  %vm829_vm9 = vweird.f32 %v4381_v61  ;;  %vm888_vm15 = vweird.f32 %v4292_v1  ;;  %2821 = vrcp.f32 %v4376_v38 }
 0x570   :  { %vm788_vm5 = vcmp.eq.f32.partialorder %v787_v36, 8.507059e+37  ;;  %vm858_vm3 = vweird.f32 %v4249_v19 }
 0x571   :  { %1848 = vadd.xlane.f32.xlu2 %v1847_v58  ;;  %v1160_v58 = vmul.f32 %v4261_v24, %v717_v37  ;;  %v767_v24 = vadd.f32 %v4333_v46, %v766_v17  ;;  %v772_v37 = vand.u32 2147483647, %v4153_v59  ;;  %v4398_v17 = vpop.permute.xlu2 %1557  ;;  %v811_v59 = vmul.f32 %v4355_v6, %v810_v63 }
 0x573   :  { %v771_v9 = vsel %vm770_vm11, %v4333_v46, %v767_v24  ;;  %vm773_vm14 = vcmp.eq.f32.partialorder %v772_v37, 8.507059e+37  ;;  %v4414_v46 = vpop.xlane.xlu1 %1342  ;;  %v812_v44 = vadd.f32 %v4355_v6, %v811_v59  ;;  %v817_v37 = vand.u32 2147483647, %v4192_v5  ;;  %vm830_vm11 = vmor %vm828_vm10, %vm829_vm9 }
 0x574   :  { %v776_v7 = vsel %vm773_vm14, %v775_v45, %v771_v9 }
 0x575   :  { %v777_v63 = vmul.f32 %v3890_v27, %v776_v7  ;;  %v816_v23 = vsel %vm815_vm4, %v4355_v6, %v812_v44  ;;  %vm818_vm8 = vcmp.eq.f32.partialorder %v817_v37, 8.507059e+37  ;;  %v2818_v44 = vpop.eup %2817 }
 0x576   :  { %v884_v36 = vmul.f32 %v2818_v44, %v4292_v1  ;;  %vm889_vm14 = vweird.f32 %v2818_v44 }
 0x577   :  { %v1164_v27 = vmul.f32 %v4238_v32, %v777_v63  ;;  %v832_v32 = vand.u32 2147483647, %v4187_v53  ;;  %vm890_vm0 = vmor %vm888_vm15, %vm889_vm14  ;;  %vm873_vm14 = vweird.f32 %v4389_v39 }
 0x57b   :  { %1916 = vrot.lane.b32.xlu0 %v1160_v58, %s2930_s2  ;;  %v745_v58 = vor.u32 1.1754944e-38, %v744_v34  ;;  %v1584_v6 = vpop.xlane.xlu1 %1583 }
 0x57d   :  { %v746_v40 = vsel %vm743_vm13, %v745_v58, %v741_v33  ;;  %v4435_v33 = vpop.permute.xlu2 %1798  ;;  %v834_v58 = vand.u32 2147483648, %v4187_v53  ;;  %vm833_vm13 = vcmp.eq.f32.partialorder %v832_v32, 8.507059e+37 }
 0x57e   :  { %v747_v34 = vmul.f32 %v3818_v3, %v746_v40  ;;  %v786_v3 = vsel %vm4419_vm2, %v4349_v56, %v782_v11  ;;  %v820_v56 = vor.u32 1.1754944e-38, %v819_v41  ;;  %v1316_v11 = vpop.permute.xlu0 %1315 }
 0x57f   :  { %v791_v22 = vsel %vm788_vm5, %v790_v20, %v786_v3  ;;  %v835_v21 = vor.u32 1.1754944e-38, %v834_v58  ;;  %v1377_v53 = vsel %vm1337_vm12, %v1316_v11, 0.0  ;;  %v2820_v58 = vpop.eup %2819 }
 0x580   :  { %v1162_v40 = vmul.f32 %v4220_v35, %v747_v34  ;;  %v827_v35 = vadd.f32 %v4381_v61, %v826_v16  ;;  %v821_v5 = vsel %vm818_vm8, %v820_v56, %v816_v23  ;;  %v792_v9 = vmul.f32 %v3894_v10, %v791_v22  ;;  %v2822_v32 = vpop.eup %2821 }
 0x581   :  { %v822_v45 = vmul.f32 %v3948_v12, %v821_v5  ;;  %v892_v16 = vand.u32 2147483647, %v4292_v1  ;;  %vm859_vm2 = vweird.f32 %v2820_v58  ;;  %vm934_vm5 = vweird.f32 %v2822_v32 }
 0x582   :  { %v1165_v59 = vmul.f32 %v4282_v29, %v792_v9  ;;  %v1612_v9 = vsel %vm1337_vm12, %v4275_v0, 0.0  ;;  %vm860_vm4 = vmor %vm858_vm3, %vm859_vm2  ;;  %vm933_vm8 = vweird.f32 %v4376_v38 }
 0x583   :  { %1922 = vrot.lane.b32.xlu0 %v1163_v54, %s2930_s2  ;;  %v831_v54 = vsel %vm830_vm11, %v4381_v61, %v827_v35  ;;  %v1167_v57 = vmul.f32 %v4247_v48, %v822_v45  ;;  %v4459_v61 = vpop.xlane.xlu1 %1827  ;;  %v1618_v48 = vsel %vm1337_vm12, %v4398_v17, 0.0  ;;  %v894_v17 = vand.u32 2147483648, %v4292_v1  ;;  %vm935_vm10 = vmor %vm933_vm8, %vm934_vm5 }
 0x584   :  { %v836_v10 = vsel %vm833_vm13, %v835_v21, %v831_v54  ;;  %vm893_vm1 = vcmp.eq.f32.partialorder %v892_v16, 8.507059e+37  ;;  %v854_v45 = vmul.f32 %v2820_v58, %v4249_v19  ;;  %v929_v54 = vmul.f32 %v2822_v32, %v4376_v38 }
 0x585   :  { %v4450_v7 = vpop.xlane.xlu2 %695  ;;  %v837_v12 = vmul.f32 %v3955_v4, %v836_v10  ;;  %v895_v23 = vor.u32 1.1754944e-38, %v894_v17 }
 0x586   :  { %v1801_v24 = vpop.permute.xlu0 %1800  ;;  %v855_v21 = vsub.f32 1.0, %v854_v45  ;;  %v930_v10 = vsub.f32 1.0, %v929_v54  ;;  %vm903_vm2 = vweird.f32 %v4450_v7 }
 0x587   :  { %v1168_v29 = vmul.f32 %v4294_v49, %v837_v12  ;;  %v1862_v4 = vsel %vm1337_vm12, %v1801_v24, 0.0  ;;  %v885_v49 = vsub.f32 1.0, %v884_v36 }
 0x588   :  { %v856_v12 = vmul.f32 %v2820_v58, %v855_v21 }
 0x589   :  { %1920 = vrot.lane.b32.xlu2 %v1162_v40, %s2930_s2  ;;  %v886_v3 = vmul.f32 %v2818_v44, %v885_v49 }
 0x58b   :  { %1924 = vrot.lane.b32.xlu0 %v1164_v27, %s2930_s2  ;;  %v4468_v63 = vpop.xlane.xlu1 %1351  ;;  %v887_v40 = vadd.f32 %v2818_v44, %v886_v3 }
 0x58d   :  { %v4464_v34 = vpop.xlane.xlu2 %1580  ;;  %v891_v27 = vsel %vm890_vm0, %v2818_v44, %v887_v40 }
 0x58e   :  { %v896_v56 = vsel %vm893_vm1, %v895_v23, %v891_v27  ;;  %v1856_v23 = vsel %vm1337_vm12, %v4284_v28, 0.0 }
 0x58f   :  { %v897_v5 = vmul.f32 %v4023_v18, %v896_v56 }
 0x591   :  { %1926 = vrot.lane.b32.xlu2 %v1165_v59, %s2930_s2  ;;  %v1172_v1 = vmul.f32 %v4240_v47, %v897_v5  ;;  %v1371_v47 = vsel %vm1337_vm12, %v4265_v13, 0.0  ;;  %v1615_v13 = vsel %vm1337_vm12, %v4424_v8, 0.0  ;;  %v939_v8 = vand.u32 2147483648, %v4376_v38 }
 0x593   :  { %1930 = vrot.lane.b32.xlu0 %v1167_v57, %s2930_s2  ;;  %1378 = vadd.xlane.f32.xlu1 %v1377_v53  ;;  %v4470_v37 = vpop.xlane.xlu1 %1592  ;;  %v4492_v57 = vpop.xlane.xlu0 %698  ;;  %v1374_v53 = vsel %vm1337_vm12, %v4351_v15, 0.0  ;;  %v940_v56 = vor.u32 1.1754944e-38, %v939_v8 }
 0x594   :  { %vm918_vm5 = vweird.f32 %v4492_v57 }
 0x595   :  { %v1822_v41 = vpop.xlane.xlu2 %1821 }
 0x596   :  { %2823 = vrcp.f32 %v1822_v41 }
 0x597   :  { %2825 = vrcp.f32 %v1584_v6  ;;  %v931_v6 = vmul.f32 %v2822_v32, %v930_v10 }
 0x598   :  { %2827 = vrcp.f32 %v4389_v39 }
 0x599   :  { %1932 = vrot.lane.b32.xlu2 %v1168_v29, %s2930_s2  ;;  %v932_v41 = vadd.f32 %v2822_v32, %v931_v6 }
 0x59b   :  { %1619 = vadd.xlane.f32.xlu1 %v1618_v48  ;;  %v4478_v22 = vpop.xlane.xlu1 %1836  ;;  %v857_v48 = vadd.f32 %v2820_v58, %v856_v12  ;;  %v4509_v49 = vpop.xlane.xlu0 %1339 }
 0x59c   :  { %v2824_v59 = vpop.eup %2823 }
 0x59d   :  { %v4475_v20 = vpop.permute.xlu2 %1319  ;;  %v1884_v0 = vmul.f32 %v2824_v59, %v3767_v60  ;;  %v2826_v29 = vpop.eup %2825  ;;  %v864_v60 = vand.u32 2147483648, %v4249_v19  ;;  %v861_v3 = vsel %vm860_vm4, %v2820_v58, %v857_v48 }
 0x59e   :  { %v1644_v15 = vmul.f32 %v2826_v29, %v3779_v2  ;;  %v2828_v36 = vpop.eup %2827  ;;  %v937_v2 = vand.u32 2147483647, %v4376_v38 }
 0x59f   :  { %v865_v40 = vor.u32 1.1754944e-38, %v864_v60  ;;  %v869_v17 = vmul.f32 %v2828_v36, %v4389_v39  ;;  %vm874_vm13 = vweird.f32 %v2828_v36 }
 0x5a0   :  { %vm938_vm11 = vcmp.eq.f32.partialorder %v937_v2, 8.507059e+37  ;;  %vm875_vm15 = vmor %vm873_vm14, %vm874_vm13  ;;  %vm2335_vm13 = vcmask 400384   ;;  %vm2352_vm14 = vcmask 474112  }
 0x5a3   :  { %1863 = vadd.xlane.f32.xlu1 %v1862_v4  ;;  %v4488_v11 = vpop.xlane.xlu1 %1360  ;;  %v862_v4 = vand.u32 2147483647, %v4249_v19  ;;  %v936_v19 = vsel %vm935_vm10, %v2822_v32, %v932_v41  ;;  %v4519_v58 = vpop.permute.xlu0 %1561  ;;  %vm2301_vm10 = vcmask 261120  }
 0x5a5   :  { %v1346_v35 = vpop.xlane.xlu2 %1345  ;;  %vm863_vm9 = vcmp.eq.f32.partialorder %v862_v4, 8.507059e+37  ;;  %v5289_v4 = vld [vmem:[#allocation41_spill] sm:$0xff] }
 0x5a6   :  { %2829 = vrcp.f32 %v1346_v35  ;;  %v866_v27 = vsel %vm863_vm9, %v865_v40, %v861_v3  ;;  %v870_v35 = vsub.f32 1.0, %v869_v17  ;;  %v5290_v40 = vld [vmem:[#allocation43_spill] sm:$0xff] }
 0x5a8   :  { %v871_v32 = vmul.f32 %v2828_v36, %v870_v35 }
 0x5aa   :  { %v872_v54 = vadd.f32 %v2828_v36, %v871_v32 }
 0x5ab   :  { %v4504_v44 = vpop.xlane.xlu1 %1601  ;;  %v4530_v21 = vpop.xlane.xlu0 %1824 }
 0x5ac   :  { %v2830_v16 = vpop.eup %2829 }
 0x5ad   :  { %v4490_v18 = vpop.xlane.xlu2 %1589  ;;  %v1404_v5 = vmul.f32 %v2830_v16, %v3790_v31 }
 0x5b3   :  { %v4522_v38 = vpop.xlane.xlu1 %1845  ;;  %v4543_v29 = vpop.xlane.xlu0 %1586 }
 0x5b5   :  { %v1831_v24 = vpop.xlane.xlu2 %1830 }
 0x5b6   :  { %2831 = vrcp.f32 %v1831_v24  ;;  %v5288_v24 = vld [vmem:[#allocation46_spill] sm:$0xff] }
 0x5b7   :  { %2833 = vrcp.f32 %v4470_v37 }
 0x5bc   :  { %1940 = vrot.lane.b32.xlu1 %v1172_v1, %s2930_s2  ;;  %v867_v1 = vmul.f32 %v4029_v43, %v866_v27  ;;  %v879_v43 = vand.u32 2147483648, %v4389_v39  ;;  %v2832_v10 = vpop.eup %2831 }
 0x5bd   :  { %1613 = vadd.xlane.f32.xlu0 %v1612_v9  ;;  %v941_v9 = vsel %vm938_vm11, %v940_v56, %v936_v19  ;;  %v1355_v45 = vpop.xlane.xlu2 %1354  ;;  %v1887_v12 = vmul.f32 %v2832_v10, %v3851_v26  ;;  %v2834_v6 = vpop.eup %2833  ;;  %v1859_v19 = vsel %vm1337_vm12, %v4435_v33, 0.0  ;;  %v5292_v33 = vld [vmem:[#allocation50_spill] sm:$0xff]  ;;  %vm2318_vm11 = vcmask 326656  }
 0x5be   :  { %v942_v59 = vmul.f32 %v4121_v62, %v941_v9  ;;  %v1170_v28 = vmul.f32 %v4259_v51, %v867_v1  ;;  %v4535_v62 = vpop.xlane.xlu1 %1369  ;;  %2835 = vrcp.f32 %v1355_v45  ;;  %v4549_v26 = vpop.xlane.xlu0 %1348  ;;  %v1621_v1 = vsel %vm1337_vm12, %v4322_v30, 0.0 }
 0x5bf   :  { %v1383_v30 = vsel %vm1337_vm12, %v4475_v20, 0.0  ;;  %v5294_v20 = vld [vmem:[#allocation63_spill] sm:$0xff] }
 0x5c0   :  { %v1175_v31 = vmul.f32 %v4253_v50, %v942_v59 }
 0x5c2   :  { %1372 = vadd.xlane.f32.xlu2 %v1371_v47  ;;  %v877_v47 = vand.u32 2147483647, %v4389_v39 }
 0x5c4   :  { %2108 = vrot.lane.b32.xlu1 %v1884_v0, %s2925_s27  ;;  %v876_v0 = vsel %vm875_vm15, %v2828_v36, %v872_v54  ;;  %vm878_vm0 = vcmp.eq.f32.partialorder %v877_v47, 8.507059e+37  ;;  %v2836_v37 = vpop.eup %2835  ;;  %v1380_v54 = vsel %vm1337_vm12, %v4304_v25, 0.0  ;;  %v1624_v25 = vsel %vm1337_vm12, %v4519_v58, 0.0 }
 0x5c5   :  { %1375 = vadd.xlane.f32.xlu0 %v1374_v53  ;;  %v4537_v51 = vpop.xlane.xlu2 %1598  ;;  %v880_v53 = vor.u32 1.1754944e-38, %v879_v43  ;;  %v1407_v41 = vmul.f32 %v2836_v37, %v5289_v4  ;;  %v5293_v43 = vld [vmem:[#allocation52_spill] sm:$0xff]  ;;  %v1865_v37 = vsel %vm1337_vm12, %v4347_v14, 0.0  ;;  %vm2369_vm15 = vcmask 547840  }
 0x5c6   :  { %v1611_v48 = vpop.xlane.xlu1 %1610 }
 0x5c7   :  { %v881_v50 = vsel %vm878_vm0, %v880_v53, %v876_v0 }
 0x5c8   :  { %v882_v39 = vmul.f32 %v4069_v52, %v881_v50 }
 0x5ca   :  { %1616 = vadd.xlane.f32.xlu2 %v1615_v13  ;;  %v1171_v60 = vmul.f32 %v4309_v55, %v882_v39  ;;  %v4556_v55 = vpop.xlane.xlu0 %1833 }
 0x5cc   :  { %2046 = vrot.lane.b32.xlu1 %v1644_v15, %s2925_s27  ;;  %v1647_v15 = vmul.f32 %v2834_v6, %v5288_v24  ;;  %v907_v24 = vand.u32 2147483647, %v4450_v7 }
 0x5cd   :  { %v1840_v13 = vpop.xlane.xlu2 %1839 }
 0x5ce   :  { %v4551_v36 = vpop.permute.xlu1 %1918  ;;  %2837 = vrcp.f32 %v1840_v13  ;;  %vm908_vm4 = vcmp.eq.f32.partialorder %v907_v24, 8.507059e+37 }
 0x5cf   :  { %2839 = vrcp.f32 %v4504_v44 }
 0x5d2   :  { %1857 = vadd.xlane.f32.xlu2 %v1856_v23  ;;  %v5291_v23 = vld [vmem:[#allocation55_spill] sm:$0xff]  ;;  %v4569_v44 = vpop.xlane.xlu0 %1595 }
 0x5d4   :  { %1984 = vrot.lane.b32.xlu1 %v1404_v5, %s2925_s27  ;;  %v2838_v8 = vpop.eup %2837 }
 0x5d5   :  { %v1364_v52 = vpop.xlane.xlu2 %1363  ;;  %v1890_v17 = vmul.f32 %v2838_v8, %v5290_v40  ;;  %v2840_v16 = vpop.eup %2839 }
 0x5d6   :  { %v4558_v3 = vpop.permute.xlu1 %1928  ;;  %2841 = vrcp.f32 %v1364_v52  ;;  %v1650_v56 = vmul.f32 %v2840_v16, %v5291_v23 }
 0x5d9   :  { %1936 = vrot.lane.b32.xlu0 %v1170_v28, %s2930_s2 }
 0x5da   :  { %v4579_v32 = vpop.xlane.xlu0 %1357 }
 0x5dc   :  { %1946 = vrot.lane.b32.xlu1 %v1175_v31, %s2930_s2  ;;  %v2842_v5 = vpop.eup %2841 }
 0x5dd   :  { %v4561_v2 = vpop.xlane.xlu2 %1607  ;;  %v1410_v45 = vmul.f32 %v2842_v5, %v5292_v33 }
 0x5de   :  { %v4566_v27 = vpop.xlane.xlu1 %1854 }
 0x5e2   :  { %v4590_v50 = vpop.xlane.xlu0 %1842 }
 0x5e4   :  { %2114 = vrot.lane.b32.xlu1 %v1887_v12, %s2925_s27 }
 0x5e5   :  { %v1849_v35 = vpop.xlane.xlu2 %1848 }
 0x5e6   :  { %2843 = vrcp.f32 %v1849_v35  ;;  %v4575_v9 = vpop.permute.xlu1 %1934 }
 0x5e7   :  { %2845 = vrcp.f32 %v4450_v7 }
 0x5e8   :  { %2847 = vrcp.f32 %v1611_v48 }
 0x5e9   :  { %2849 = vrcp.f32 %v4509_v49 }
 0x5ea   :  { %1938 = vrot.lane.b32.xlu2 %v1171_v60, %s2930_s2  ;;  %v909_v60 = vand.u32 2147483648, %v4450_v7  ;;  %2851 = vrcp.f32 %v4492_v57 }
 0x5eb   :  { %2853 = vrcp.f32 %v4530_v21  ;;  %v5297_v21 = vld [vmem:[#allocation40_spill] sm:$0xff] }
 0x5ec   :  { %2052 = vrot.lane.b32.xlu1 %v1647_v15, %s2925_s27  ;;  %v2844_v59 = vpop.eup %2843  ;;  %v4604_v15 = vpop.xlane.xlu0 %1604  ;;  %v910_v4 = vor.u32 1.1754944e-38, %v909_v60  ;;  %2855 = vrcp.f32 %v4464_v34 }
 0x5ed   :  { %v2846_v28 = vpop.eup %2845  ;;  %v1893_v47 = vmul.f32 %v2844_v59, %v5293_v43  ;;  %v4592_v12 = vpop.permute.xlu2 %1920  ;;  %2857 = vrcp.f32 %v4543_v29  ;;  %v5298_v43 = vld [vmem:[#allocation39_spill] sm:$0xff] }
 0x5ee   :  { %v899_v0 = vmul.f32 %v2846_v28, %v4450_v7  ;;  %v2848_v10 = vpop.eup %2847  ;;  %vm904_vm1 = vweird.f32 %v2846_v28 }
 0x5ef   :  { %v1653_v39 = vmul.f32 %v2848_v10, %v5294_v20  ;;  %v2850_v58 = vpop.eup %2849  ;;  %vm905_vm3 = vmor %vm903_vm2, %vm904_vm1  ;;  %v924_v10 = vand.u32 2147483648, %v4492_v57 }
 0x5f0   :  { %v900_v53 = vsub.f32 1.0, %v899_v0  ;;  %v2852_v14 = vpop.eup %2851 }
 0x5f1   :  { %v914_v5 = vmul.f32 %v2852_v14, %v4492_v57  ;;  %vm919_vm12 = vweird.f32 %v2852_v14 }
 0x5f2   :  { %v901_v6 = vmul.f32 %v2846_v28, %v900_v53  ;;  %v922_v53 = vand.u32 2147483647, %v4492_v57  ;;  %vm920_vm8 = vmor %vm918_vm5, %vm919_vm12  ;;  %v5301_v57 = vld [vmem:[#allocation35_spill] sm:$0xff] }
 0x5f3   :  { %v915_v33 = vsub.f32 1.0, %v914_v5  ;;  %v5304_v5 = vld [vmem:[#allocation81_spill] sm:$0xff] }
 0x5f4   :  { %1990 = vrot.lane.b32.xlu1 %v1407_v41, %s2925_s27  ;;  %v902_v13 = vadd.f32 %v2846_v28, %v901_v6  ;;  %v5295_v41 = vld [vmem:[#allocation38_spill] sm:$0xff]  ;;  %v5300_v6 = vld [vmem:[#allocation36_spill] sm:$0xff]  ;;  %vm923_vm9 = vcmp.eq.f32.partialorder %v922_v53, 8.507059e+37 }
 0x5f5   :  { %v4608_v52 = vpop.permute.xlu2 %1926  ;;  %v1402_v8 = vmul.f32 %v2850_v58, %v5295_v41 }
 0x5f6   :  { %v906_v49 = vsel %vm905_vm3, %v2846_v28, %v902_v13 }
 0x5f7   :  { %v911_v7 = vsel %vm908_vm4, %v910_v4, %v906_v49 }
 0x5fc   :  { %2120 = vrot.lane.b32.xlu1 %v1890_v17, %s2925_s27  ;;  %v5296_v17 = vld [vmem:[#allocation78_spill] sm:$0xff] }
 0x5fd   :  { %v912_v16 = vmul.f32 %v5296_v17, %v911_v7  ;;  %v4619_v23 = vpop.permute.xlu2 %1932  ;;  %v5303_v17 = vld [vmem:[#allocation77_spill] sm:$0xff] }
 0x603   :  { %1860 = vadd.xlane.f32.xlu0 %v1859_v19  ;;  %v4616_v19 = vpop.xlane.xlu0 %1366 }
 0x604   :  { %2058 = vrot.lane.b32.xlu1 %v1650_v56, %s2925_s27  ;;  %v1173_v56 = vmul.f32 %v4271_v42, %v912_v16 }
 0x606   :  { %v4585_v31 = vpop.xlane.xlu1 %1378 }
 0x60b   :  { %1622 = vadd.xlane.f32.xlu0 %v1621_v1  ;;  %v2854_v1 = vpop.eup %2853 }
 0x60c   :  { %1996 = vrot.lane.b32.xlu1 %v1410_v45, %s2925_s27  ;;  %v4628_v45 = vpop.xlane.xlu0 %1851  ;;  %v1885_v28 = vmul.f32 %v2854_v1, %v5297_v21 }
 0x60e   :  { %v4598_v48 = vpop.xlane.xlu1 %1619 }
 0x613   :  { %1384 = vadd.xlane.f32.xlu0 %v1383_v30  ;;  %1381 = vadd.xlane.f32.xlu2 %v1380_v54  ;;  %v2856_v54 = vpop.eup %2855  ;;  %v916_v30 = vmul.f32 %v2852_v14, %v915_v33 }
 0x614   :  { %2126 = vrot.lane.b32.xlu1 %v1893_v47, %s2925_s27  ;;  %v1643_v34 = vmul.f32 %v2856_v54, %v5298_v43  ;;  %v2858_v47 = vpop.eup %2857 }
 0x615   :  { %v917_v0 = vadd.f32 %v2852_v14, %v916_v30  ;;  %v1645_v13 = vmul.f32 %v2858_v47, %v5300_v6 }
 0x616   :  { %v4612_v40 = vpop.xlane.xlu1 %1863 }
 0x617   :  { %v921_v58 = vsel %vm920_vm8, %v2852_v14, %v917_v0 }
 0x61b   :  { %1625 = vadd.xlane.f32.xlu2 %v1624_v25  ;;  %v4641_v25 = vpop.permute.xlu0 %1916 }
 0x61c   :  { %2064 = vrot.lane.b32.xlu1 %v1653_v39, %s2925_s27 }
 0x623   :  { %1866 = vadd.xlane.f32.xlu2 %v1865_v37 }
 0x627   :  { %1980 = vrot.lane.b32.xlu0 %v1402_v8, %s2925_s27  ;;  %v5302_v8 = vld [vmem:[#allocation44_spill] sm:$0xff] }
 0x62e   :  { %v4622_v35 = vpop.permute.xlu1 %1940 }
 0x62f   :  { %1942 = vrot.lane.b32.xlu0 %v1173_v56, %s2930_s2  ;;  %v4658_v56 = vpop.permute.xlu0 %1922 }
 0x635   :  { %v1373_v59 = vpop.xlane.xlu2 %1372 }
 0x636   :  { %2859 = vrcp.f32 %v1373_v59  ;;  %v4631_v42 = vpop.permute.xlu1 %2108  ;;  %v5305_v59 = vld [vmem:[#allocation64_spill] sm:$0xff] }
 0x637   :  { %2110 = vrot.lane.b32.xlu0 %v1885_v28, %s2925_s27  ;;  %2861 = vrcp.f32 %v4414_v46  ;;  %v5299_v46 = vld [vmem:[#allocation59_spill] sm:$0xff] }
 0x638   :  { %2863 = vrcp.f32 %v4549_v26  ;;  %v925_v26 = vor.u32 1.1754944e-38, %v924_v10  ;;  %v5306_v28 = vld [vmem:[#allocation47_spill] sm:$0xff]  ;;  %v5309_v10 = vld [vmem:[#allocation42_spill] sm:$0xff] }
 0x639   :  { %2865 = vrcp.f32 %v4556_v55 }
 0x63a   :  { %v926_v4 = vsel %vm923_vm9, %v925_v26, %v921_v58 }
 0x63b   :  { %2044 = vrot.lane.b32.xlu2 %v1643_v34, %s2925_s27  ;;  %v927_v16 = vmul.f32 %v5303_v17, %v926_v4  ;;  %v5307_v34 = vld [vmem:[#allocation37_spill] sm:$0xff] }
 0x63c   :  { %v2860_v29 = vpop.eup %2859  ;;  %v5314_v17 = vld [vmem:[#allocation49_spill] sm:$0xff] }
 0x63d   :  { %v4643_v20 = vpop.xlane.xlu2 %1616  ;;  %v1413_v39 = vmul.f32 %v2860_v29, %v5299_v46  ;;  %v2862_v60 = vpop.eup %2861  ;;  %v1174_v1 = vmul.f32 %v5304_v5, %v927_v16 }
 0x63e   :  { %v4647_v24 = vpop.permute.xlu1 %2046  ;;  %v1403_v37 = vmul.f32 %v2862_v60, %v5301_v57  ;;  %v2864_v49 = vpop.eup %2863 }
 0x63f   :  { %2002 = vrot.lane.b32.xlu1 %v1413_v39, %s2925_s27  ;;  %2048 = vrot.lane.b32.xlu0 %v1645_v13, %s2925_s27  ;;  %v1405_v7 = vmul.f32 %v2864_v49, %v5302_v8  ;;  %v2866_v33 = vpop.eup %2865 }
 0x640   :  { %v1888_v54 = vmul.f32 %v2866_v33, %v5306_v28 }
 0x643   :  { %1982 = vrot.lane.b32.xlu2 %v1403_v37, %s2925_s27  ;;  %v5312_v37 = vld [vmem:[#allocation48_spill] sm:$0xff] }
 0x645   :  { %v1858_v41 = vpop.xlane.xlu2 %1857 }
 0x646   :  { %2867 = vrcp.f32 %v1858_v41  ;;  %v4656_v14 = vpop.permute.xlu1 %1984  ;;  %v5313_v41 = vld [vmem:[#allocation57_spill] sm:$0xff] }
 0x647   :  { %1986 = vrot.lane.b32.xlu0 %v1405_v7, %s2925_s27  ;;  %2869 = vrcp.f32 %v4459_v61 }
 0x648   :  { %2871 = vrcp.f32 %v4569_v44  ;;  %v4673_v44 = vpop.permute.xlu0 %1924 }
 0x649   :  { %2873 = vrcp.f32 %v4598_v48  ;;  %v5308_v48 = vld [vmem:[#allocation74_spill] sm:$0xff] }
 0x64a   :  { %2875 = vrcp.f32 %v4490_v18  ;;  %v5310_v18 = vld [vmem:[#allocation45_spill] sm:$0xff] }
 0x64b   :  { %1944 = vrot.lane.b32.xlu2 %v1174_v1, %s2930_s2  ;;  %2877 = vrcp.f32 %v4579_v32  ;;  %v5311_v32 = vld [vmem:[#allocation53_spill] sm:$0xff]  ;;  %v5315_v1 = vld [vmem:[#allocation51_spill] sm:$0xff] }
 0x64c   :  { %v2868_v55 = vpop.eup %2867  ;;  %2879 = vrcp.f32 %v4468_v63 }
 0x64d   :  { %v1896_v21 = vmul.f32 %v2868_v55, %v5305_v59  ;;  %v2870_v30 = vpop.eup %2869  ;;  %2881 = vrcp.f32 %v4590_v50  ;;  %v5316_v59 = vld [vmem:[#allocation54_spill] sm:$0xff] }
 0x64e   :  { %v4668_v43 = vpop.permute.xlu1 %1946  ;;  %v2872_v61 = vpop.eup %2871  ;;  %v1886_v47 = vmul.f32 %v2870_v30, %v5307_v34  ;;  %2883 = vrcp.f32 %v4478_v22  ;;  %v5318_v34 = vld [vmem:[#allocation56_spill] sm:$0xff] }
 0x64f   :  { %2132 = vrot.lane.b32.xlu1 %v1896_v21, %s2925_s27  ;;  %2116 = vrot.lane.b32.xlu0 %v1888_v54, %s2925_s27  ;;  %v2874_v0 = vpop.eup %2873  ;;  %v1648_v53 = vmul.f32 %v2872_v61, %v5309_v10  ;;  %2885 = vrcp.f32 %v4604_v15  ;;  %v5320_v10 = vld [vmem:[#allocation10_spill] sm:$0xff] }
 0x650   :  { %v1656_v29 = vmul.f32 %v2874_v0, %v5308_v48  ;;  %v2876_v46 = vpop.eup %2875  ;;  %v4686_v60 = vpop.permute.xlu0 %1930  ;;  %2887 = vrcp.f32 %v4537_v51 }
 0x651   :  { %v1646_v6 = vmul.f32 %v2876_v46, %v5310_v18  ;;  %v2878_v13 = vpop.eup %2877  ;;  %2889 = vrcp.f32 %v4616_v19  ;;  %v5317_v19 = vld [vmem:[#allocation60_spill] sm:$0xff]  ;;  %v4728_v18 = vpop.permute.xlu2 %1938 }
 0x652   :  { %v1408_v58 = vmul.f32 %v2878_v13, %v5311_v32  ;;  %v2880_v26 = vpop.eup %2879  ;;  %2891 = vrcp.f32 %v4488_v11  ;;  %v5322_v13 = vld [vmem:[#allocation58_spill] sm:$0xff] }
 0x653   :  { %2112 = vrot.lane.b32.xlu2 %v1886_v47, %s2925_s27  ;;  %v1406_v63 = vmul.f32 %v2880_v26, %v5312_v37  ;;  %v2882_v49 = vpop.eup %2881  ;;  %2893 = vrcp.f32 %v4628_v45  ;;  %v5319_v45 = vld [vmem:[#allocation66_spill] sm:$0xff]  ;;  %v4736_v26 = vpop.f32.mrf.mxu3 }
 0x654   :  { %v1891_v8 = vmul.f32 %v2882_v49, %v5313_v41  ;;  %v2884_v50 = vpop.eup %2883  ;;  %2895 = vrcp.f32 %v4522_v38  ;;  %v5324_v41 = vld [vmem:[#allocation62_spill] sm:$0xff] }
 0x655   :  { %v1889_v16 = vmul.f32 %v2884_v50, %v5314_v17  ;;  %v2886_v22 = vpop.eup %2885 }
 0x656   :  { %v4680_v39 = vpop.permute.xlu1 %2114  ;;  %v1651_v33 = vmul.f32 %v2886_v22, %v5315_v1  ;;  %v2888_v15 = vpop.eup %2887 }
 0x657   :  { %2070 = vrot.lane.b32.xlu1 %v1656_v29, %s2925_s27  ;;  %2054 = vrot.lane.b32.xlu0 %v1648_v53, %s2925_s27  ;;  %v1649_v21 = vmul.f32 %v2888_v15, %v5316_v59  ;;  %v2890_v51 = vpop.eup %2889  ;;  %v5321_v53 = vmax.f32 %v5320_v10, 0.0  ;;  %v5327_v59 = vld [vmem:[#allocation65_spill] sm:$0xff] }
 0x658   :  { %v1614_v4 = vpop.xlane.xlu0 %1613  ;;  %v1411_v54 = vmul.f32 %v2890_v51, %v5317_v19  ;;  %v2892_v30 = vpop.eup %2891 }
 0x659   :  { %v1409_v11 = vmul.f32 %v2892_v30, %v5318_v34  ;;  %v2894_v47 = vpop.eup %2893  ;;  %2897 = vrcp.f32 %v1614_v4  ;;  %v2310_v46 = vsel %vm2301_vm10, %v5321_v53, %v4619_v23  ;;  %v5323_v23 = vld [vmem:[#allocation61_spill] sm:$0xff] }
 0x65a   :  { %v1894_v48 = vmul.f32 %v2894_v47, %v5319_v45  ;;  %v2896_v29 = vpop.eup %2895  ;;  %2899 = vrcp.f32 %v4561_v2  ;;  %v5329_v47 = vld [vmem:[#allocation67_spill] sm:$0xff] }
 0x65b   :  { %2050 = vrot.lane.b32.xlu2 %v1646_v6, %s2925_s27  ;;  %v1892_v32 = vmul.f32 %v2896_v29, %v5322_v13  ;;  %v4744_v50 = vpop.f32.mrf.mxu3  ;;  %v5330_v29 = vld [vmem:[#allocation2_spill] sm:$0xff] }
 0x65c   :  { %v5331_v10 = vmax.f32 %v5330_v29, 0.0  ;;  %v5343_v29 = vld [vmem:[#allocation19_spill] sm:$0xff] }
 0x65e   :  { %v4691_v57 = vpop.permute.xlu1 %2052  ;;  %v2302_v53 = vsel %vm2301_vm10, %v5331_v10, %v4641_v25  ;;  %v5344_v10 = vld [vmem:[#allocation13_spill] sm:$0xff] }
 0x65f   :  { %1992 = vrot.lane.b32.xlu0 %v1408_v58, %s2925_s27  ;;  %v2898_v58 = vpop.eup %2897 }
 0x660   :  { %v1376_v5 = vpop.xlane.xlu0 %1375  ;;  %v1654_v37 = vmul.f32 %v2898_v58, %v5323_v23  ;;  %v5333_v23 = vld [vmem:[#allocation70_spill] sm:$0xff] }
 0x661   :  { %2901 = vrcp.f32 %v1376_v5 }
 0x663   :  { %1988 = vrot.lane.b32.xlu2 %v1406_v63, %s2925_s27  ;;  %v2900_v63 = vpop.eup %2899  ;;  %v538_v19 = vpop.f32.mrf.mxu3 }
 0x664   :  { %v1652_v2 = vmul.f32 %v2900_v63, %v5324_v41 }
 0x666   :  { %v4699_v7 = vpop.permute.xlu1 %1990 }
 0x667   :  { %2122 = vrot.lane.b32.xlu0 %v1891_v8, %s2925_s27  ;;  %v2902_v8 = vpop.eup %2901 }
 0x668   :  { %v4714_v28 = vpop.permute.xlu0 %1936 }
 0x66b   :  { %2118 = vrot.lane.b32.xlu2 %v1889_v16, %s2925_s27  ;;  %v5325_v16 = vld [vmem:[#allocation73_spill] sm:$0xff] }
 0x66c   :  { %v1414_v22 = vmul.f32 %v2902_v8, %v5325_v16  ;;  %v5335_v8 = vld [vmem:[#allocation71_spill] sm:$0xff] }
 0x66e   :  { %v4707_v55 = vpop.permute.xlu1 %2120 }
 0x66f   :  { %2060 = vrot.lane.b32.xlu0 %v1651_v33, %s2925_s27  ;;  %v5326_v33 = vld [vmem:[#allocation68_spill] sm:$0xff] }
 0x673   :  { %2056 = vrot.lane.b32.xlu2 %v1649_v21, %s2925_s27 }
 0x676   :  { %v4717_v61 = vpop.permute.xlu1 %2058  ;;  %v1861_v0 = vpop.xlane.xlu0 %1860 }
 0x677   :  { %1998 = vrot.lane.b32.xlu0 %v1411_v54, %s2925_s27  ;;  %v5328_v54 = vld [vmem:[#allocation76_spill] sm:$0xff] }
 0x67b   :  { %1994 = vrot.lane.b32.xlu2 %v1409_v11, %s2925_s27 }
 0x67e   :  { %v1997_v38 = vpop.permute.xlu1 %1996  ;;  %v1623_v4 = vpop.xlane.xlu0 %1622 }
 0x67f   :  { %v4731_v6 = vsel %vm2318_vm11, %v2310_v46, %v1997_v38  ;;  %2128 = vrot.lane.b32.xlu0 %v1894_v48, %s2925_s27  ;;  %v5332_v46 = vld [vmem:[#allocation69_spill] sm:$0xff] }
 0x683   :  { %2124 = vrot.lane.b32.xlu2 %v1892_v32, %s2925_s27  ;;  %v4765_v32 = vpop.f32.mrf.mxu3 }
 0x686   :  { %v1382_v49 = vpop.xlane.xlu2 %1381  ;;  %v4769_v63 = vpop.permute.xlu1 %2126 }
 0x687   :  { %2903 = vrcp.f32 %v1382_v49  ;;  %2066 = vrot.lane.b32.xlu0 %v1654_v37, %s2925_s27 }
 0x688   :  { %2905 = vrcp.f32 %v4535_v62  ;;  %v1385_v62 = vpop.xlane.xlu0 %1384 }
 0x689   :  { %2907 = vrcp.f32 %v1861_v0 }
 0x68a   :  { %2909 = vrcp.f32 %v4566_v27 }
 0x68b   :  { %2062 = vrot.lane.b32.xlu2 %v1652_v2, %s2925_s27  ;;  %2911 = vrcp.f32 %v1623_v4  ;;  %v5334_v4 = vld [vmem:[#allocation28_spill] sm:$0xff] }
 0x68d   :  { %v2904_v17 = vpop.eup %2903 }
 0x68e   :  { %v2906_v5 = vpop.eup %2905  ;;  %v4747_v1 = vpop.xlane.xlu2 %1625  ;;  %v1416_v15 = vmul.f32 %v2904_v17, %v5326_v33 }
 0x68f   :  { %2004 = vrot.lane.b32.xlu0 %v1414_v22, %s2925_s27  ;;  %v1412_v21 = vmul.f32 %v2906_v5, %v5327_v59  ;;  %v2908_v51 = vpop.eup %2907 }
 0x690   :  { %2008 = vrot.lane.b32.xlu1 %v1416_v15, %s2925_s27  ;;  %v1897_v30 = vmul.f32 %v2908_v51, %v5328_v54  ;;  %v2910_v34 = vpop.eup %2909  ;;  %v5339_v51 = vld [vmem:[#allocation20_spill] sm:$0xff] }
 0x691   :  { %v1895_v0 = vmul.f32 %v2910_v34, %v5329_v47  ;;  %v2912_v45 = vpop.eup %2911  ;;  %v5341_v47 = vld [vmem:[#allocation30_spill] sm:$0xff] }
 0x692   :  { %v1657_v38 = vmul.f32 %v2912_v45, %v5332_v46  ;;  %v5342_v45 = vld [vmem:[#allocation18_spill] sm:$0xff] }
 0x693   :  { %2000 = vrot.lane.b32.xlu2 %v1412_v21, %s2925_s27  ;;  %v543_v21 = vpop.f32.mrf.mxu3 }
 0x696   :  { %v1867_v11 = vpop.xlane.xlu2 %1866 }
 0x697   :  { %2913 = vrcp.f32 %v1867_v11  ;;  %2134 = vrot.lane.b32.xlu0 %v1897_v30, %s2925_s27  ;;  %v4798_v30 = vpop.permute.xlu1 %2064  ;;  %v5340_v11 = vld [vmem:[#allocation72_spill] sm:$0xff] }
 0x698   :  { %2915 = vrcp.f32 %v4643_v20 }
 0x699   :  { %v1981_v27 = vpop.permute.xlu0 %1980  ;;  %2917 = vrcp.f32 %v1385_v62 }
 0x69a   :  { %v2319_v20 = vsel %vm2318_vm11, %v2302_v53, %v1981_v27  ;;  %2919 = vrcp.f32 %v4585_v31  ;;  %v5336_v31 = vld [vmem:[#allocation80_spill] sm:$0xff]  ;;  %v5345_v53 = vmax.f32 %v5344_v10, 0.0 }
 0x69b   :  { %2130 = vrot.lane.b32.xlu2 %v1895_v0, %s2925_s27  ;;  %2921 = vrcp.f32 %v4612_v40 }
 0x69c   :  { %2923 = vrcp.f32 %v4747_v1  ;;  %v2313_v46 = vsel %vm2301_vm10, %v5345_v53, %v4728_v18 }
 0x69d   :  { %v2914_v48 = vpop.eup %2913 }
 0x69e   :  { %v2916_v13 = vpop.eup %2915  ;;  %v2045_v58 = vpop.permute.xlu2 %2044  ;;  %v1899_v37 = vmul.f32 %v2914_v48, %v5333_v23  ;;  %v539_v48 = vadd.f32 %v538_v19, %v5342_v45 }
 0x69f   :  { %v2336_v49 = vsel %vm2335_vm13, %v2319_v20, %v2045_v58  ;;  %2072 = vrot.lane.b32.xlu0 %v1657_v38, %s2925_s27  ;;  %v1655_v17 = vmul.f32 %v2916_v13, %v5335_v8  ;;  %v2918_v16 = vpop.eup %2917  ;;  %v5346_v20 = vld [vmem:[#allocation75_spill] sm:$0xff]  ;;  %v545_v23 = vpop.f32.mrf.mxu3 }
 0x6a0   :  { %v2353_v25 = vsel %vm2352_vm14, %v2336_v49, %v4631_v42  ;;  %2138 = vrot.lane.b32.xlu1 %v1899_v37, %s2925_s27  ;;  %v1417_v22 = vmul.f32 %v2918_v16, %v5336_v31  ;;  %v2920_v5 = vpop.eup %2919  ;;  %v5337_v42 = vld [vmem:[#allocation3_spill] sm:$0xff]  ;;  %v5347_v37 = vld [vmem:[#allocation4_spill] sm:$0xff] }
 0x6a1   :  { %v2370_v41 = vsel %vm2369_vm15, %v2353_v25, %v5334_v4  ;;  %v4779_v2 = vpop.permute.xlu0 %1942  ;;  %v5338_v33 = vmax.f32 %v5337_v42, 0.0  ;;  %v1415_v27 = vmul.f32 %v2920_v5, %v5340_v11  ;;  %v2922_v40 = vpop.eup %2921  ;;  %v5348_v1 = vmax.f32 %v5347_v37, 0.0  ;;  %v5349_v16 = vld [vmem:[#allocation31_spill] sm:$0xff]  ;;  %v5352_v42 = vld [vmem:[#allocation5_spill] sm:$0xff] }
 0x6a2   :  { %2403 = vst [vmem:[%s5105_s7] sm:$0xff] %v2370_v41  ;;  %v1898_v58 = vmul.f32 %v2922_v40, %v5346_v20  ;;  %v536_v25 = vadd.f32 %v4744_v50, %v5342_v45  ;;  %v2924_v4 = vpop.eup %2923 }
 0x6a3   :  { %2068 = vrot.lane.b32.xlu2 %v1655_v17, %s2925_s27  ;;  %v2303_v15 = vsel %vm2301_vm10, %v5338_v33, %v4551_v36  ;;  %v2304_v49 = vsel %vm2301_vm10, %v5348_v1, %v4592_v12  ;;  %v5353_v33 = vmax.f32 %v5352_v42, 0.0 }
 0x6a4   :  { %v2321_v18 = vsel %vm2318_vm11, %v2304_v49, %v4656_v14  ;;  %v5351_v14 = vld [vmem:[#allocation79_spill] sm:$0xff] }
 0x6a5   :  { %v1658_v50 = vmul.f32 %v2924_v4, %v5351_v14 }
 0x6a6   :  { %v1983_v62 = vpop.permute.xlu2 %1982 }
 0x6a7   :  { %v2320_v59 = vsel %vm2318_vm11, %v2303_v15, %v1983_v62  ;;  %2010 = vrot.lane.b32.xlu0 %v1417_v22, %s2925_s27  ;;  %v5350_v22 = vld [vmem:[#allocation23_spill] sm:$0xff]  ;;  %v548_v5 = vpop.f32.mrf.mxu3  ;;  %v2305_v15 = vsel %vm2301_vm10, %v5353_v33, %v4658_v56  ;;  %v546_v62 = vadd.f32 %v545_v23, %v5342_v45  ;;  %v5367_v33 = vld [vmem:[#allocation24_spill] sm:$0xff] }
 0x6a8   :  { %2216 = vrot.lane.b32.xlu1 %v5339_v51, %s2925_s27  ;;  %v2337_v54 = vsel %vm2335_vm13, %v2320_v59, %v4647_v24 }
 0x6a9   :  { %v2111_v34 = vpop.permute.xlu0 %2110 }
 0x6aa   :  { %v2354_v36 = vsel %vm2352_vm14, %v2337_v54, %v2111_v34  ;;  %v5354_v34 = vld [vmem:[#allocation21_spill] sm:$0xff] }
 0x6ab   :  { %v2371_v0 = vsel %vm2369_vm15, %v2354_v36, %v5341_v47  ;;  %2006 = vrot.lane.b32.xlu2 %v1415_v27, %s2925_s27  ;;  %v534_v27 = vadd.f32 %v4736_v26, %v5342_v45  ;;  %v5355_v36 = vld [vmem:[#allocation32_spill] sm:$0xff] }
 0x6ac   :  { %2405 = vst [vmem:[%s5105_s7 + $0x10] sm:$0xff] %v2371_v0  ;;  %v544_v0 = vadd.f32 %v543_v21, %v5342_v45 }
 0x6ae   :  { %v4809_v24 = vpop.permute.xlu2 %1944 }
 0x6af   :  { %2212 = vrot.lane.b32.xlu0 %v5343_v29, %s2925_s27  ;;  %v550_v40 = vpop.f32.mrf.mxu3 }
 0x6b0   :  { %2222 = vrot.lane.b32.xlu1 %v539_v48, %s2925_s27  ;;  %v551_v14 = vadd.f32 %v550_v40, %v5342_v45 }
 0x6b1   :  { %v2003_v38 = vpop.permute.xlu1 %2002  ;;  %v2049_v13 = vpop.permute.xlu0 %2048 }
 0x6b2   :  { %v4821_v19 = vsel %vm2318_vm11, %v2313_v46, %v2003_v38  ;;  %v2338_v41 = vsel %vm2335_vm13, %v2321_v18, %v2049_v13  ;;  %v5358_v46 = vld [vmem:[#allocation25_spill] sm:$0xff] }
 0x6b3   :  { %2136 = vrot.lane.b32.xlu2 %v1898_v58, %s2925_s27  ;;  %v5359_v13 = vld [vmem:[#allocation33_spill] sm:$0xff]  ;;  %v5361_v58 = vld [vmem:[#allocation7_spill] sm:$0xff] }
 0x6b4   :  { %v5362_v23 = vmax.f32 %v5361_v58, 0.0  ;;  %v5374_v58 = vld [vmem:[#allocation16_spill] sm:$0xff] }
 0x6b6   :  { %v2113_v8 = vpop.permute.xlu2 %2112 }
 0x6b7   :  { %v2355_v17 = vsel %vm2352_vm14, %v2338_v41, %v2113_v8  ;;  %2218 = vrot.lane.b32.xlu0 %v536_v25, %s2925_s27  ;;  %v553_v37 = vpop.f32.mrf.mxu3  ;;  %v5363_v41 = vld [vmem:[#allocation26_spill] sm:$0xff] }
 0x6b8   :  { %v2372_v31 = vsel %vm2369_vm15, %v2355_v17, %v5349_v16  ;;  %2228 = vrot.lane.b32.xlu1 %v5350_v22, %s2925_s27  ;;  %v554_v49 = vadd.f32 %v553_v37, %v5342_v45  ;;  %v5364_v8 = vld [vmem:[#allocation34_spill] sm:$0xff] }
 0x6b9   :  { %2407 = vst [vmem:[%s5105_s7 + $0x20] sm:$0xff] %v2372_v31  ;;  %v1987_v12 = vpop.permute.xlu0 %1986 }
 0x6ba   :  { %v2322_v59 = vsel %vm2318_vm11, %v2305_v15, %v1987_v12 }
 0x6bb   :  { %2074 = vrot.lane.b32.xlu2 %v1658_v50, %s2925_s27 }
 0x6be   :  { %v2051_v51 = vpop.permute.xlu2 %2050 }
 0x6bf   :  { %v2339_v54 = vsel %vm2335_vm13, %v2322_v59, %v2051_v51  ;;  %2224 = vrot.lane.b32.xlu0 %v5354_v34, %s2925_s27 }
 0x6c0   :  { %v2356_v11 = vsel %vm2352_vm14, %v2339_v54, %v4680_v39  ;;  %2234 = vrot.lane.b32.xlu1 %v546_v62, %s2925_s27  ;;  %v5356_v39 = vld [vmem:[#allocation6_spill] sm:$0xff]  ;;  %v5370_v54 = vld [vmem:[#allocation29_spill] sm:$0xff] }
 0x6c1   :  { %v2373_v56 = vsel %vm2369_vm15, %v2356_v11, %v5355_v36  ;;  %v2117_v47 = vpop.permute.xlu0 %2116  ;;  %v5357_v48 = vmax.f32 %v5356_v39, 0.0  ;;  %v549_v11 = vadd.f32 %v548_v5, %v5342_v45  ;;  %v5373_v5 = vld [vmem:[#allocation27_spill] sm:$0xff] }
 0x6c2   :  { %2409 = vst [vmem:[%s5105_s7 + $0x30] sm:$0xff] %v2373_v56 }
 0x6c3   :  { %2214 = vrot.lane.b32.xlu2 %v534_v27, %s2925_s27  ;;  %v2306_v29 = vsel %vm2301_vm10, %v5357_v48, %v4673_v44  ;;  %v5360_v44 = vld [vmem:[#allocation22_spill] sm:$0xff] }
 0x6c6   :  { %v1989_v10 = vpop.permute.xlu2 %1988 }
 0x6c7   :  { %v2323_v26 = vsel %vm2318_vm11, %v2306_v29, %v1989_v10  ;;  %2230 = vrot.lane.b32.xlu0 %v544_v0, %s2925_s27  ;;  %v5371_v0 = vld [vmem:[#allocation11_spill] sm:$0xff]  ;;  %v555_v29 = vpop.f32.mrf.mxu3 }
 0x6c8   :  { %v2340_v53 = vsel %vm2335_vm13, %v2323_v26, %v4691_v57  ;;  %2240 = vrot.lane.b32.xlu1 %v5358_v46, %s2925_s27  ;;  %v2307_v57 = vsel %vm2301_vm10, %v5362_v23, %v4608_v52  ;;  %v541_v52 = vadd.f32 %v4765_v32, %v5342_v45  ;;  %v5372_v40 = vmax.f32 %v5371_v0, 0.0  ;;  %v2133_v26 = vpop.permute.xlu1 %2132 }
 0x6c9   :  { %v2357_v38 = vsel %vm2352_vm14, %v2340_v53, %v2117_v47  ;;  %v2055_v21 = vpop.permute.xlu0 %2054  ;;  %v2324_v1 = vsel %vm2318_vm11, %v2307_v57, %v4699_v7  ;;  %v5365_v7 = vld [vmem:[#allocation8_spill] sm:$0xff]  ;;  %v556_v53 = vadd.f32 %v555_v29, %v5342_v45  ;;  %v5375_v23 = vmax.f32 %v5374_v58, 0.0 }
 0x6ca   :  { %v2374_v20 = vsel %vm2369_vm15, %v2357_v38, %v5359_v13  ;;  %v2341_v25 = vsel %vm2335_vm13, %v2324_v1, %v2055_v21  ;;  %v5366_v16 = vmax.f32 %v5365_v7, 0.0  ;;  %v2311_v39 = vsel %vm2301_vm10, %v5372_v40, %v4575_v9  ;;  %v5376_v1 = vld [vmem:[#allocation14_spill] sm:$0xff] }
 0x6cb   :  { %2411 = vst [vmem:[%s5105_s7 + $0x40] sm:$0xff] %v2374_v20  ;;  %2220 = vrot.lane.b32.xlu2 %v5360_v44, %s2925_s27  ;;  %v2316_v57 = vsel %vm2301_vm10, %v5375_v23, %v4809_v24 }
 0x6cc   :  { %v2308_v31 = vsel %vm2301_vm10, %v5366_v16, %v4558_v3  ;;  %v5368_v3 = vld [vmem:[#allocation9_spill] sm:$0xff] }
 0x6cd   :  { %v5369_v15 = vmax.f32 %v5368_v3, 0.0 }
 0x6ce   :  { %v2119_v18 = vpop.permute.xlu2 %2118 }
 0x6cf   :  { %v2358_v4 = vsel %vm2352_vm14, %v2341_v25, %v2119_v18  ;;  %2236 = vrot.lane.b32.xlu0 %v5363_v41, %s2925_s27  ;;  %v2309_v62 = vsel %vm2301_vm10, %v5369_v15, %v4686_v60 }
 0x6d0   :  { %v2375_v17 = vsel %vm2369_vm15, %v2358_v4, %v5364_v8  ;;  %2246 = vrot.lane.b32.xlu1 %v554_v49, %s2925_s27  ;;  %v2071_v13 = vpop.permute.xlu1 %2070  ;;  %v5377_v49 = vmax.f32 %v5376_v1, 0.0 }
 0x6d1   :  { %2413 = vst [vmem:[%s5105_s7 + $0x50] sm:$0xff] %v2375_v17  ;;  %v1993_v22 = vpop.permute.xlu0 %1992 }
 0x6d2   :  { %v2325_v12 = vsel %vm2318_vm11, %v2308_v31, %v1993_v22  ;;  %v2314_v25 = vsel %vm2301_vm10, %v5377_v49, %v4622_v35 }
 0x6d3   :  { %2226 = vrot.lane.b32.xlu2 %v541_v52, %s2925_s27 }
 0x6d6   :  { %v2057_v50 = vpop.permute.xlu2 %2056 }
 0x6d7   :  { %v2342_v42 = vsel %vm2335_vm13, %v2325_v12, %v2057_v50  ;;  %2242 = vrot.lane.b32.xlu0 %v551_v14, %s2925_s27 }
 0x6d8   :  { %v2359_v12 = vsel %vm2352_vm14, %v2342_v42, %v4707_v55 }
 0x6d9   :  { %v2123_v32 = vpop.permute.xlu0 %2122 }
 0x6db   :  { %2232 = vrot.lane.b32.xlu2 %v5367_v33, %s2925_s27  ;;  %v5378_v33 = vld [vmem:[#allocation12_spill] sm:$0xff] }
 0x6dc   :  { %v5379_v3 = vmax.f32 %v5378_v33, 0.0 }
 0x6de   :  { %v1995_v59 = vpop.permute.xlu2 %1994  ;;  %v2312_v15 = vsel %vm2301_vm10, %v5379_v3, %v4714_v28 }
 0x6df   :  { %v2326_v51 = vsel %vm2318_vm11, %v2309_v62, %v1995_v59  ;;  %2248 = vrot.lane.b32.xlu0 %v5370_v54, %s2925_s27 }
 0x6e0   :  { %v2343_v34 = vsel %vm2335_vm13, %v2326_v51, %v4717_v61 }
 0x6e1   :  { %v2061_v27 = vpop.permute.xlu0 %2060  ;;  %v2360_v36 = vsel %vm2352_vm14, %v2343_v34, %v2123_v32 }
 0x6e2   :  { %v2344_v56 = vsel %vm2335_vm13, %v4731_v6, %v2061_v27 }
 0x6e3   :  { %2238 = vrot.lane.b32.xlu2 %v549_v11, %s2925_s27 }
 0x6e6   :  { %v2125_v60 = vpop.permute.xlu2 %2124 }
 0x6e7   :  { %v2361_v47 = vsel %vm2352_vm14, %v2344_v56, %v2125_v60 }
 0x6e9   :  { %v1999_v48 = vpop.permute.xlu0 %1998 }
 0x6ea   :  { %v2328_v61 = vsel %vm2318_vm11, %v2311_v39, %v1999_v48 }
 0x6eb   :  { %2244 = vrot.lane.b32.xlu2 %v5373_v5, %s2925_s27  ;;  %v5380_v5 = vld [vmem:[#allocation15_spill] sm:$0xff] }
 0x6ee   :  { %v2063_v10 = vpop.permute.xlu2 %2062 }
 0x6ef   :  { %v2345_v6 = vsel %vm2335_vm13, %v2328_v61, %v2063_v10 }
 0x6f0   :  { %v2362_v40 = vsel %vm2352_vm14, %v2345_v6, %v4769_v63 }
 0x6f1   :  { %v2129_v46 = vpop.permute.xlu0 %2128 }
 0x6f3   :  { %2250 = vrot.lane.b32.xlu2 %v556_v53, %s2925_s27 }
 0x6f6   :  { %v2001_v38 = vpop.permute.xlu2 %2000 }
 0x6f7   :  { %v2329_v62 = vsel %vm2318_vm11, %v2312_v15, %v2001_v38 }
 0x6f8   :  { %v2346_v51 = vsel %vm2335_vm13, %v2329_v62, %v4798_v30 }
 0x6f9   :  { %v2067_v21 = vpop.permute.xlu0 %2066  ;;  %v2363_v11 = vsel %vm2352_vm14, %v2346_v51, %v2129_v46 }
 0x6fa   :  { %v4940_v9 = vsel %vm2335_vm13, %v4821_v19, %v2067_v21 }
 0x6fe   :  { %v4942_v20 = vpop.permute.xlu2 %2130 }
 0x701   :  { %v2005_v44 = vpop.permute.xlu0 %2004 }
 0x702   :  { %v2009_v37 = vpop.permute.xlu1 %2008  ;;  %v2331_v19 = vsel %vm2318_vm11, %v2314_v25, %v2005_v44 }
 0x703   :  { %v4949_v45 = vsel %vm2318_vm11, %v2316_v57, %v2009_v37 }
 0x706   :  { %v2069_v18 = vpop.permute.xlu2 %2068 }
 0x707   :  { %v2348_v4 = vsel %vm2335_vm13, %v2331_v19, %v2069_v18 }
 0x708   :  { %v4958_v41 = vsel %vm2352_vm14, %v2348_v4, %v2133_v26 }
 0x709   :  { %v2135_v8 = vpop.permute.xlu0 %2134 }
 0x70e   :  { %v2007_v17 = vpop.permute.xlu2 %2006 }
 0x711   :  { %v4960_v24 = vpop.permute.xlu0 %2072 }
 0x712   :  { %v4962_v52 = vpop.permute.xlu1 %2138 }
 0x716   :  { %v4964_v7 = vpop.permute.xlu2 %2136 }
 0x719   :  { %v4966_v16 = vpop.permute.xlu0 %2010 }
 0x71a   :  { %v2217_v31 = vpop.permute.xlu1 %2216 }
 0x71b   :  { %v2377_v35 = vsel %vm2369_vm15, %v2360_v36, %v2217_v31 }
 0x71c   :  { %2417 = vst [vmem:[%s5105_s7 + $0x70] sm:$0xff] %v2377_v35  ;;  %v2350_v35 = vsel %vm2335_vm13, %v4949_v45, %v4960_v24 }
 0x71e   :  { %v4972_v22 = vpop.permute.xlu2 %2074 }
 0x721   :  { %v2213_v14 = vpop.permute.xlu0 %2212 }
 0x722   :  { %v2376_v50 = vsel %vm2369_vm15, %v2359_v12, %v2213_v14  ;;  %v2223_v32 = vpop.permute.xlu1 %2222 }
 0x723   :  { %2415 = vst [vmem:[%s5105_s7 + $0x60] sm:$0xff] %v2376_v50 }
 0x726   :  { %v2215_v59 = vpop.permute.xlu2 %2214 }
 0x727   :  { %v2259_v55 = vsel %vm2252_vm6, %v2213_v14, %v2215_v59  ;;  %v2367_v14 = vsel %vm2352_vm14, %v2350_v35, %v4964_v7 }
 0x728   :  { %v2393_v42 = vsel %vm2386_vm7, %v2259_v55, 0.0 }
 0x729   :  { %2416 = vst [vmem:[%s5105_s7 + $0x68] sm:$0xff] %v2393_v42  ;;  %v2219_v54 = vpop.permute.xlu0 %2218 }
 0x72a   :  { %v2260_v28 = vsel %vm2252_vm6, %v2217_v31, %v2219_v54  ;;  %v2229_v34 = vpop.permute.xlu1 %2228 }
 0x72b   :  { %v2394_v27 = vsel %vm2386_vm7, %v2260_v28, 0.0  ;;  %v2380_v36 = vsel %vm2369_vm15, %v2363_v11, %v2229_v34 }
 0x72c   :  { %2418 = vst [vmem:[%s5105_s7 + $0x78] sm:$0xff] %v2394_v27 }
 0x72d   :  { %2423 = vst [vmem:[%s5105_s7 + $0xa0] sm:$0xff] %v2380_v36 }
 0x72e   :  { %v2221_v30 = vpop.permute.xlu2 %2220 }
 0x72f   :  { %v2261_v56 = vsel %vm2252_vm6, %v2221_v30, %v2223_v32  ;;  %v2378_v60 = vsel %vm2369_vm15, %v2361_v47, %v2221_v30  ;;  %v5381_v47 = vmax.f32 %v5380_v5, 0.0 }
 0x730   :  { %v2395_v0 = vsel %vm2386_vm7, %v2261_v56, 0.0  ;;  %2419 = vst [vmem:[%s5105_s7 + $0x80] sm:$0xff] %v2378_v60 }
 0x731   :  { %2420 = vst [vmem:[%s5105_s7 + $0x88] sm:$0xff] %v2395_v0  ;;  %v2225_v39 = vpop.permute.xlu0 %2224  ;;  %v2315_v29 = vsel %vm2301_vm10, %v5381_v47, %v4779_v2 }
 0x732   :  { %v2379_v48 = vsel %vm2369_vm15, %v2362_v40, %v2225_v39  ;;  %v2235_v61 = vpop.permute.xlu1 %2234  ;;  %v2332_v10 = vsel %vm2318_vm11, %v2315_v29, %v2007_v17 }
 0x733   :  { %2421 = vst [vmem:[%s5105_s7 + $0x90] sm:$0xff] %v2379_v48  ;;  %v2349_v53 = vsel %vm2335_vm13, %v2332_v10, %v2071_v13  ;;  %v2364_v13 = vsel %vm2352_vm14, %v4940_v9, %v4942_v20 }
 0x734   :  { %v2366_v21 = vsel %vm2352_vm14, %v2349_v53, %v2135_v8 }
 0x736   :  { %v2227_v26 = vpop.permute.xlu2 %2226 }
 0x737   :  { %v2262_v63 = vsel %vm2252_vm6, %v2225_v39, %v2227_v26 }
 0x738   :  { %v2396_v6 = vsel %vm2386_vm7, %v2262_v63, 0.0 }
 0x739   :  { %2422 = vst [vmem:[%s5105_s7 + $0x98] sm:$0xff] %v2396_v6  ;;  %v2231_v46 = vpop.permute.xlu0 %2230 }
 0x73a   :  { %v2263_v2 = vsel %vm2252_vm6, %v2229_v34, %v2231_v46  ;;  %v2241_v38 = vpop.permute.xlu1 %2240 }
 0x73b   :  { %v2397_v44 = vsel %vm2386_vm7, %v2263_v2, 0.0  ;;  %v2383_v58 = vsel %vm2369_vm15, %v2366_v21, %v2241_v38 }
 0x73c   :  { %2424 = vst [vmem:[%s5105_s7 + $0xa8] sm:$0xff] %v2397_v44 }
 0x73d   :  { %2429 = vst [vmem:[%s5105_s7 + $0xd0] sm:$0xff] %v2383_v58 }
 0x73e   :  { %v2233_v23 = vpop.permute.xlu2 %2232 }
 0x73f   :  { %v2264_v57 = vsel %vm2252_vm6, %v2233_v23, %v2235_v61  ;;  %v2381_v37 = vsel %vm2369_vm15, %v2364_v13, %v2233_v23 }
 0x740   :  { %v2398_v1 = vsel %vm2386_vm7, %v2264_v57, 0.0  ;;  %2425 = vst [vmem:[%s5105_s7 + $0xb0] sm:$0xff] %v2381_v37 }
 0x741   :  { %2426 = vst [vmem:[%s5105_s7 + $0xb8] sm:$0xff] %v2398_v1  ;;  %v2237_v49 = vpop.permute.xlu0 %2236 }
 0x742   :  { %v2382_v25 = vsel %vm2369_vm15, %v4958_v41, %v2237_v49  ;;  %v5382_v41 = vld [vmem:[#allocation17_spill] sm:$0xff]  ;;  %v2247_v32 = vpop.permute.xlu1 %2246 }
 0x743   :  { %2427 = vst [vmem:[%s5105_s7 + $0xc0] sm:$0xff] %v2382_v25  ;;  %v5383_v17 = vmax.f32 %v5382_v41, 0.0 }
 0x745   :  { %v2317_v31 = vsel %vm2301_vm10, %v5383_v17, %v4668_v43 }
 0x746   :  { %v2239_v9 = vpop.permute.xlu2 %2238  ;;  %v2334_v12 = vsel %vm2318_vm11, %v2317_v31, %v4966_v16 }
 0x747   :  { %v2265_v20 = vsel %vm2252_vm6, %v2237_v49, %v2239_v9  ;;  %v2351_v50 = vsel %vm2335_vm13, %v2334_v12, %v4972_v22 }
 0x748   :  { %v2399_v19 = vsel %vm2386_vm7, %v2265_v20, 0.0  ;;  %v2368_v45 = vsel %vm2352_vm14, %v2351_v50, %v4962_v52 }
 0x749   :  { %2428 = vst [vmem:[%s5105_s7 + $0xc8] sm:$0xff] %v2399_v19  ;;  %v2243_v18 = vpop.permute.xlu0 %2242 }
 0x74a   :  { %v2266_v4 = vsel %vm2252_vm6, %v2241_v38, %v2243_v18 }
 0x74b   :  { %v2400_v8 = vsel %vm2386_vm7, %v2266_v4, 0.0 }
 0x74c   :  { %2430 = vst [vmem:[%s5105_s7 + $0xd8] sm:$0xff] %v2400_v8 }
 0x74e   :  { %v2245_v33 = vpop.permute.xlu2 %2244 }
 0x74f   :  { %v2267_v43 = vsel %vm2252_vm6, %v2245_v33, %v2247_v32  ;;  %v2384_v3 = vsel %vm2369_vm15, %v2367_v14, %v2245_v33 }
 0x750   :  { %v2401_v15 = vsel %vm2386_vm7, %v2267_v43, 0.0  ;;  %2431 = vst [vmem:[%s5105_s7 + $0xe0] sm:$0xff] %v2384_v3 }
 0x751   :  { %2432 = vst [vmem:[%s5105_s7 + $0xe8] sm:$0xff] %v2401_v15  ;;  %v2249_v24 = vpop.permute.xlu0 %2248 }
 0x752   :  { %v2385_v7 = vsel %vm2369_vm15, %v2368_v45, %v2249_v24 }
 0x753   :  { %2433 = vst [vmem:[%s5105_s7 + $0xf0] sm:$0xff] %v2385_v7 }
 0x756   :  { %v2251_v16 = vpop.permute.xlu2 %2250 }
 0x757   :  { %v2268_v22 = vsel %vm2252_vm6, %v2249_v24, %v2251_v16 }
 0x758   :  { %v2402_v62 = vsel %vm2386_vm7, %v2268_v22, 0.0 }
 0x759   :  { %2434 = vst [vmem:[%s5105_s7 + $0xf8] sm:$0xff] %v2402_v62 }

</bundles_post_ra>
